<compile_context>
chip_gen: v7x
topology: tpu7x:2x2x1
jax: 0.10.0
libtpu: 0.0.40
codegen_flags: <defaults>
</compile_context>

<pallas_src>
import functools

import jax
import jax.numpy as jnp
from jax import lax
from jax.experimental import pallas as pl
from jax.experimental.pallas import tpu as pltpu


def _vecint_kernel(base_ref, vec_ref, out_ref, flat_sc, u_sc, *,
                   H, W, nsteps, scale, block_b):
    P = H * W
    # Loop-invariant tables (tiny: (1, P) coords come in as a resident input,
    # the source-index iotas are single columns).
    base_y = base_ref[0:1, :]                                 # (1, P) f32
    base_x = base_ref[1:2, :]                                 # (1, P) f32
    sy_col = lax.broadcasted_iota(jnp.int32, (H, 1), 0)       # source row index
    sx_col = lax.broadcasted_iota(jnp.int32, (W, 1), 0)       # source col index
    zero = jnp.float32(0.0)

    def warp(v):
        # Sample the field v at (y + v_y, x + v_x): bilinear, align_corners=True,
        # zeros padding.  v: (2, P) f32 flattened; returns (2, P) f32.

        # --- un-flatten (2, P) -> (2H, W) through VMEM scratch: 2H static
        #     lane-slice copies, no matmul, no lane-changing vector reshape.
        flat_sc[...] = v
        for c in range(2):
            for sy in range(H):
                r = c * H + sy
                u_sc[r:r + 1, :] = flat_sc[c:c + 1, sy * W:(sy + 1) * W]
        U = u_sc[...]                                         # (2H, W)

        # --- bilinear sample coordinates per output pixel.
        py = base_y + v[0:1, :]
        px = base_x + v[1:2, :]
        y0f = jnp.floor(py)
        x0f = jnp.floor(px)
        wy1 = py - y0f
        wy0 = 1.0 - wy1
        wx1 = px - x0f
        wx0 = 1.0 - wx1
        y0 = y0f.astype(jnp.int32)
        x0 = x0f.astype(jnp.int32)

        # --- separable one-hot gather weights via nested selects.  Out-of-range
        #     corners never match the [0,H)/[0,W) iota columns, so zeros padding
        #     is handled implicitly (per-axis, exactly equivalent to the
        #     per-corner in-bounds mask since it factorizes).
        Wy = jnp.where(sy_col == y0, wy0,
                       jnp.where(sy_col == y0 + 1, wy1, zero))    # (H, P)
        Wx = jnp.where(sx_col == x0, wx0,
                       jnp.where(sx_col == x0 + 1, wx1, zero))    # (W, P)

        # --- stage 1 (MXU): gather along x.  G[c*H+sy, i] = sum_sx U*Wx.
        G = jnp.dot(U, Wx, preferred_element_type=jnp.float32)   # (2H, P)
        # --- stage 2 (VPU/XLU): gather along y via weighted sublane reduction.
        out0 = jnp.sum(G[0:H, :] * Wy, axis=0, keepdims=True)    # (1, P)
        out1 = jnp.sum(G[H:2 * H, :] * Wy, axis=0, keepdims=True)
        return jnp.concatenate([out0, out1], axis=0)              # (2, P)

    for bi in range(block_b):
        v = vec_ref[bi].astype(jnp.float32) * scale               # (2, P)
        # Fully-unrolled integration loop (nsteps is a small static constant);
        # equivalent to lax.fori_loop(..., unroll=True) and gives the LLO
        # scheduler full cross-step visibility.
        for _ in range(nsteps):
            v = v + warp(v)
        out_ref[bi] = v.astype(out_ref.dtype)


def vecint(vec, nsteps, *, block_b=None):
    """vec: (B, 2, H, W) flow field (NCHW); returns integrated field, same shape/dtype."""
    B, C, H, W = vec.shape
    assert C == 2, "2-D flow field expected: channels = ndims = 2"
    assert nsteps >= 0
    P = H * W
    scale = 1.0 / 2 ** nsteps

    if block_b is None:
        # Keep >= 2 grid points when possible (both v7x TensorCores get work),
        # otherwise amortize per-grid-step overhead over the whole batch.
        block_b = B // 2 if (B >= 2 and B % 2 == 0) else 1
    assert B % block_b == 0
    nb = B // block_b

    vec_flat = vec.reshape(B, C, P)   # native dtype; upcast happens in-kernel

    # Loop-invariant output-pixel base coordinates, built once by XLA and kept
    # resident in VMEM across the grid via a constant index_map.
    ys, xs = jnp.meshgrid(jnp.arange(H, dtype=jnp.float32),
                          jnp.arange(W, dtype=jnp.float32), indexing="ij")
    base = jnp.stack([ys.reshape(-1), xs.reshape(-1)], axis=0)    # (2, P) f32

    # VMEM budget from actual buffers (resident tables + per-step transients +
    # double-buffered I/O blocks), with 2x headroom; capped v7x-safe.
    esize = jnp.dtype(vec.dtype).itemsize
    est = 4 * ((3 * H + W + 24) * P + 2 * H * W) + 4 * esize * block_b * C * P
    vmem_limit = int(min(64 * 1024 * 1024, max(24 * 1024 * 1024, 2 * est)))

    kernel = functools.partial(_vecint_kernel, H=H, W=W, nsteps=nsteps,
                               scale=scale, block_b=block_b)
    out = pl.pallas_call(
        kernel,
        out_shape=jax.ShapeDtypeStruct((B, C, P), vec.dtype),
        grid_spec=pltpu.PrefetchScalarGridSpec(
            num_scalar_prefetch=0,
            grid=(nb,),
            in_specs=[
                pl.BlockSpec((C, P), lambda b: (0, 0)),            # base coords, resident
                pl.BlockSpec((block_b, C, P), lambda b: (b, 0, 0)),
            ],
            out_specs=pl.BlockSpec((block_b, C, P), lambda b: (b, 0, 0)),
            scratch_shapes=[
                pltpu.VMEM((C, P), jnp.float32),       # flat field staging
                pltpu.VMEM((2 * H, W), jnp.float32),   # un-flattened field (2H, W)
            ],
        ),
        compiler_params=pltpu.CompilerParams(
            dimension_semantics=("parallel",),
            vmem_limit_bytes=vmem_limit,
        ),
    )(base, vec_flat)
    return out.reshape(B, C, H, W)


# ---------------- pure-JAX reference (numerical sanity check) ----------------
def _warp_ref(v):
    # v: (2, H, W) — warp v by itself, bilinear, zeros padding, align_corners=True.
    _, H, W = v.shape
    ys, xs = jnp.meshgrid(jnp.arange(H, dtype=jnp.float32),
                          jnp.arange(W, dtype=jnp.float32), indexing="ij")
    py = ys + v[0]
    px = xs + v[1]
    y0f = jnp.floor(py)
    x0f = jnp.floor(px)
    wy1 = py - y0f
    wy0 = 1.0 - wy1
    wx1 = px - x0f
    wx0 = 1.0 - wx1
    y0 = y0f.astype(jnp.int32)
    x0 = x0f.astype(jnp.int32)
    out = jnp.zeros_like(v)
    for dy, wy in ((0, wy0), (1, wy1)):
        for dx, wx in ((0, wx0), (1, wx1)):
            yy = y0 + dy
            xx = x0 + dx
            inb = ((yy >= 0) & (yy < H) & (xx >= 0) & (xx < W)).astype(jnp.float32)
            yyc = jnp.clip(yy, 0, H - 1)
            xxc = jnp.clip(xx, 0, W - 1)
            val = v[:, yyc, xxc]                              # (2, H, W)
            out = out + (wy * wx * inb)[None] * val
    return out


def vecint_ref(vec, nsteps):
    v = vec.astype(jnp.float32) * (1.0 / 2 ** nsteps)
    for _ in range(nsteps):
        v = v + jax.vmap(_warp_ref)(v)
    return v


if __name__ == "__main__":
    B, C, H, W = 2, 2, 16, 16
    nsteps = 4
    key = jax.random.PRNGKey(0)
    vec = jax.random.normal(key, (B, C, H, W), dtype=jnp.float32) * 2.0

    out = jax.block_until_ready(vecint(vec, nsteps))
    ref = jax.block_until_ready(vecint_ref(vec, nsteps))

    assert out.shape == (B, C, H, W)
    err = float(jnp.max(jnp.abs(out.astype(jnp.float32) - ref)))
    assert err < 1e-4, err
    print("KERNEL_OK")
</pallas_src>

<mosaic_0001>
module attributes {stable_mosaic.version = 11 : i64} {
  func.func @_vecint_kernel(%arg0: i32, %arg1: memref<2x256xf32, #tpu.memory_space<vmem>>, %arg2: memref<1x2x256xf32, #tpu.memory_space<vmem>>, %arg3: memref<1x2x256xf32, #tpu.memory_space<vmem>>, %arg4: memref<2x256xf32, #tpu.memory_space<vmem>>, %arg5: memref<32x16xf32, #tpu.memory_space<vmem>>) attributes {dimension_semantics = [#tpu.dimension_semantics<parallel>], iteration_bounds = array<i64: 2>, scalar_prefetch = 0 : i64, scratch_operands = 2 : i64, tpu.core_type = #tpu.core_type<tc>, window_params = [{pipeline_mode = #tpu.pipeline_mode<synchronous>, transform_indices = @transform_0, window_bounds = array<i64: 2, 256>}, {transform_indices = @transform_1, window_bounds = array<i64: 1, 2, 256>}, {transform_indices = @transform_2, window_bounds = array<i64: 1, 2, 256>}]} {
    %c0 = arith.constant 0 : index
    %c0_0 = arith.constant 0 : index
    %0 = vector.load %arg1[%c0, %c0_0] : memref<2x256xf32, #tpu.memory_space<vmem>>, vector<1x256xf32>
    %c1 = arith.constant 1 : index
    %c0_1 = arith.constant 0 : index
    %1 = vector.load %arg1[%c1, %c0_1] : memref<2x256xf32, #tpu.memory_space<vmem>>, vector<1x256xf32>
    %2 = tpu.iota {dimensions = array<i32: 0>} : vector<16x1xi32>
    %3 = tpu.iota {dimensions = array<i32: 0>} : vector<16x1xi32>
    %c0_2 = arith.constant 0 : index
    %c0_3 = arith.constant 0 : index
    %c0_4 = arith.constant 0 : index
    %4 = vector.load %arg2[%c0_2, %c0_3, %c0_4] : memref<1x2x256xf32, #tpu.memory_space<vmem>>, vector<1x2x256xf32>
    %5 = vector.shape_cast %4 : vector<1x2x256xf32> to vector<2x256xf32>
    %cst = arith.constant 6.250000e-02 : f32
    %6 = vector.broadcast %cst : f32 to vector<2x256xf32>
    %7 = arith.mulf %5, %6 : vector<2x256xf32>
    %c0_5 = arith.constant 0 : index
    %c0_6 = arith.constant 0 : index
    %8 = vector.load %arg4[%c0_5, %c0_6] : memref<2x256xf32, #tpu.memory_space<vmem>>, vector<2x256xf32>
    tpu.vector_store %arg4[%c0_5, %c0_6], %7 {strides = array<i32>} : memref<2x256xf32, #tpu.memory_space<vmem>>, vector<2x256xf32>,
    %c0_7 = arith.constant 0 : index
    %c0_8 = arith.constant 0 : index
    %9 = vector.load %arg4[%c0_7, %c0_8] : memref<2x256xf32, #tpu.memory_space<vmem>>, vector<1x16xf32>
    %c0_9 = arith.constant 0 : index
    %c0_10 = arith.constant 0 : index
    %10 = vector.load %arg5[%c0_9, %c0_10] : memref<32x16xf32, #tpu.memory_space<vmem>>, vector<1x16xf32>
    tpu.vector_store %arg5[%c0_9, %c0_10], %9 {strides = array<i32>} : memref<32x16xf32, #tpu.memory_space<vmem>>, vector<1x16xf32>,
    %c0_11 = arith.constant 0 : index
    %c16 = arith.constant 16 : index
    %11 = vector.load %arg4[%c0_11, %c16] : memref<2x256xf32, #tpu.memory_space<vmem>>, vector<1x16xf32>
    %c1_12 = arith.constant 1 : index
    %c0_13 = arith.constant 0 : index
    %12 = vector.load %arg5[%c1_12, %c0_13] : memref<32x16xf32, #tpu.memory_space<vmem>>, vector<1x16xf32>
    tpu.vector_store %arg5[%c1_12, %c0_13], %11 {strides = array<i32>} : memref<32x16xf32, #tpu.memory_space<vmem>>, vector<1x16xf32>,
    %c0_14 = arith.constant 0 : index
    %c32 = arith.constant 32 : index
    %13 = vector.load %arg4[%c0_14, %c32] : memref<2x256xf32, #tpu.memory_space<vmem>>, vector<1x16xf32>
    %c2 = arith.constant 2 : index
    %c0_15 = arith.constant 0 : index
    %14 = vector.load %arg5[%c2, %c0_15] : memref<32x16xf32, #tpu.memory_space<vmem>>, vector<1x16xf32>
    tpu.vector_store %arg5[%c2, %c0_15], %13 {strides = array<i32>} : memref<32x16xf32, #tpu.memory_space<vmem>>, vector<1x16xf32>,
    %c0_16 = arith.constant 0 : index
    %c48 = arith.constant 48 : index
    %15 = vector.load %arg4[%c0_16, %c48] : memref<2x256xf32, #tpu.memory_space<vmem>>, vector<1x16xf32>
    %c3 = arith.constant 3 : index
    %c0_17 = arith.constant 0 : index
    %16 = vector.load %arg5[%c3, %c0_17] : memref<32x16xf32, #tpu.memory_space<vmem>>, vector<1x16xf32>
    tpu.vector_store %arg5[%c3, %c0_17], %15 {strides = array<i32>} : memref<32x16xf32, #tpu.memory_space<vmem>>, vector<1x16xf32>,
    %c0_18 = arith.constant 0 : index
    %c64 = arith.constant 64 : index
    %17 = vector.load %arg4[%c0_18, %c64] : memref<2x256xf32, #tpu.memory_space<vmem>>, vector<1x16xf32>
    %c4 = arith.constant 4 : index
    %c0_19 = arith.constant 0 : index
    %18 = vector.load %arg5[%c4, %c0_19] : memref<32x16xf32, #tpu.memory_space<vmem>>, vector<1x16xf32>
    tpu.vector_store %arg5[%c4, %c0_19], %17 {strides = array<i32>} : memref<32x16xf32, #tpu.memory_space<vmem>>, vector<1x16xf32>,
    %c0_20 = arith.constant 0 : index
    %c80 = arith.constant 80 : index
    %19 = vector.load %arg4[%c0_20, %c80] : memref<2x256xf32, #tpu.memory_space<vmem>>, vector<1x16xf32>
    %c5 = arith.constant 5 : index
    %c0_21 = arith.constant 0 : index
    %20 = vector.load %arg5[%c5, %c0_21] : memref<32x16xf32, #tpu.memory_space<vmem>>, vector<1x16xf32>
    tpu.vector_store %arg5[%c5, %c0_21], %19 {strides = array<i32>} : memref<32x16xf32, #tpu.memory_space<vmem>>, vector<1x16xf32>,
    %c0_22 = arith.constant 0 : index
    %c96 = arith.constant 96 : index
    %21 = vector.load %arg4[%c0_22, %c96] : memref<2x256xf32, #tpu.memory_space<vmem>>, vector<1x16xf32>
    %c6 = arith.constant 6 : index
    %c0_23 = arith.constant 0 : index
    %22 = vector.load %arg5[%c6, %c0_23] : memref<32x16xf32, #tpu.memory_space<vmem>>, vector<1x16xf32>
    tpu.vector_store %arg5[%c6, %c0_23], %21 {strides = array<i32>} : memref<32x16xf32, #tpu.memory_space<vmem>>, vector<1x16xf32>,
    %c0_24 = arith.constant 0 : index
    %c112 = arith.constant 112 : index
    %23 = vector.load %arg4[%c0_24, %c112] : memref<2x256xf32, #tpu.memory_space<vmem>>, vector<1x16xf32>
    %c7 = arith.constant 7 : index
    %c0_25 = arith.constant 0 : index
    %24 = vector.load %arg5[%c7, %c0_25] : memref<32x16xf32, #tpu.memory_space<vmem>>, vector<1x16xf32>
    tpu.vector_store %arg5[%c7, %c0_25], %23 {strides = array<i32>} : memref<32x16xf32, #tpu.memory_space<vmem>>, vector<1x16xf32>,
    %c0_26 = arith.constant 0 : index
    %c128 = arith.constant 128 : index
    %25 = vector.load %arg4[%c0_26, %c128] : memref<2x256xf32, #tpu.memory_space<vmem>>, vector<1x16xf32>
    %c8 = arith.constant 8 : index
    %c0_27 = arith.constant 0 : index
    %26 = vector.load %arg5[%c8, %c0_27] : memref<32x16xf32, #tpu.memory_space<vmem>>, vector<1x16xf32>
    tpu.vector_store %arg5[%c8, %c0_27], %25 {strides = array<i32>} : memref<32x16xf32, #tpu.memory_space<vmem>>, vector<1x16xf32>,
    %c0_28 = arith.constant 0 : index
    %c144 = arith.constant 144 : index
    %27 = vector.load %arg4[%c0_28, %c144] : memref<2x256xf32, #tpu.memory_space<vmem>>, vector<1x16xf32>
    %c9 = arith.constant 9 : index
    %c0_29 = arith.constant 0 : index
    %28 = vector.load %arg5[%c9, %c0_29] : memref<32x16xf32, #tpu.memory_space<vmem>>, vector<1x16xf32>
    tpu.vector_store %arg5[%c9, %c0_29], %27 {strides = array<i32>} : memref<32x16xf32, #tpu.memory_space<vmem>>, vector<1x16xf32>,
    %c0_30 = arith.constant 0 : index
    %c160 = arith.constant 160 : index
    %29 = vector.load %arg4[%c0_30, %c160] : memref<2x256xf32, #tpu.memory_space<vmem>>, vector<1x16xf32>
    %c10 = arith.constant 10 : index
    %c0_31 = arith.constant 0 : index
    %30 = vector.load %arg5[%c10, %c0_31] : memref<32x16xf32, #tpu.memory_space<vmem>>, vector<1x16xf32>
    tpu.vector_store %arg5[%c10, %c0_31], %29 {strides = array<i32>} : memref<32x16xf32, #tpu.memory_space<vmem>>, vector<1x16xf32>,
    %c0_32 = arith.constant 0 : index
    %c176 = arith.constant 176 : index
    %31 = vector.load %arg4[%c0_32, %c176] : memref<2x256xf32, #tpu.memory_space<vmem>>, vector<1x16xf32>
    %c11 = arith.constant 11 : index
    %c0_33 = arith.constant 0 : index
    %32 = vector.load %arg5[%c11, %c0_33] : memref<32x16xf32, #tpu.memory_space<vmem>>, vector<1x16xf32>
    tpu.vector_store %arg5[%c11, %c0_33], %31 {strides = array<i32>} : memref<32x16xf32, #tpu.memory_space<vmem>>, vector<1x16xf32>,
    %c0_34 = arith.constant 0 : index
    %c192 = arith.constant 192 : index
    %33 = vector.load %arg4[%c0_34, %c192] : memref<2x256xf32, #tpu.memory_space<vmem>>, vector<1x16xf32>
    %c12 = arith.constant 12 : index
    %c0_35 = arith.constant 0 : index
    %34 = vector.load %arg5[%c12, %c0_35] : memref<32x16xf32, #tpu.memory_space<vmem>>, vector<1x16xf32>
    tpu.vector_store %arg5[%c12, %c0_35], %33 {strides = array<i32>} : memref<32x16xf32, #tpu.memory_space<vmem>>, vector<1x16xf32>,
    %c0_36 = arith.constant 0 : index
    %c208 = arith.constant 208 : index
    %35 = vector.load %arg4[%c0_36, %c208] : memref<2x256xf32, #tpu.memory_space<vmem>>, vector<1x16xf32>
    %c13 = arith.constant 13 : index
    %c0_37 = arith.constant 0 : index
    %36 = vector.load %arg5[%c13, %c0_37] : memref<32x16xf32, #tpu.memory_space<vmem>>, vector<1x16xf32>
    tpu.vector_store %arg5[%c13, %c0_37], %35 {strides = array<i32>} : memref<32x16xf32, #tpu.memory_space<vmem>>, vector<1x16xf32>,
    %c0_38 = arith.constant 0 : index
    %c224 = arith.constant 224 : index
    %37 = vector.load %arg4[%c0_38, %c224] : memref<2x256xf32, #tpu.memory_space<vmem>>, vector<1x16xf32>
    %c14 = arith.constant 14 : index
    %c0_39 = arith.constant 0 : index
    %38 = vector.load %arg5[%c14, %c0_39] : memref<32x16xf32, #tpu.memory_space<vmem>>, vector<1x16xf32>
    tpu.vector_store %arg5[%c14, %c0_39], %37 {strides = array<i32>} : memref<32x16xf32, #tpu.memory_space<vmem>>, vector<1x16xf32>,
    %c0_40 = arith.constant 0 : index
    %c240 = arith.constant 240 : index
    %39 = vector.load %arg4[%c0_40, %c240] : memref<2x256xf32, #tpu.memory_space<vmem>>, vector<1x16xf32>
    %c15 = arith.constant 15 : index
    %c0_41 = arith.constant 0 : index
    %40 = vector.load %arg5[%c15, %c0_41] : memref<32x16xf32, #tpu.memory_space<vmem>>, vector<1x16xf32>
    tpu.vector_store %arg5[%c15, %c0_41], %39 {strides = array<i32>} : memref<32x16xf32, #tpu.memory_space<vmem>>, vector<1x16xf32>,
    %c1_42 = arith.constant 1 : index
    %c0_43 = arith.constant 0 : index
    %41 = vector.load %arg4[%c1_42, %c0_43] : memref<2x256xf32, #tpu.memory_space<vmem>>, vector<1x16xf32>
    %c16_44 = arith.constant 16 : index
    %c0_45 = arith.constant 0 : index
    %42 = vector.load %arg5[%c16_44, %c0_45] : memref<32x16xf32, #tpu.memory_space<vmem>>, vector<1x16xf32>
    tpu.vector_store %arg5[%c16_44, %c0_45], %41 {strides = array<i32>} : memref<32x16xf32, #tpu.memory_space<vmem>>, vector<1x16xf32>,
    %c1_46 = arith.constant 1 : index
    %c16_47 = arith.constant 16 : index
    %43 = vector.load %arg4[%c1_46, %c16_47] : memref<2x256xf32, #tpu.memory_space<vmem>>, vector<1x16xf32>
    %c17 = arith.constant 17 : index
    %c0_48 = arith.constant 0 : index
    %44 = vector.load %arg5[%c17, %c0_48] : memref<32x16xf32, #tpu.memory_space<vmem>>, vector<1x16xf32>
    tpu.vector_store %arg5[%c17, %c0_48], %43 {strides = array<i32>} : memref<32x16xf32, #tpu.memory_space<vmem>>, vector<1x16xf32>,
    %c1_49 = arith.constant 1 : index
    %c32_50 = arith.constant 32 : index
    %45 = vector.load %arg4[%c1_49, %c32_50] : memref<2x256xf32, #tpu.memory_space<vmem>>, vector<1x16xf32>
    %c18 = arith.constant 18 : index
    %c0_51 = arith.constant 0 : index
    %46 = vector.load %arg5[%c18, %c0_51] : memref<32x16xf32, #tpu.memory_space<vmem>>, vector<1x16xf32>
    tpu.vector_store %arg5[%c18, %c0_51], %45 {strides = array<i32>} : memref<32x16xf32, #tpu.memory_space<vmem>>, vector<1x16xf32>,
    %c1_52 = arith.constant 1 : index
    %c48_53 = arith.constant 48 : index
    %47 = vector.load %arg4[%c1_52, %c48_53] : memref<2x256xf32, #tpu.memory_space<vmem>>, vector<1x16xf32>
    %c19 = arith.constant 19 : index
    %c0_54 = arith.constant 0 : index
    %48 = vector.load %arg5[%c19, %c0_54] : memref<32x16xf32, #tpu.memory_space<vmem>>, vector<1x16xf32>
    tpu.vector_store %arg5[%c19, %c0_54], %47 {strides = array<i32>} : memref<32x16xf32, #tpu.memory_space<vmem>>, vector<1x16xf32>,
    %c1_55 = arith.constant 1 : index
    %c64_56 = arith.constant 64 : index
    %49 = vector.load %arg4[%c1_55, %c64_56] : memref<2x256xf32, #tpu.memory_space<vmem>>, vector<1x16xf32>
    %c20 = arith.constant 20 : index
    %c0_57 = arith.constant 0 : index
    %50 = vector.load %arg5[%c20, %c0_57] : memref<32x16xf32, #tpu.memory_space<vmem>>, vector<1x16xf32>
    tpu.vector_store %arg5[%c20, %c0_57], %49 {strides = array<i32>} : memref<32x16xf32, #tpu.memory_space<vmem>>, vector<1x16xf32>,
    %c1_58 = arith.constant 1 : index
    %c80_59 = arith.constant 80 : index
    %51 = vector.load %arg4[%c1_58, %c80_59] : memref<2x256xf32, #tpu.memory_space<vmem>>, vector<1x16xf32>
    %c21 = arith.constant 21 : index
    %c0_60 = arith.constant 0 : index
    %52 = vector.load %arg5[%c21, %c0_60] : memref<32x16xf32, #tpu.memory_space<vmem>>, vector<1x16xf32>
    tpu.vector_store %arg5[%c21, %c0_60], %51 {strides = array<i32>} : memref<32x16xf32, #tpu.memory_space<vmem>>, vector<1x16xf32>,
    %c1_61 = arith.constant 1 : index
    %c96_62 = arith.constant 96 : index
    %53 = vector.load %arg4[%c1_61, %c96_62] : memref<2x256xf32, #tpu.memory_space<vmem>>, vector<1x16xf32>
    %c22 = arith.constant 22 : index
    %c0_63 = arith.constant 0 : index
    %54 = vector.load %arg5[%c22, %c0_63] : memref<32x16xf32, #tpu.memory_space<vmem>>, vector<1x16xf32>
    tpu.vector_store %arg5[%c22, %c0_63], %53 {strides = array<i32>} : memref<32x16xf32, #tpu.memory_space<vmem>>, vector<1x16xf32>,
    %c1_64 = arith.constant 1 : index
    %c112_65 = arith.constant 112 : index
    %55 = vector.load %arg4[%c1_64, %c112_65] : memref<2x256xf32, #tpu.memory_space<vmem>>, vector<1x16xf32>
    %c23 = arith.constant 23 : index
    %c0_66 = arith.constant 0 : index
    %56 = vector.load %arg5[%c23, %c0_66] : memref<32x16xf32, #tpu.memory_space<vmem>>, vector<1x16xf32>
    tpu.vector_store %arg5[%c23, %c0_66], %55 {strides = array<i32>} : memref<32x16xf32, #tpu.memory_space<vmem>>, vector<1x16xf32>,
    %c1_67 = arith.constant 1 : index
    %c128_68 = arith.constant 128 : index
    %57 = vector.load %arg4[%c1_67, %c128_68] : memref<2x256xf32, #tpu.memory_space<vmem>>, vector<1x16xf32>
    %c24 = arith.constant 24 : index
    %c0_69 = arith.constant 0 : index
    %58 = vector.load %arg5[%c24, %c0_69] : memref<32x16xf32, #tpu.memory_space<vmem>>, vector<1x16xf32>
    tpu.vector_store %arg5[%c24, %c0_69], %57 {strides = array<i32>} : memref<32x16xf32, #tpu.memory_space<vmem>>, vector<1x16xf32>,
    %c1_70 = arith.constant 1 : index
    %c144_71 = arith.constant 144 : index
    %59 = vector.load %arg4[%c1_70, %c144_71] : memref<2x256xf32, #tpu.memory_space<vmem>>, vector<1x16xf32>
    %c25 = arith.constant 25 : index
    %c0_72 = arith.constant 0 : index
    %60 = vector.load %arg5[%c25, %c0_72] : memref<32x16xf32, #tpu.memory_space<vmem>>, vector<1x16xf32>
    tpu.vector_store %arg5[%c25, %c0_72], %59 {strides = array<i32>} : memref<32x16xf32, #tpu.memory_space<vmem>>, vector<1x16xf32>,
    %c1_73 = arith.constant 1 : index
    %c160_74 = arith.constant 160 : index
    %61 = vector.load %arg4[%c1_73, %c160_74] : memref<2x256xf32, #tpu.memory_space<vmem>>, vector<1x16xf32>
    %c26 = arith.constant 26 : index
    %c0_75 = arith.constant 0 : index
    %62 = vector.load %arg5[%c26, %c0_75] : memref<32x16xf32, #tpu.memory_space<vmem>>, vector<1x16xf32>
    tpu.vector_store %arg5[%c26, %c0_75], %61 {strides = array<i32>} : memref<32x16xf32, #tpu.memory_space<vmem>>, vector<1x16xf32>,
    %c1_76 = arith.constant 1 : index
    %c176_77 = arith.constant 176 : index
    %63 = vector.load %arg4[%c1_76, %c176_77] : memref<2x256xf32, #tpu.memory_space<vmem>>, vector<1x16xf32>
    %c27 = arith.constant 27 : index
    %c0_78 = arith.constant 0 : index
    %64 = vector.load %arg5[%c27, %c0_78] : memref<32x16xf32, #tpu.memory_space<vmem>>, vector<1x16xf32>
    tpu.vector_store %arg5[%c27, %c0_78], %63 {strides = array<i32>} : memref<32x16xf32, #tpu.memory_space<vmem>>, vector<1x16xf32>,
    %c1_79 = arith.constant 1 : index
    %c192_80 = arith.constant 192 : index
    %65 = vector.load %arg4[%c1_79, %c192_80] : memref<2x256xf32, #tpu.memory_space<vmem>>, vector<1x16xf32>
    %c28 = arith.constant 28 : index
    %c0_81 = arith.constant 0 : index
    %66 = vector.load %arg5[%c28, %c0_81] : memref<32x16xf32, #tpu.memory_space<vmem>>, vector<1x16xf32>
    tpu.vector_store %arg5[%c28, %c0_81], %65 {strides = array<i32>} : memref<32x16xf32, #tpu.memory_space<vmem>>, vector<1x16xf32>,
    %c1_82 = arith.constant 1 : index
    %c208_83 = arith.constant 208 : index
    %67 = vector.load %arg4[%c1_82, %c208_83] : memref<2x256xf32, #tpu.memory_space<vmem>>, vector<1x16xf32>
    %c29 = arith.constant 29 : index
    %c0_84 = arith.constant 0 : index
    %68 = vector.load %arg5[%c29, %c0_84] : memref<32x16xf32, #tpu.memory_space<vmem>>, vector<1x16xf32>
    tpu.vector_store %arg5[%c29, %c0_84], %67 {strides = array<i32>} : memref<32x16xf32, #tpu.memory_space<vmem>>, vector<1x16xf32>,
    %c1_85 = arith.constant 1 : index
    %c224_86 = arith.constant 224 : index
    %69 = vector.load %arg4[%c1_85, %c224_86] : memref<2x256xf32, #tpu.memory_space<vmem>>, vector<1x16xf32>
    %c30 = arith.constant 30 : index
    %c0_87 = arith.constant 0 : index
    %70 = vector.load %arg5[%c30, %c0_87] : memref<32x16xf32, #tpu.memory_space<vmem>>, vector<1x16xf32>
    tpu.vector_store %arg5[%c30, %c0_87], %69 {strides = array<i32>} : memref<32x16xf32, #tpu.memory_space<vmem>>, vector<1x16xf32>,
    %c1_88 = arith.constant 1 : index
    %c240_89 = arith.constant 240 : index
    %71 = vector.load %arg4[%c1_88, %c240_89] : memref<2x256xf32, #tpu.memory_space<vmem>>, vector<1x16xf32>
    %c31 = arith.constant 31 : index
    %c0_90 = arith.constant 0 : index
    %72 = vector.load %arg5[%c31, %c0_90] : memref<32x16xf32, #tpu.memory_space<vmem>>, vector<1x16xf32>
    tpu.vector_store %arg5[%c31, %c0_90], %71 {strides = array<i32>} : memref<32x16xf32, #tpu.memory_space<vmem>>, vector<1x16xf32>,
    %c0_91 = arith.constant 0 : index
    %c0_92 = arith.constant 0 : index
    %73 = vector.load %arg5[%c0_91, %c0_92] : memref<32x16xf32, #tpu.memory_space<vmem>>, vector<32x16xf32>
    %74 = vector.extract_strided_slice %7 {offsets = [0, 0], sizes = [1, 256], strides = [1, 1]} : vector<2x256xf32> to vector<1x256xf32>
    %75 = arith.addf %0, %74 : vector<1x256xf32>
    %76 = vector.extract_strided_slice %7 {offsets = [1, 0], sizes = [1, 256], strides = [1, 1]} : vector<2x256xf32> to vector<1x256xf32>
    %77 = arith.addf %1, %76 : vector<1x256xf32>
    %78 = math.floor %75 : vector<1x256xf32>
    %79 = math.floor %77 : vector<1x256xf32>
    %80 = arith.subf %75, %78 : vector<1x256xf32>
    %cst_93 = arith.constant 1.000000e+00 : f32
    %81 = vector.broadcast %cst_93 : f32 to vector<1x256xf32>
    %82 = arith.subf %81, %80 : vector<1x256xf32>
    %83 = arith.subf %77, %79 : vector<1x256xf32>
    %cst_94 = arith.constant 1.000000e+00 : f32
    %84 = vector.broadcast %cst_94 : f32 to vector<1x256xf32>
    %85 = arith.subf %84, %83 : vector<1x256xf32>
    %86 = arith.fptosi %78 : vector<1x256xf32> to vector<1x256xi32>
    %87 = arith.fptosi %79 : vector<1x256xf32> to vector<1x256xi32>
    %88 = vector.broadcast %2 : vector<16x1xi32> to vector<16x256xi32>
    %89 = vector.broadcast %86 : vector<1x256xi32> to vector<16x256xi32>
    %90 = arith.cmpi eq, %88, %89 : vector<16x256xi32>
    %c1_i32 = arith.constant 1 : i32
    %91 = vector.broadcast %c1_i32 : i32 to vector<1x256xi32>
    %92 = arith.addi %86, %91 : vector<1x256xi32>
    %93 = vector.broadcast %2 : vector<16x1xi32> to vector<16x256xi32>
    %94 = vector.broadcast %92 : vector<1x256xi32> to vector<16x256xi32>
    %95 = arith.cmpi eq, %93, %94 : vector<16x256xi32>
    %cst_95 = arith.constant 0.000000e+00 : f32
    %96 = vector.shape_cast %80 : vector<1x256xf32> to vector<1x256xf32>
    %97 = vector.broadcast %96 : vector<1x256xf32> to vector<16x256xf32>
    %98 = vector.broadcast %cst_95 : f32 to vector<16x256xf32>
    %99 = arith.select %95, %97, %98 : vector<16x256xi1>, vector<16x256xf32>
    %100 = vector.shape_cast %82 : vector<1x256xf32> to vector<1x256xf32>
    %101 = vector.broadcast %100 : vector<1x256xf32> to vector<16x256xf32>
    %102 = arith.select %90, %101, %99 : vector<16x256xi1>, vector<16x256xf32>
    %103 = vector.broadcast %3 : vector<16x1xi32> to vector<16x256xi32>
    %104 = vector.broadcast %87 : vector<1x256xi32> to vector<16x256xi32>
    %105 = arith.cmpi eq, %103, %104 : vector<16x256xi32>
    %c1_i32_96 = arith.constant 1 : i32
    %106 = vector.broadcast %c1_i32_96 : i32 to vector<1x256xi32>
    %107 = arith.addi %87, %106 : vector<1x256xi32>
    %108 = vector.broadcast %3 : vector<16x1xi32> to vector<16x256xi32>
    %109 = vector.broadcast %107 : vector<1x256xi32> to vector<16x256xi32>
    %110 = arith.cmpi eq, %108, %109 : vector<16x256xi32>
    %cst_97 = arith.constant 0.000000e+00 : f32
    %111 = vector.shape_cast %83 : vector<1x256xf32> to vector<1x256xf32>
    %112 = vector.broadcast %111 : vector<1x256xf32> to vector<16x256xf32>
    %113 = vector.broadcast %cst_97 : f32 to vector<16x256xf32>
    %114 = arith.select %110, %112, %113 : vector<16x256xi1>, vector<16x256xf32>
    %115 = vector.shape_cast %85 : vector<1x256xf32> to vector<1x256xf32>
    %116 = vector.broadcast %115 : vector<1x256xf32> to vector<16x256xf32>
    %117 = arith.select %105, %116, %114 : vector<16x256xi1>, vector<16x256xf32>
    %cst_98 = arith.constant dense<0.000000e+00> : vector<32x256xf32>
    %118 = tpu.matmul %73, %117, %cst_98 {dimension_numbers = #tpu.dot_dimension_numbers<[1], [0], [0], [1], [0, 0, 1, 1], [], []>} : vector<32x16xf32>, vector<16x256xf32>, vector<32x256xf32> -> vector<32x256xf32>
    %119 = vector.extract_strided_slice %118 {offsets = [0, 0], sizes = [16, 256], strides = [1, 1]} : vector<32x256xf32> to vector<16x256xf32>
    %120 = arith.mulf %119, %102 : vector<16x256xf32>
    %cst_99 = arith.constant dense<0.000000e+00> : vector<256xf32>
    %121 = vector.multi_reduction <add>, %120, %cst_99 [0] : vector<16x256xf32> to vector<256xf32>
    %122 = vector.shape_cast %121 : vector<256xf32> to vector<1x256xf32>
    %123 = vector.extract_strided_slice %118 {offsets = [16, 0], sizes = [16, 256], strides = [1, 1]} : vector<32x256xf32> to vector<16x256xf32>
    %124 = arith.mulf %123, %102 : vector<16x256xf32>
    %cst_100 = arith.constant dense<0.000000e+00> : vector<256xf32>
    %125 = vector.multi_reduction <add>, %124, %cst_100 [0] : vector<16x256xf32> to vector<256xf32>
    %126 = vector.shape_cast %125 : vector<256xf32> to vector<1x256xf32>
    %127 = tpu.concatenate %122, %126 in 0 : vector<1x256xf32>, vector<1x256xf32> -> vector<2x256xf32>
    %128 = arith.addf %7, %127 : vector<2x256xf32>
    %c0_101 = arith.constant 0 : index
    %c0_102 = arith.constant 0 : index
    %129 = vector.load %arg4[%c0_101, %c0_102] : memref<2x256xf32, #tpu.memory_space<vmem>>, vector<2x256xf32>
    tpu.vector_store %arg4[%c0_101, %c0_102], %128 {strides = array<i32>} : memref<2x256xf32, #tpu.memory_space<vmem>>, vector<2x256xf32>,
    %c0_103 = arith.constant 0 : index
    %c0_104 = arith.constant 0 : index
    %130 = vector.load %arg4[%c0_103, %c0_104] : memref<2x256xf32, #tpu.memory_space<vmem>>, vector<1x16xf32>
    %c0_105 = arith.constant 0 : index
    %c0_106 = arith.constant 0 : index
    %131 = vector.load %arg5[%c0_105, %c0_106] : memref<32x16xf32, #tpu.memory_space<vmem>>, vector<1x16xf32>
    tpu.vector_store %arg5[%c0_105, %c0_106], %130 {strides = array<i32>} : memref<32x16xf32, #tpu.memory_space<vmem>>, vector<1x16xf32>,
    %c0_107 = arith.constant 0 : index
    %c16_108 = arith.constant 16 : index
    %132 = vector.load %arg4[%c0_107, %c16_108] : memref<2x256xf32, #tpu.memory_space<vmem>>, vector<1x16xf32>
    %c1_109 = arith.constant 1 : index
    %c0_110 = arith.constant 0 : index
    %133 = vector.load %arg5[%c1_109, %c0_110] : memref<32x16xf32, #tpu.memory_space<vmem>>, vector<1x16xf32>
    tpu.vector_store %arg5[%c1_109, %c0_110], %132 {strides = array<i32>} : memref<32x16xf32, #tpu.memory_space<vmem>>, vector<1x16xf32>,
    %c0_111 = arith.constant 0 : index
    %c32_112 = arith.constant 32 : index
    %134 = vector.load %arg4[%c0_111, %c32_112] : memref<2x256xf32, #tpu.memory_space<vmem>>, vector<1x16xf32>
    %c2_113 = arith.constant 2 : index
    %c0_114 = arith.constant 0 : index
    %135 = vector.load %arg5[%c2_113, %c0_114] : memref<32x16xf32, #tpu.memory_space<vmem>>, vector<1x16xf32>
    tpu.vector_store %arg5[%c2_113, %c0_114], %134 {strides = array<i32>} : memref<32x16xf32, #tpu.memory_space<vmem>>, vector<1x16xf32>,
    %c0_115 = arith.constant 0 : index
    %c48_116 = arith.constant 48 : index
    %136 = vector.load %arg4[%c0_115, %c48_116] : memref<2x256xf32, #tpu.memory_space<vmem>>, vector<1x16xf32>
    %c3_117 = arith.constant 3 : index
    %c0_118 = arith.constant 0 : index
    %137 = vector.load %arg5[%c3_117, %c0_118] : memref<32x16xf32, #tpu.memory_space<vmem>>, vector<1x16xf32>
    tpu.vector_store %arg5[%c3_117, %c0_118], %136 {strides = array<i32>} : memref<32x16xf32, #tpu.memory_space<vmem>>, vector<1x16xf32>,
    %c0_119 = arith.constant 0 : index
    %c64_120 = arith.constant 64 : index
    %138 = vector.load %arg4[%c0_119, %c64_120] : memref<2x256xf32, #tpu.memory_space<vmem>>, vector<1x16xf32>
    %c4_121 = arith.constant 4 : index
    %c0_122 = arith.constant 0 : index
    %139 = vector.load %arg5[%c4_121, %c0_122] : memref<32x16xf32, #tpu.memory_space<vmem>>, vector<1x16xf32>
    tpu.vector_store %arg5[%c4_121, %c0_122], %138 {strides = array<i32>} : memref<32x16xf32, #tpu.memory_space<vmem>>, vector<1x16xf32>,
    %c0_123 = arith.constant 0 : index
    %c80_124 = arith.constant 80 : index
    %140 = vector.load %arg4[%c0_123, %c80_124] : memref<2x256xf32, #tpu.memory_space<vmem>>, vector<1x16xf32>
    %c5_125 = arith.constant 5 : index
    %c0_126 = arith.constant 0 : index
    %141 = vector.load %arg5[%c5_125, %c0_126] : memref<32x16xf32, #tpu.memory_space<vmem>>, vector<1x16xf32>
    tpu.vector_store %arg5[%c5_125, %c0_126], %140 {strides = array<i32>} : memref<32x16xf32, #tpu.memory_space<vmem>>, vector<1x16xf32>,
    %c0_127 = arith.constant 0 : index
    %c96_128 = arith.constant 96 : index
    %142 = vector.load %arg4[%c0_127, %c96_128] : memref<2x256xf32, #tpu.memory_space<vmem>>, vector<1x16xf32>
    %c6_129 = arith.constant 6 : index
    %c0_130 = arith.constant 0 : index
    %143 = vector.load %arg5[%c6_129, %c0_130] : memref<32x16xf32, #tpu.memory_space<vmem>>, vector<1x16xf32>
    tpu.vector_store %arg5[%c6_129, %c0_130], %142 {strides = array<i32>} : memref<32x16xf32, #tpu.memory_space<vmem>>, vector<1x16xf32>,
    %c0_131 = arith.constant 0 : index
    %c112_132 = arith.constant 112 : index
    %144 = vector.load %arg4[%c0_131, %c112_132] : memref<2x256xf32, #tpu.memory_space<vmem>>, vector<1x16xf32>
    %c7_133 = arith.constant 7 : index
    %c0_134 = arith.constant 0 : index
    %145 = vector.load %arg5[%c7_133, %c0_134] : memref<32x16xf32, #tpu.memory_space<vmem>>, vector<1x16xf32>
    tpu.vector_store %arg5[%c7_133, %c0_134], %144 {strides = array<i32>} : memref<32x16xf32, #tpu.memory_space<vmem>>, vector<1x16xf32>,
    %c0_135 = arith.constant 0 : index
    %c128_136 = arith.constant 128 : index
    %146 = vector.load %arg4[%c0_135, %c128_136] : memref<2x256xf32, #tpu.memory_space<vmem>>, vector<1x16xf32>
    %c8_137 = arith.constant 8 : index
    %c0_138 = arith.constant 0 : index
    %147 = vector.load %arg5[%c8_137, %c0_138] : memref<32x16xf32, #tpu.memory_space<vmem>>, vector<1x16xf32>
    tpu.vector_store %arg5[%c8_137, %c0_138], %146 {strides = array<i32>} : memref<32x16xf32, #tpu.memory_space<vmem>>, vector<1x16xf32>,
    %c0_139 = arith.constant 0 : index
    %c144_140 = arith.constant 144 : index
    %148 = vector.load %arg4[%c0_139, %c144_140] : memref<2x256xf32, #tpu.memory_space<vmem>>, vector<1x16xf32>
    %c9_141 = arith.constant 9 : index
    %c0_142 = arith.constant 0 : index
    %149 = vector.load %arg5[%c9_141, %c0_142] : memref<32x16xf32, #tpu.memory_space<vmem>>, vector<1x16xf32>
    tpu.vector_store %arg5[%c9_141, %c0_142], %148 {strides = array<i32>} : memref<32x16xf32, #tpu.memory_space<vmem>>, vector<1x16xf32>,
    %c0_143 = arith.constant 0 : index
    %c160_144 = arith.constant 160 : index
    %150 = vector.load %arg4[%c0_143, %c160_144] : memref<2x256xf32, #tpu.memory_space<vmem>>, vector<1x16xf32>
    %c10_145 = arith.constant 10 : index
    %c0_146 = arith.constant 0 : index
    %151 = vector.load %arg5[%c10_145, %c0_146] : memref<32x16xf32, #tpu.memory_space<vmem>>, vector<1x16xf32>
    tpu.vector_store %arg5[%c10_145, %c0_146], %150 {strides = array<i32>} : memref<32x16xf32, #tpu.memory_space<vmem>>, vector<1x16xf32>,
    %c0_147 = arith.constant 0 : index
    %c176_148 = arith.constant 176 : index
    %152 = vector.load %arg4[%c0_147, %c176_148] : memref<2x256xf32, #tpu.memory_space<vmem>>, vector<1x16xf32>
    %c11_149 = arith.constant 11 : index
    %c0_150 = arith.constant 0 : index
    %153 = vector.load %arg5[%c11_149, %c0_150] : memref<32x16xf32, #tpu.memory_space<vmem>>, vector<1x16xf32>
    tpu.vector_store %arg5[%c11_149, %c0_150], %152 {strides = array<i32>} : memref<32x16xf32, #tpu.memory_space<vmem>>, vector<1x16xf32>,
    %c0_151 = arith.constant 0 : index
    %c192_152 = arith.constant 192 : index
    %154 = vector.load %arg4[%c0_151, %c192_152] : memref<2x256xf32, #tpu.memory_space<vmem>>, vector<1x16xf32>
    %c12_153 = arith.constant 12 : index
    %c0_154 = arith.constant 0 : index
    %155 = vector.load %arg5[%c12_153, %c0_154] : memref<32x16xf32, #tpu.memory_space<vmem>>, vector<1x16xf32>
    tpu.vector_store %arg5[%c12_153, %c0_154], %154 {strides = array<i32>} : memref<32x16xf32, #tpu.memory_space<vmem>>, vector<1x16xf32>,
    %c0_155 = arith.constant 0 : index
    %c208_156 = arith.constant 208 : index
    %156 = vector.load %arg4[%c0_155, %c208_156] : memref<2x256xf32, #tpu.memory_space<vmem>>, vector<1x16xf32>
    %c13_157 = arith.constant 13 : index
    %c0_158 = arith.constant 0 : index
    %157 = vector.load %arg5[%c13_157, %c0_158] : memref<32x16xf32, #tpu.memory_space<vmem>>, vector<1x16xf32>
    tpu.vector_store %arg5[%c13_157, %c0_158], %156 {strides = array<i32>} : memref<32x16xf32, #tpu.memory_space<vmem>>, vector<1x16xf32>,
    %c0_159 = arith.constant 0 : index
    %c224_160 = arith.constant 224 : index
    %158 = vector.load %arg4[%c0_159, %c224_160] : memref<2x256xf32, #tpu.memory_space<vmem>>, vector<1x16xf32>
    %c14_161 = arith.constant 14 : index
    %c0_162 = arith.constant 0 : index
    %159 = vector.load %arg5[%c14_161, %c0_162] : memref<32x16xf32, #tpu.memory_space<vmem>>, vector<1x16xf32>
    tpu.vector_store %arg5[%c14_161, %c0_162], %158 {strides = array<i32>} : memref<32x16xf32, #tpu.memory_space<vmem>>, vector<1x16xf32>,
    %c0_163 = arith.constant 0 : index
    %c240_164 = arith.constant 240 : index
    %160 = vector.load %arg4[%c0_163, %c240_164] : memref<2x256xf32, #tpu.memory_space<vmem>>, vector<1x16xf32>
    %c15_165 = arith.constant 15 : index
    %c0_166 = arith.constant 0 : index
    %161 = vector.load %arg5[%c15_165, %c0_166] : memref<32x16xf32, #tpu.memory_space<vmem>>, vector<1x16xf32>
    tpu.vector_store %arg5[%c15_165, %c0_166], %160 {strides = array<i32>} : memref<32x16xf32, #tpu.memory_space<vmem>>, vector<1x16xf32>,
    %c1_167 = arith.constant 1 : index
    %c0_168 = arith.constant 0 : index
    %162 = vector.load %arg4[%c1_167, %c0_168] : memref<2x256xf32, #tpu.memory_space<vmem>>, vector<1x16xf32>
    %c16_169 = arith.constant 16 : index
    %c0_170 = arith.constant 0 : index
    %163 = vector.load %arg5[%c16_169, %c0_170] : memref<32x16xf32, #tpu.memory_space<vmem>>, vector<1x16xf32>
    tpu.vector_store %arg5[%c16_169, %c0_170], %162 {strides = array<i32>} : memref<32x16xf32, #tpu.memory_space<vmem>>, vector<1x16xf32>,
    %c1_171 = arith.constant 1 : index
    %c16_172 = arith.constant 16 : index
    %164 = vector.load %arg4[%c1_171, %c16_172] : memref<2x256xf32, #tpu.memory_space<vmem>>, vector<1x16xf32>
    %c17_173 = arith.constant 17 : index
    %c0_174 = arith.constant 0 : index
    %165 = vector.load %arg5[%c17_173, %c0_174] : memref<32x16xf32, #tpu.memory_space<vmem>>, vector<1x16xf32>
    tpu.vector_store %arg5[%c17_173, %c0_174], %164 {strides = array<i32>} : memref<32x16xf32, #tpu.memory_space<vmem>>, vector<1x16xf32>,
    %c1_175 = arith.constant 1 : index
    %c32_176 = arith.constant 32 : index
    %166 = vector.load %arg4[%c1_175, %c32_176] : memref<2x256xf32, #tpu.memory_space<vmem>>, vector<1x16xf32>
    %c18_177 = arith.constant 18 : index
    %c0_178 = arith.constant 0 : index
    %167 = vector.load %arg5[%c18_177, %c0_178] : memref<32x16xf32, #tpu.memory_space<vmem>>, vector<1x16xf32>
    tpu.vector_store %arg5[%c18_177, %c0_178], %166 {strides = array<i32>} : memref<32x16xf32, #tpu.memory_space<vmem>>, vector<1x16xf32>,
    %c1_179 = arith.constant 1 : index
    %c48_180 = arith.constant 48 : index
    %168 = vector.load %arg4[%c1_179, %c48_180] : memref<2x256xf32, #tpu.memory_space<vmem>>, vector<1x16xf32>
    %c19_181 = arith.constant 19 : index
    %c0_182 = arith.constant 0 : index
    %169 = vector.load %arg5[%c19_181, %c0_182] : memref<32x16xf32, #tpu.memory_space<vmem>>, vector<1x16xf32>
    tpu.vector_store %arg5[%c19_181, %c0_182], %168 {strides = array<i32>} : memref<32x16xf32, #tpu.memory_space<vmem>>, vector<1x16xf32>,
    %c1_183 = arith.constant 1 : index
    %c64_184 = arith.constant 64 : index
    %170 = vector.load %arg4[%c1_183, %c64_184] : memref<2x256xf32, #tpu.memory_space<vmem>>, vector<1x16xf32>
    %c20_185 = arith.constant 20 : index
    %c0_186 = arith.constant 0 : index
    %171 = vector.load %arg5[%c20_185, %c0_186] : memref<32x16xf32, #tpu.memory_space<vmem>>, vector<1x16xf32>
    tpu.vector_store %arg5[%c20_185, %c0_186], %170 {strides = array<i32>} : memref<32x16xf32, #tpu.memory_space<vmem>>, vector<1x16xf32>,
    %c1_187 = arith.constant 1 : index
    %c80_188 = arith.constant 80 : index
    %172 = vector.load %arg4[%c1_187, %c80_188] : memref<2x256xf32, #tpu.memory_space<vmem>>, vector<1x16xf32>
    %c21_189 = arith.constant 21 : index
    %c0_190 = arith.constant 0 : index
    %173 = vector.load %arg5[%c21_189, %c0_190] : memref<32x16xf32, #tpu.memory_space<vmem>>, vector<1x16xf32>
    tpu.vector_store %arg5[%c21_189, %c0_190], %172 {strides = array<i32>} : memref<32x16xf32, #tpu.memory_space<vmem>>, vector<1x16xf32>,
    %c1_191 = arith.constant 1 : index
    %c96_192 = arith.constant 96 : index
    %174 = vector.load %arg4[%c1_191, %c96_192] : memref<2x256xf32, #tpu.memory_space<vmem>>, vector<1x16xf32>
    %c22_193 = arith.constant 22 : index
    %c0_194 = arith.constant 0 : index
    %175 = vector.load %arg5[%c22_193, %c0_194] : memref<32x16xf32, #tpu.memory_space<vmem>>, vector<1x16xf32>
    tpu.vector_store %arg5[%c22_193, %c0_194], %174 {strides = array<i32>} : memref<32x16xf32, #tpu.memory_space<vmem>>, vector<1x16xf32>,
    %c1_195 = arith.constant 1 : index
    %c112_196 = arith.constant 112 : index
    %176 = vector.load %arg4[%c1_195, %c112_196] : memref<2x256xf32, #tpu.memory_space<vmem>>, vector<1x16xf32>
    %c23_197 = arith.constant 23 : index
    %c0_198 = arith.constant 0 : index
    %177 = vector.load %arg5[%c23_197, %c0_198] : memref<32x16xf32, #tpu.memory_space<vmem>>, vector<1x16xf32>
    tpu.vector_store %arg5[%c23_197, %c0_198], %176 {strides = array<i32>} : memref<32x16xf32, #tpu.memory_space<vmem>>, vector<1x16xf32>,
    %c1_199 = arith.constant 1 : index
    %c128_200 = arith.constant 128 : index
    %178 = vector.load %arg4[%c1_199, %c128_200] : memref<2x256xf32, #tpu.memory_space<vmem>>, vector<1x16xf32>
    %c24_201 = arith.constant 24 : index
    %c0_202 = arith.constant 0 : index
    %179 = vector.load %arg5[%c24_201, %c0_202] : memref<32x16xf32, #tpu.memory_space<vmem>>, vector<1x16xf32>
    tpu.vector_store %arg5[%c24_201, %c0_202], %178 {strides = array<i32>} : memref<32x16xf32, #tpu.memory_space<vmem>>, vector<1x16xf32>,
    %c1_203 = arith.constant 1 : index
    %c144_204 = arith.constant 144 : index
    %180 = vector.load %arg4[%c1_203, %c144_204] : memref<2x256xf32, #tpu.memory_space<vmem>>, vector<1x16xf32>
    %c25_205 = arith.constant 25 : index
    %c0_206 = arith.constant 0 : index
    %181 = vector.load %arg5[%c25_205, %c0_206] : memref<32x16xf32, #tpu.memory_space<vmem>>, vector<1x16xf32>
    tpu.vector_store %arg5[%c25_205, %c0_206], %180 {strides = array<i32>} : memref<32x16xf32, #tpu.memory_space<vmem>>, vector<1x16xf32>,
    %c1_207 = arith.constant 1 : index
    %c160_208 = arith.constant 160 : index
    %182 = vector.load %arg4[%c1_207, %c160_208] : memref<2x256xf32, #tpu.memory_space<vmem>>, vector<1x16xf32>
    %c26_209 = arith.constant 26 : index
    %c0_210 = arith.constant 0 : index
    %183 = vector.load %arg5[%c26_209, %c0_210] : memref<32x16xf32, #tpu.memory_space<vmem>>, vector<1x16xf32>
    tpu.vector_store %arg5[%c26_209, %c0_210], %182 {strides = array<i32>} : memref<32x16xf32, #tpu.memory_space<vmem>>, vector<1x16xf32>,
    %c1_211 = arith.constant 1 : index
    %c176_212 = arith.constant 176 : index
    %184 = vector.load %arg4[%c1_211, %c176_212] : memref<2x256xf32, #tpu.memory_space<vmem>>, vector<1x16xf32>
    %c27_213 = arith.constant 27 : index
    %c0_214 = arith.constant 0 : index
    %185 = vector.load %arg5[%c27_213, %c0_214] : memref<32x16xf32, #tpu.memory_space<vmem>>, vector<1x16xf32>
    tpu.vector_store %arg5[%c27_213, %c0_214], %184 {strides = array<i32>} : memref<32x16xf32, #tpu.memory_space<vmem>>, vector<1x16xf32>,
    %c1_215 = arith.constant 1 : index
    %c192_216 = arith.constant 192 : index
    %186 = vector.load %arg4[%c1_215, %c192_216] : memref<2x256xf32, #tpu.memory_space<vmem>>, vector<1x16xf32>
    %c28_217 = arith.constant 28 : index
    %c0_218 = arith.constant 0 : index
    %187 = vector.load %arg5[%c28_217, %c0_218] : memref<32x16xf32, #tpu.memory_space<vmem>>, vector<1x16xf32>
    tpu.vector_store %arg5[%c28_217, %c0_218], %186 {strides = array<i32>} : memref<32x16xf32, #tpu.memory_space<vmem>>, vector<1x16xf32>,
    %c1_219 = arith.constant 1 : index
    %c208_220 = arith.constant 208 : index
    %188 = vector.load %arg4[%c1_219, %c208_220] : memref<2x256xf32, #tpu.memory_space<vmem>>, vector<1x16xf32>
    %c29_221 = arith.constant 29 : index
    %c0_222 = arith.constant 0 : index
    %189 = vector.load %arg5[%c29_221, %c0_222] : memref<32x16xf32, #tpu.memory_space<vmem>>, vector<1x16xf32>
    tpu.vector_store %arg5[%c29_221, %c0_222], %188 {strides = array<i32>} : memref<32x16xf32, #tpu.memory_space<vmem>>, vector<1x16xf32>,
    %c1_223 = arith.constant 1 : index
    %c224_224 = arith.constant 224 : index
    %190 = vector.load %arg4[%c1_223, %c224_224] : memref<2x256xf32, #tpu.memory_space<vmem>>, vector<1x16xf32>
    %c30_225 = arith.constant 30 : index
    %c0_226 = arith.constant 0 : index
    %191 = vector.load %arg5[%c30_225, %c0_226] : memref<32x16xf32, #tpu.memory_space<vmem>>, vector<1x16xf32>
    tpu.vector_store %arg5[%c30_225, %c0_226], %190 {strides = array<i32>} : memref<32x16xf32, #tpu.memory_space<vmem>>, vector<1x16xf32>,
    %c1_227 = arith.constant 1 : index
    %c240_228 = arith.constant 240 : index
    %192 = vector.load %arg4[%c1_227, %c240_228] : memref<2x256xf32, #tpu.memory_space<vmem>>, vector<1x16xf32>
    %c31_229 = arith.constant 31 : index
    %c0_230 = arith.constant 0 : index
    %193 = vector.load %arg5[%c31_229, %c0_230] : memref<32x16xf32, #tpu.memory_space<vmem>>, vector<1x16xf32>
    tpu.vector_store %arg5[%c31_229, %c0_230], %192 {strides = array<i32>} : memref<32x16xf32, #tpu.memory_space<vmem>>, vector<1x16xf32>,
    %c0_231 = arith.constant 0 : index
    %c0_232 = arith.constant 0 : index
    %194 = vector.load %arg5[%c0_231, %c0_232] : memref<32x16xf32, #tpu.memory_space<vmem>>, vector<32x16xf32>
    %195 = vector.extract_strided_slice %128 {offsets = [0, 0], sizes = [1, 256], strides = [1, 1]} : vector<2x256xf32> to vector<1x256xf32>
    %196 = arith.addf %0, %195 : vector<1x256xf32>
    %197 = vector.extract_strided_slice %128 {offsets = [1, 0], sizes = [1, 256], strides = [1, 1]} : vector<2x256xf32> to vector<1x256xf32>
    %198 = arith.addf %1, %197 : vector<1x256xf32>
    %199 = math.floor %196 : vector<1x256xf32>
    %200 = math.floor %198 : vector<1x256xf32>
    %201 = arith.subf %196, %199 : vector<1x256xf32>
    %cst_233 = arith.constant 1.000000e+00 : f32
    %202 = vector.broadcast %cst_233 : f32 to vector<1x256xf32>
    %203 = arith.subf %202, %201 : vector<1x256xf32>
    %204 = arith.subf %198, %200 : vector<1x256xf32>
    %cst_234 = arith.constant 1.000000e+00 : f32
    %205 = vector.broadcast %cst_234 : f32 to vector<1x256xf32>
    %206 = arith.subf %205, %204 : vector<1x256xf32>
    %207 = arith.fptosi %199 : vector<1x256xf32> to vector<1x256xi32>
    %208 = arith.fptosi %200 : vector<1x256xf32> to vector<1x256xi32>
    %209 = vector.broadcast %2 : vector<16x1xi32> to vector<16x256xi32>
    %210 = vector.broadcast %207 : vector<1x256xi32> to vector<16x256xi32>
    %211 = arith.cmpi eq, %209, %210 : vector<16x256xi32>
    %c1_i32_235 = arith.constant 1 : i32
    %212 = vector.broadcast %c1_i32_235 : i32 to vector<1x256xi32>
    %213 = arith.addi %207, %212 : vector<1x256xi32>
    %214 = vector.broadcast %2 : vector<16x1xi32> to vector<16x256xi32>
    %215 = vector.broadcast %213 : vector<1x256xi32> to vector<16x256xi32>
    %216 = arith.cmpi eq, %214, %215 : vector<16x256xi32>
    %cst_236 = arith.constant 0.000000e+00 : f32
    %217 = vector.shape_cast %201 : vector<1x256xf32> to vector<1x256xf32>
    %218 = vector.broadcast %217 : vector<1x256xf32> to vector<16x256xf32>
    %219 = vector.broadcast %cst_236 : f32 to vector<16x256xf32>
    %220 = arith.select %216, %218, %219 : vector<16x256xi1>, vector<16x256xf32>
    %221 = vector.shape_cast %203 : vector<1x256xf32> to vector<1x256xf32>
    %222 = vector.broadcast %221 : vector<1x256xf32> to vector<16x256xf32>
    %223 = arith.select %211, %222, %220 : vector<16x256xi1>, vector<16x256xf32>
    %224 = vector.broadcast %3 : vector<16x1xi32> to vector<16x256xi32>
    %225 = vector.broadcast %208 : vector<1x256xi32> to vector<16x256xi32>
    %226 = arith.cmpi eq, %224, %225 : vector<16x256xi32>
    %c1_i32_237 = arith.constant 1 : i32
    %227 = vector.broadcast %c1_i32_237 : i32 to vector<1x256xi32>
    %228 = arith.addi %208, %227 : vector<1x256xi32>
    %229 = vector.broadcast %3 : vector<16x1xi32> to vector<16x256xi32>
    %230 = vector.broadcast %228 : vector<1x256xi32> to vector<16x256xi32>
    %231 = arith.cmpi eq, %229, %230 : vector<16x256xi32>
    %cst_238 = arith.constant 0.000000e+00 : f32
    %232 = vector.shape_cast %204 : vector<1x256xf32> to vector<1x256xf32>
    %233 = vector.broadcast %232 : vector<1x256xf32> to vector<16x256xf32>
    %234 = vector.broadcast %cst_238 : f32 to vector<16x256xf32>
    %235 = arith.select %231, %233, %234 : vector<16x256xi1>, vector<16x256xf32>
    %236 = vector.shape_cast %206 : vector<1x256xf32> to vector<1x256xf32>
    %237 = vector.broadcast %236 : vector<1x256xf32> to vector<16x256xf32>
    %238 = arith.select %226, %237, %235 : vector<16x256xi1>, vector<16x256xf32>
    %cst_239 = arith.constant dense<0.000000e+00> : vector<32x256xf32>
    %239 = tpu.matmul %194, %238, %cst_239 {dimension_numbers = #tpu.dot_dimension_numbers<[1], [0], [0], [1], [0, 0, 1, 1], [], []>} : vector<32x16xf32>, vector<16x256xf32>, vector<32x256xf32> -> vector<32x256xf32>
    %240 = vector.extract_strided_slice %239 {offsets = [0, 0], sizes = [16, 256], strides = [1, 1]} : vector<32x256xf32> to vector<16x256xf32>
    %241 = arith.mulf %240, %223 : vector<16x256xf32>
    %cst_240 = arith.constant dense<0.000000e+00> : vector<256xf32>
    %242 = vector.multi_reduction <add>, %241, %cst_240 [0] : vector<16x256xf32> to vector<256xf32>
    %243 = vector.shape_cast %242 : vector<256xf32> to vector<1x256xf32>
    %244 = vector.extract_strided_slice %239 {offsets = [16, 0], sizes = [16, 256], strides = [1, 1]} : vector<32x256xf32> to vector<16x256xf32>
    %245 = arith.mulf %244, %223 : vector<16x256xf32>
    %cst_241 = arith.constant dense<0.000000e+00> : vector<256xf32>
    %246 = vector.multi_reduction <add>, %245, %cst_241 [0] : vector<16x256xf32> to vector<256xf32>
    %247 = vector.shape_cast %246 : vector<256xf32> to vector<1x256xf32>
    %248 = tpu.concatenate %243, %247 in 0 : vector<1x256xf32>, vector<1x256xf32> -> vector<2x256xf32>
    %249 = arith.addf %128, %248 : vector<2x256xf32>
    %c0_242 = arith.constant 0 : index
    %c0_243 = arith.constant 0 : index
    %250 = vector.load %arg4[%c0_242, %c0_243] : memref<2x256xf32, #tpu.memory_space<vmem>>, vector<2x256xf32>
    tpu.vector_store %arg4[%c0_242, %c0_243], %249 {strides = array<i32>} : memref<2x256xf32, #tpu.memory_space<vmem>>, vector<2x256xf32>,
    %c0_244 = arith.constant 0 : index
    %c0_245 = arith.constant 0 : index
    %251 = vector.load %arg4[%c0_244, %c0_245] : memref<2x256xf32, #tpu.memory_space<vmem>>, vector<1x16xf32>
    %c0_246 = arith.constant 0 : index
    %c0_247 = arith.constant 0 : index
    %252 = vector.load %arg5[%c0_246, %c0_247] : memref<32x16xf32, #tpu.memory_space<vmem>>, vector<1x16xf32>
    tpu.vector_store %arg5[%c0_246, %c0_247], %251 {strides = array<i32>} : memref<32x16xf32, #tpu.memory_space<vmem>>, vector<1x16xf32>,
    %c0_248 = arith.constant 0 : index
    %c16_249 = arith.constant 16 : index
    %253 = vector.load %arg4[%c0_248, %c16_249] : memref<2x256xf32, #tpu.memory_space<vmem>>, vector<1x16xf32>
    %c1_250 = arith.constant 1 : index
    %c0_251 = arith.constant 0 : index
    %254 = vector.load %arg5[%c1_250, %c0_251] : memref<32x16xf32, #tpu.memory_space<vmem>>, vector<1x16xf32>
    tpu.vector_store %arg5[%c1_250, %c0_251], %253 {strides = array<i32>} : memref<32x16xf32, #tpu.memory_space<vmem>>, vector<1x16xf32>,
    %c0_252 = arith.constant 0 : index
    %c32_253 = arith.constant 32 : index
    %255 = vector.load %arg4[%c0_252, %c32_253] : memref<2x256xf32, #tpu.memory_space<vmem>>, vector<1x16xf32>
    %c2_254 = arith.constant 2 : index
    %c0_255 = arith.constant 0 : index
    %256 = vector.load %arg5[%c2_254, %c0_255] : memref<32x16xf32, #tpu.memory_space<vmem>>, vector<1x16xf32>
    tpu.vector_store %arg5[%c2_254, %c0_255], %255 {strides = array<i32>} : memref<32x16xf32, #tpu.memory_space<vmem>>, vector<1x16xf32>,
    %c0_256 = arith.constant 0 : index
    %c48_257 = arith.constant 48 : index
    %257 = vector.load %arg4[%c0_256, %c48_257] : memref<2x256xf32, #tpu.memory_space<vmem>>, vector<1x16xf32>
    %c3_258 = arith.constant 3 : index
    %c0_259 = arith.constant 0 : index
    %258 = vector.load %arg5[%c3_258, %c0_259] : memref<32x16xf32, #tpu.memory_space<vmem>>, vector<1x16xf32>
    tpu.vector_store %arg5[%c3_258, %c0_259], %257 {strides = array<i32>} : memref<32x16xf32, #tpu.memory_space<vmem>>, vector<1x16xf32>,
    %c0_260 = arith.constant 0 : index
    %c64_261 = arith.constant 64 : index
    %259 = vector.load %arg4[%c0_260, %c64_261] : memref<2x256xf32, #tpu.memory_space<vmem>>, vector<1x16xf32>
    %c4_262 = arith.constant 4 : index
    %c0_263 = arith.constant 0 : index
    %260 = vector.load %arg5[%c4_262, %c0_263] : memref<32x16xf32, #tpu.memory_space<vmem>>, vector<1x16xf32>
    tpu.vector_store %arg5[%c4_262, %c0_263], %259 {strides = array<i32>} : memref<32x16xf32, #tpu.memory_space<vmem>>, vector<1x16xf32>,
    %c0_264 = arith.constant 0 : index
    %c80_265 = arith.constant 80 : index
    %261 = vector.load %arg4[%c0_264, %c80_265] : memref<2x256xf32, #tpu.memory_space<vmem>>, vector<1x16xf32>
    %c5_266 = arith.constant 5 : index
    %c0_267 = arith.constant 0 : index
    %262 = vector.load %arg5[%c5_266, %c0_267] : memref<32x16xf32, #tpu.memory_space<vmem>>, vector<1x16xf32>
    tpu.vector_store %arg5[%c5_266, %c0_267], %261 {strides = array<i32>} : memref<32x16xf32, #tpu.memory_space<vmem>>, vector<1x16xf32>,
    %c0_268 = arith.constant 0 : index
    %c96_269 = arith.constant 96 : index
    %263 = vector.load %arg4[%c0_268, %c96_269] : memref<2x256xf32, #tpu.memory_space<vmem>>, vector<1x16xf32>
    %c6_270 = arith.constant 6 : index
    %c0_271 = arith.constant 0 : index
    %264 = vector.load %arg5[%c6_270, %c0_271] : memref<32x16xf32, #tpu.memory_space<vmem>>, vector<1x16xf32>
    tpu.vector_store %arg5[%c6_270, %c0_271], %263 {strides = array<i32>} : memref<32x16xf32, #tpu.memory_space<vmem>>, vector<1x16xf32>,
    %c0_272 = arith.constant 0 : index
    %c112_273 = arith.constant 112 : index
    %265 = vector.load %arg4[%c0_272, %c112_273] : memref<2x256xf32, #tpu.memory_space<vmem>>, vector<1x16xf32>
    %c7_274 = arith.constant 7 : index
    %c0_275 = arith.constant 0 : index
    %266 = vector.load %arg5[%c7_274, %c0_275] : memref<32x16xf32, #tpu.memory_space<vmem>>, vector<1x16xf32>
    tpu.vector_store %arg5[%c7_274, %c0_275], %265 {strides = array<i32>} : memref<32x16xf32, #tpu.memory_space<vmem>>, vector<1x16xf32>,
    %c0_276 = arith.constant 0 : index
    %c128_277 = arith.constant 128 : index
    %267 = vector.load %arg4[%c0_276, %c128_277] : memref<2x256xf32, #tpu.memory_space<vmem>>, vector<1x16xf32>
    %c8_278 = arith.constant 8 : index
    %c0_279 = arith.constant 0 : index
    %268 = vector.load %arg5[%c8_278, %c0_279] : memref<32x16xf32, #tpu.memory_space<vmem>>, vector<1x16xf32>
    tpu.vector_store %arg5[%c8_278, %c0_279], %267 {strides = array<i32>} : memref<32x16xf32, #tpu.memory_space<vmem>>, vector<1x16xf32>,
    %c0_280 = arith.constant 0 : index
    %c144_281 = arith.constant 144 : index
    %269 = vector.load %arg4[%c0_280, %c144_281] : memref<2x256xf32, #tpu.memory_space<vmem>>, vector<1x16xf32>
    %c9_282 = arith.constant 9 : index
    %c0_283 = arith.constant 0 : index
    %270 = vector.load %arg5[%c9_282, %c0_283] : memref<32x16xf32, #tpu.memory_space<vmem>>, vector<1x16xf32>
    tpu.vector_store %arg5[%c9_282, %c0_283], %269 {strides = array<i32>} : memref<32x16xf32, #tpu.memory_space<vmem>>, vector<1x16xf32>,
    %c0_284 = arith.constant 0 : index
    %c160_285 = arith.constant 160 : index
    %271 = vector.load %arg4[%c0_284, %c160_285] : memref<2x256xf32, #tpu.memory_space<vmem>>, vector<1x16xf32>
    %c10_286 = arith.constant 10 : index
    %c0_287 = arith.constant 0 : index
    %272 = vector.load %arg5[%c10_286, %c0_287] : memref<32x16xf32, #tpu.memory_space<vmem>>, vector<1x16xf32>
    tpu.vector_store %arg5[%c10_286, %c0_287], %271 {strides = array<i32>} : memref<32x16xf32, #tpu.memory_space<vmem>>, vector<1x16xf32>,
    %c0_288 = arith.constant 0 : index
    %c176_289 = arith.constant 176 : index
    %273 = vector.load %arg4[%c0_288, %c176_289] : memref<2x256xf32, #tpu.memory_space<vmem>>, vector<1x16xf32>
    %c11_290 = arith.constant 11 : index
    %c0_291 = arith.constant 0 : index
    %274 = vector.load %arg5[%c11_290, %c0_291] : memref<32x16xf32, #tpu.memory_space<vmem>>, vector<1x16xf32>
    tpu.vector_store %arg5[%c11_290, %c0_291], %273 {strides = array<i32>} : memref<32x16xf32, #tpu.memory_space<vmem>>, vector<1x16xf32>,
    %c0_292 = arith.constant 0 : index
    %c192_293 = arith.constant 192 : index
    %275 = vector.load %arg4[%c0_292, %c192_293] : memref<2x256xf32, #tpu.memory_space<vmem>>, vector<1x16xf32>
    %c12_294 = arith.constant 12 : index
    %c0_295 = arith.constant 0 : index
    %276 = vector.load %arg5[%c12_294, %c0_295] : memref<32x16xf32, #tpu.memory_space<vmem>>, vector<1x16xf32>
    tpu.vector_store %arg5[%c12_294, %c0_295], %275 {strides = array<i32>} : memref<32x16xf32, #tpu.memory_space<vmem>>, vector<1x16xf32>,
    %c0_296 = arith.constant 0 : index
    %c208_297 = arith.constant 208 : index
    %277 = vector.load %arg4[%c0_296, %c208_297] : memref<2x256xf32, #tpu.memory_space<vmem>>, vector<1x16xf32>
    %c13_298 = arith.constant 13 : index
    %c0_299 = arith.constant 0 : index
    %278 = vector.load %arg5[%c13_298, %c0_299] : memref<32x16xf32, #tpu.memory_space<vmem>>, vector<1x16xf32>
    tpu.vector_store %arg5[%c13_298, %c0_299], %277 {strides = array<i32>} : memref<32x16xf32, #tpu.memory_space<vmem>>, vector<1x16xf32>,
    %c0_300 = arith.constant 0 : index
    %c224_301 = arith.constant 224 : index
    %279 = vector.load %arg4[%c0_300, %c224_301] : memref<2x256xf32, #tpu.memory_space<vmem>>, vector<1x16xf32>
    %c14_302 = arith.constant 14 : index
    %c0_303 = arith.constant 0 : index
    %280 = vector.load %arg5[%c14_302, %c0_303] : memref<32x16xf32, #tpu.memory_space<vmem>>, vector<1x16xf32>
    tpu.vector_store %arg5[%c14_302, %c0_303], %279 {strides = array<i32>} : memref<32x16xf32, #tpu.memory_space<vmem>>, vector<1x16xf32>,
    %c0_304 = arith.constant 0 : index
    %c240_305 = arith.constant 240 : index
    %281 = vector.load %arg4[%c0_304, %c240_305] : memref<2x256xf32, #tpu.memory_space<vmem>>, vector<1x16xf32>
    %c15_306 = arith.constant 15 : index
    %c0_307 = arith.constant 0 : index
    %282 = vector.load %arg5[%c15_306, %c0_307] : memref<32x16xf32, #tpu.memory_space<vmem>>, vector<1x16xf32>
    tpu.vector_store %arg5[%c15_306, %c0_307], %281 {strides = array<i32>} : memref<32x16xf32, #tpu.memory_space<vmem>>, vector<1x16xf32>,
    %c1_308 = arith.constant 1 : index
    %c0_309 = arith.constant 0 : index
    %283 = vector.load %arg4[%c1_308, %c0_309] : memref<2x256xf32, #tpu.memory_space<vmem>>, vector<1x16xf32>
    %c16_310 = arith.constant 16 : index
    %c0_311 = arith.constant 0 : index
    %284 = vector.load %arg5[%c16_310, %c0_311] : memref<32x16xf32, #tpu.memory_space<vmem>>, vector<1x16xf32>
    tpu.vector_store %arg5[%c16_310, %c0_311], %283 {strides = array<i32>} : memref<32x16xf32, #tpu.memory_space<vmem>>, vector<1x16xf32>,
    %c1_312 = arith.constant 1 : index
    %c16_313 = arith.constant 16 : index
    %285 = vector.load %arg4[%c1_312, %c16_313] : memref<2x256xf32, #tpu.memory_space<vmem>>, vector<1x16xf32>
    %c17_314 = arith.constant 17 : index
    %c0_315 = arith.constant 0 : index
    %286 = vector.load %arg5[%c17_314, %c0_315] : memref<32x16xf32, #tpu.memory_space<vmem>>, vector<1x16xf32>
    tpu.vector_store %arg5[%c17_314, %c0_315], %285 {strides = array<i32>} : memref<32x16xf32, #tpu.memory_space<vmem>>, vector<1x16xf32>,
    %c1_316 = arith.constant 1 : index
    %c32_317 = arith.constant 32 : index
    %287 = vector.load %arg4[%c1_316, %c32_317] : memref<2x256xf32, #tpu.memory_space<vmem>>, vector<1x16xf32>
    %c18_318 = arith.constant 18 : index
    %c0_319 = arith.constant 0 : index
    %288 = vector.load %arg5[%c18_318, %c0_319] : memref<32x16xf32, #tpu.memory_space<vmem>>, vector<1x16xf32>
    tpu.vector_store %arg5[%c18_318, %c0_319], %287 {strides = array<i32>} : memref<32x16xf32, #tpu.memory_space<vmem>>, vector<1x16xf32>,
    %c1_320 = arith.constant 1 : index
    %c48_321 = arith.constant 48 : index
    %289 = vector.load %arg4[%c1_320, %c48_321] : memref<2x256xf32, #tpu.memory_space<vmem>>, vector<1x16xf32>
    %c19_322 = arith.constant 19 : index
    %c0_323 = arith.constant 0 : index
    %290 = vector.load %arg5[%c19_322, %c0_323] : memref<32x16xf32, #tpu.memory_space<vmem>>, vector<1x16xf32>
    tpu.vector_store %arg5[%c19_322, %c0_323], %289 {strides = array<i32>} : memref<32x16xf32, #tpu.memory_space<vmem>>, vector<1x16xf32>,
    %c1_324 = arith.constant 1 : index
    %c64_325 = arith.constant 64 : index
    %291 = vector.load %arg4[%c1_324, %c64_325] : memref<2x256xf32, #tpu.memory_space<vmem>>, vector<1x16xf32>
    %c20_326 = arith.constant 20 : index
    %c0_327 = arith.constant 0 : index
    %292 = vector.load %arg5[%c20_326, %c0_327] : memref<32x16xf32, #tpu.memory_space<vmem>>, vector<1x16xf32>
    tpu.vector_store %arg5[%c20_326, %c0_327], %291 {strides = array<i32>} : memref<32x16xf32, #tpu.memory_space<vmem>>, vector<1x16xf32>,
    %c1_328 = arith.constant 1 : index
    %c80_329 = arith.constant 80 : index
    %293 = vector.load %arg4[%c1_328, %c80_329] : memref<2x256xf32, #tpu.memory_space<vmem>>, vector<1x16xf32>
    %c21_330 = arith.constant 21 : index
    %c0_331 = arith.constant 0 : index
    %294 = vector.load %arg5[%c21_330, %c0_331] : memref<32x16xf32, #tpu.memory_space<vmem>>, vector<1x16xf32>
    tpu.vector_store %arg5[%c21_330, %c0_331], %293 {strides = array<i32>} : memref<32x16xf32, #tpu.memory_space<vmem>>, vector<1x16xf32>,
    %c1_332 = arith.constant 1 : index
    %c96_333 = arith.constant 96 : index
    %295 = vector.load %arg4[%c1_332, %c96_333] : memref<2x256xf32, #tpu.memory_space<vmem>>, vector<1x16xf32>
    %c22_334 = arith.constant 22 : index
    %c0_335 = arith.constant 0 : index
    %296 = vector.load %arg5[%c22_334, %c0_335] : memref<32x16xf32, #tpu.memory_space<vmem>>, vector<1x16xf32>
    tpu.vector_store %arg5[%c22_334, %c0_335], %295 {strides = array<i32>} : memref<32x16xf32, #tpu.memory_space<vmem>>, vector<1x16xf32>,
    %c1_336 = arith.constant 1 : index
    %c112_337 = arith.constant 112 : index
    %297 = vector.load %arg4[%c1_336, %c112_337] : memref<2x256xf32, #tpu.memory_space<vmem>>, vector<1x16xf32>
    %c23_338 = arith.constant 23 : index
    %c0_339 = arith.constant 0 : index
    %298 = vector.load %arg5[%c23_338, %c0_339] : memref<32x16xf32, #tpu.memory_space<vmem>>, vector<1x16xf32>
    tpu.vector_store %arg5[%c23_338, %c0_339], %297 {strides = array<i32>} : memref<32x16xf32, #tpu.memory_space<vmem>>, vector<1x16xf32>,
    %c1_340 = arith.constant 1 : index
    %c128_341 = arith.constant 128 : index
    %299 = vector.load %arg4[%c1_340, %c128_341] : memref<2x256xf32, #tpu.memory_space<vmem>>, vector<1x16xf32>
    %c24_342 = arith.constant 24 : index
    %c0_343 = arith.constant 0 : index
    %300 = vector.load %arg5[%c24_342, %c0_343] : memref<32x16xf32, #tpu.memory_space<vmem>>, vector<1x16xf32>
    tpu.vector_store %arg5[%c24_342, %c0_343], %299 {strides = array<i32>} : memref<32x16xf32, #tpu.memory_space<vmem>>, vector<1x16xf32>,
    %c1_344 = arith.constant 1 : index
    %c144_345 = arith.constant 144 : index
    %301 = vector.load %arg4[%c1_344, %c144_345] : memref<2x256xf32, #tpu.memory_space<vmem>>, vector<1x16xf32>
    %c25_346 = arith.constant 25 : index
    %c0_347 = arith.constant 0 : index
    %302 = vector.load %arg5[%c25_346, %c0_347] : memref<32x16xf32, #tpu.memory_space<vmem>>, vector<1x16xf32>
    tpu.vector_store %arg5[%c25_346, %c0_347], %301 {strides = array<i32>} : memref<32x16xf32, #tpu.memory_space<vmem>>, vector<1x16xf32>,
    %c1_348 = arith.constant 1 : index
    %c160_349 = arith.constant 160 : index
    %303 = vector.load %arg4[%c1_348, %c160_349] : memref<2x256xf32, #tpu.memory_space<vmem>>, vector<1x16xf32>
    %c26_350 = arith.constant 26 : index
    %c0_351 = arith.constant 0 : index
    %304 = vector.load %arg5[%c26_350, %c0_351] : memref<32x16xf32, #tpu.memory_space<vmem>>, vector<1x16xf32>
    tpu.vector_store %arg5[%c26_350, %c0_351], %303 {strides = array<i32>} : memref<32x16xf32, #tpu.memory_space<vmem>>, vector<1x16xf32>,
    %c1_352 = arith.constant 1 : index
    %c176_353 = arith.constant 176 : index
    %305 = vector.load %arg4[%c1_352, %c176_353] : memref<2x256xf32, #tpu.memory_space<vmem>>, vector<1x16xf32>
    %c27_354 = arith.constant 27 : index
    %c0_355 = arith.constant 0 : index
    %306 = vector.load %arg5[%c27_354, %c0_355] : memref<32x16xf32, #tpu.memory_space<vmem>>, vector<1x16xf32>
    tpu.vector_store %arg5[%c27_354, %c0_355], %305 {strides = array<i32>} : memref<32x16xf32, #tpu.memory_space<vmem>>, vector<1x16xf32>,
    %c1_356 = arith.constant 1 : index
    %c192_357 = arith.constant 192 : index
    %307 = vector.load %arg4[%c1_356, %c192_357] : memref<2x256xf32, #tpu.memory_space<vmem>>, vector<1x16xf32>
    %c28_358 = arith.constant 28 : index
    %c0_359 = arith.constant 0 : index
    %308 = vector.load %arg5[%c28_358, %c0_359] : memref<32x16xf32, #tpu.memory_space<vmem>>, vector<1x16xf32>
    tpu.vector_store %arg5[%c28_358, %c0_359], %307 {strides = array<i32>} : memref<32x16xf32, #tpu.memory_space<vmem>>, vector<1x16xf32>,
    %c1_360 = arith.constant 1 : index
    %c208_361 = arith.constant 208 : index
    %309 = vector.load %arg4[%c1_360, %c208_361] : memref<2x256xf32, #tpu.memory_space<vmem>>, vector<1x16xf32>
    %c29_362 = arith.constant 29 : index
    %c0_363 = arith.constant 0 : index
    %310 = vector.load %arg5[%c29_362, %c0_363] : memref<32x16xf32, #tpu.memory_space<vmem>>, vector<1x16xf32>
    tpu.vector_store %arg5[%c29_362, %c0_363], %309 {strides = array<i32>} : memref<32x16xf32, #tpu.memory_space<vmem>>, vector<1x16xf32>,
    %c1_364 = arith.constant 1 : index
    %c224_365 = arith.constant 224 : index
    %311 = vector.load %arg4[%c1_364, %c224_365] : memref<2x256xf32, #tpu.memory_space<vmem>>, vector<1x16xf32>
    %c30_366 = arith.constant 30 : index
    %c0_367 = arith.constant 0 : index
    %312 = vector.load %arg5[%c30_366, %c0_367] : memref<32x16xf32, #tpu.memory_space<vmem>>, vector<1x16xf32>
    tpu.vector_store %arg5[%c30_366, %c0_367], %311 {strides = array<i32>} : memref<32x16xf32, #tpu.memory_space<vmem>>, vector<1x16xf32>,
    %c1_368 = arith.constant 1 : index
    %c240_369 = arith.constant 240 : index
    %313 = vector.load %arg4[%c1_368, %c240_369] : memref<2x256xf32, #tpu.memory_space<vmem>>, vector<1x16xf32>
    %c31_370 = arith.constant 31 : index
    %c0_371 = arith.constant 0 : index
    %314 = vector.load %arg5[%c31_370, %c0_371] : memref<32x16xf32, #tpu.memory_space<vmem>>, vector<1x16xf32>
    tpu.vector_store %arg5[%c31_370, %c0_371], %313 {strides = array<i32>} : memref<32x16xf32, #tpu.memory_space<vmem>>, vector<1x16xf32>,
    %c0_372 = arith.constant 0 : index
    %c0_373 = arith.constant 0 : index
    %315 = vector.load %arg5[%c0_372, %c0_373] : memref<32x16xf32, #tpu.memory_space<vmem>>, vector<32x16xf32>
    %316 = vector.extract_strided_slice %249 {offsets = [0, 0], sizes = [1, 256], strides = [1, 1]} : vector<2x256xf32> to vector<1x256xf32>
    %317 = arith.addf %0, %316 : vector<1x256xf32>
    %318 = vector.extract_strided_slice %249 {offsets = [1, 0], sizes = [1, 256], strides = [1, 1]} : vector<2x256xf32> to vector<1x256xf32>
    %319 = arith.addf %1, %318 : vector<1x256xf32>
    %320 = math.floor %317 : vector<1x256xf32>
    %321 = math.floor %319 : vector<1x256xf32>
    %322 = arith.subf %317, %320 : vector<1x256xf32>
    %cst_374 = arith.constant 1.000000e+00 : f32
    %323 = vector.broadcast %cst_374 : f32 to vector<1x256xf32>
    %324 = arith.subf %323, %322 : vector<1x256xf32>
    %325 = arith.subf %319, %321 : vector<1x256xf32>
    %cst_375 = arith.constant 1.000000e+00 : f32
    %326 = vector.broadcast %cst_375 : f32 to vector<1x256xf32>
    %327 = arith.subf %326, %325 : vector<1x256xf32>
    %328 = arith.fptosi %320 : vector<1x256xf32> to vector<1x256xi32>
    %329 = arith.fptosi %321 : vector<1x256xf32> to vector<1x256xi32>
    %330 = vector.broadcast %2 : vector<16x1xi32> to vector<16x256xi32>
    %331 = vector.broadcast %328 : vector<1x256xi32> to vector<16x256xi32>
    %332 = arith.cmpi eq, %330, %331 : vector<16x256xi32>
    %c1_i32_376 = arith.constant 1 : i32
    %333 = vector.broadcast %c1_i32_376 : i32 to vector<1x256xi32>
    %334 = arith.addi %328, %333 : vector<1x256xi32>
    %335 = vector.broadcast %2 : vector<16x1xi32> to vector<16x256xi32>
    %336 = vector.broadcast %334 : vector<1x256xi32> to vector<16x256xi32>
    %337 = arith.cmpi eq, %335, %336 : vector<16x256xi32>
    %cst_377 = arith.constant 0.000000e+00 : f32
    %338 = vector.shape_cast %322 : vector<1x256xf32> to vector<1x256xf32>
    %339 = vector.broadcast %338 : vector<1x256xf32> to vector<16x256xf32>
    %340 = vector.broadcast %cst_377 : f32 to vector<16x256xf32>
    %341 = arith.select %337, %339, %340 : vector<16x256xi1>, vector<16x256xf32>
    %342 = vector.shape_cast %324 : vector<1x256xf32> to vector<1x256xf32>
    %343 = vector.broadcast %342 : vector<1x256xf32> to vector<16x256xf32>
    %344 = arith.select %332, %343, %341 : vector<16x256xi1>, vector<16x256xf32>
    %345 = vector.broadcast %3 : vector<16x1xi32> to vector<16x256xi32>
    %346 = vector.broadcast %329 : vector<1x256xi32> to vector<16x256xi32>
    %347 = arith.cmpi eq, %345, %346 : vector<16x256xi32>
    %c1_i32_378 = arith.constant 1 : i32
    %348 = vector.broadcast %c1_i32_378 : i32 to vector<1x256xi32>
    %349 = arith.addi %329, %348 : vector<1x256xi32>
    %350 = vector.broadcast %3 : vector<16x1xi32> to vector<16x256xi32>
    %351 = vector.broadcast %349 : vector<1x256xi32> to vector<16x256xi32>
    %352 = arith.cmpi eq, %350, %351 : vector<16x256xi32>
    %cst_379 = arith.constant 0.000000e+00 : f32
    %353 = vector.shape_cast %325 : vector<1x256xf32> to vector<1x256xf32>
    %354 = vector.broadcast %353 : vector<1x256xf32> to vector<16x256xf32>
    %355 = vector.broadcast %cst_379 : f32 to vector<16x256xf32>
    %356 = arith.select %352, %354, %355 : vector<16x256xi1>, vector<16x256xf32>
    %357 = vector.shape_cast %327 : vector<1x256xf32> to vector<1x256xf32>
    %358 = vector.broadcast %357 : vector<1x256xf32> to vector<16x256xf32>
    %359 = arith.select %347, %358, %356 : vector<16x256xi1>, vector<16x256xf32>
    %cst_380 = arith.constant dense<0.000000e+00> : vector<32x256xf32>
    %360 = tpu.matmul %315, %359, %cst_380 {dimension_numbers = #tpu.dot_dimension_numbers<[1], [0], [0], [1], [0, 0, 1, 1], [], []>} : vector<32x16xf32>, vector<16x256xf32>, vector<32x256xf32> -> vector<32x256xf32>
    %361 = vector.extract_strided_slice %360 {offsets = [0, 0], sizes = [16, 256], strides = [1, 1]} : vector<32x256xf32> to vector<16x256xf32>
    %362 = arith.mulf %361, %344 : vector<16x256xf32>
    %cst_381 = arith.constant dense<0.000000e+00> : vector<256xf32>
    %363 = vector.multi_reduction <add>, %362, %cst_381 [0] : vector<16x256xf32> to vector<256xf32>
    %364 = vector.shape_cast %363 : vector<256xf32> to vector<1x256xf32>
    %365 = vector.extract_strided_slice %360 {offsets = [16, 0], sizes = [16, 256], strides = [1, 1]} : vector<32x256xf32> to vector<16x256xf32>
    %366 = arith.mulf %365, %344 : vector<16x256xf32>
    %cst_382 = arith.constant dense<0.000000e+00> : vector<256xf32>
    %367 = vector.multi_reduction <add>, %366, %cst_382 [0] : vector<16x256xf32> to vector<256xf32>
    %368 = vector.shape_cast %367 : vector<256xf32> to vector<1x256xf32>
    %369 = tpu.concatenate %364, %368 in 0 : vector<1x256xf32>, vector<1x256xf32> -> vector<2x256xf32>
    %370 = arith.addf %249, %369 : vector<2x256xf32>
    %c0_383 = arith.constant 0 : index
    %c0_384 = arith.constant 0 : index
    %371 = vector.load %arg4[%c0_383, %c0_384] : memref<2x256xf32, #tpu.memory_space<vmem>>, vector<2x256xf32>
    tpu.vector_store %arg4[%c0_383, %c0_384], %370 {strides = array<i32>} : memref<2x256xf32, #tpu.memory_space<vmem>>, vector<2x256xf32>,
    %c0_385 = arith.constant 0 : index
    %c0_386 = arith.constant 0 : index
    %372 = vector.load %arg4[%c0_385, %c0_386] : memref<2x256xf32, #tpu.memory_space<vmem>>, vector<1x16xf32>
    %c0_387 = arith.constant 0 : index
    %c0_388 = arith.constant 0 : index
    %373 = vector.load %arg5[%c0_387, %c0_388] : memref<32x16xf32, #tpu.memory_space<vmem>>, vector<1x16xf32>
    tpu.vector_store %arg5[%c0_387, %c0_388], %372 {strides = array<i32>} : memref<32x16xf32, #tpu.memory_space<vmem>>, vector<1x16xf32>,
    %c0_389 = arith.constant 0 : index
    %c16_390 = arith.constant 16 : index
    %374 = vector.load %arg4[%c0_389, %c16_390] : memref<2x256xf32, #tpu.memory_space<vmem>>, vector<1x16xf32>
    %c1_391 = arith.constant 1 : index
    %c0_392 = arith.constant 0 : index
    %375 = vector.load %arg5[%c1_391, %c0_392] : memref<32x16xf32, #tpu.memory_space<vmem>>, vector<1x16xf32>
    tpu.vector_store %arg5[%c1_391, %c0_392], %374 {strides = array<i32>} : memref<32x16xf32, #tpu.memory_space<vmem>>, vector<1x16xf32>,
    %c0_393 = arith.constant 0 : index
    %c32_394 = arith.constant 32 : index
    %376 = vector.load %arg4[%c0_393, %c32_394] : memref<2x256xf32, #tpu.memory_space<vmem>>, vector<1x16xf32>
    %c2_395 = arith.constant 2 : index
    %c0_396 = arith.constant 0 : index
    %377 = vector.load %arg5[%c2_395, %c0_396] : memref<32x16xf32, #tpu.memory_space<vmem>>, vector<1x16xf32>
    tpu.vector_store %arg5[%c2_395, %c0_396], %376 {strides = array<i32>} : memref<32x16xf32, #tpu.memory_space<vmem>>, vector<1x16xf32>,
    %c0_397 = arith.constant 0 : index
    %c48_398 = arith.constant 48 : index
    %378 = vector.load %arg4[%c0_397, %c48_398] : memref<2x256xf32, #tpu.memory_space<vmem>>, vector<1x16xf32>
    %c3_399 = arith.constant 3 : index
    %c0_400 = arith.constant 0 : index
    %379 = vector.load %arg5[%c3_399, %c0_400] : memref<32x16xf32, #tpu.memory_space<vmem>>, vector<1x16xf32>
    tpu.vector_store %arg5[%c3_399, %c0_400], %378 {strides = array<i32>} : memref<32x16xf32, #tpu.memory_space<vmem>>, vector<1x16xf32>,
    %c0_401 = arith.constant 0 : index
    %c64_402 = arith.constant 64 : index
    %380 = vector.load %arg4[%c0_401, %c64_402] : memref<2x256xf32, #tpu.memory_space<vmem>>, vector<1x16xf32>
    %c4_403 = arith.constant 4 : index
    %c0_404 = arith.constant 0 : index
    %381 = vector.load %arg5[%c4_403, %c0_404] : memref<32x16xf32, #tpu.memory_space<vmem>>, vector<1x16xf32>
    tpu.vector_store %arg5[%c4_403, %c0_404], %380 {strides = array<i32>} : memref<32x16xf32, #tpu.memory_space<vmem>>, vector<1x16xf32>,
    %c0_405 = arith.constant 0 : index
    %c80_406 = arith.constant 80 : index
    %382 = vector.load %arg4[%c0_405, %c80_406] : memref<2x256xf32, #tpu.memory_space<vmem>>, vector<1x16xf32>
    %c5_407 = arith.constant 5 : index
    %c0_408 = arith.constant 0 : index
    %383 = vector.load %arg5[%c5_407, %c0_408] : memref<32x16xf32, #tpu.memory_space<vmem>>, vector<1x16xf32>
    tpu.vector_store %arg5[%c5_407, %c0_408], %382 {strides = array<i32>} : memref<32x16xf32, #tpu.memory_space<vmem>>, vector<1x16xf32>,
    %c0_409 = arith.constant 0 : index
    %c96_410 = arith.constant 96 : index
    %384 = vector.load %arg4[%c0_409, %c96_410] : memref<2x256xf32, #tpu.memory_space<vmem>>, vector<1x16xf32>
    %c6_411 = arith.constant 6 : index
    %c0_412 = arith.constant 0 : index
    %385 = vector.load %arg5[%c6_411, %c0_412] : memref<32x16xf32, #tpu.memory_space<vmem>>, vector<1x16xf32>
    tpu.vector_store %arg5[%c6_411, %c0_412], %384 {strides = array<i32>} : memref<32x16xf32, #tpu.memory_space<vmem>>, vector<1x16xf32>,
    %c0_413 = arith.constant 0 : index
    %c112_414 = arith.constant 112 : index
    %386 = vector.load %arg4[%c0_413, %c112_414] : memref<2x256xf32, #tpu.memory_space<vmem>>, vector<1x16xf32>
    %c7_415 = arith.constant 7 : index
    %c0_416 = arith.constant 0 : index
    %387 = vector.load %arg5[%c7_415, %c0_416] : memref<32x16xf32, #tpu.memory_space<vmem>>, vector<1x16xf32>
    tpu.vector_store %arg5[%c7_415, %c0_416], %386 {strides = array<i32>} : memref<32x16xf32, #tpu.memory_space<vmem>>, vector<1x16xf32>,
    %c0_417 = arith.constant 0 : index
    %c128_418 = arith.constant 128 : index
    %388 = vector.load %arg4[%c0_417, %c128_418] : memref<2x256xf32, #tpu.memory_space<vmem>>, vector<1x16xf32>
    %c8_419 = arith.constant 8 : index
    %c0_420 = arith.constant 0 : index
    %389 = vector.load %arg5[%c8_419, %c0_420] : memref<32x16xf32, #tpu.memory_space<vmem>>, vector<1x16xf32>
    tpu.vector_store %arg5[%c8_419, %c0_420], %388 {strides = array<i32>} : memref<32x16xf32, #tpu.memory_space<vmem>>, vector<1x16xf32>,
    %c0_421 = arith.constant 0 : index
    %c144_422 = arith.constant 144 : index
    %390 = vector.load %arg4[%c0_421, %c144_422] : memref<2x256xf32, #tpu.memory_space<vmem>>, vector<1x16xf32>
    %c9_423 = arith.constant 9 : index
    %c0_424 = arith.constant 0 : index
    %391 = vector.load %arg5[%c9_423, %c0_424] : memref<32x16xf32, #tpu.memory_space<vmem>>, vector<1x16xf32>
    tpu.vector_store %arg5[%c9_423, %c0_424], %390 {strides = array<i32>} : memref<32x16xf32, #tpu.memory_space<vmem>>, vector<1x16xf32>,
    %c0_425 = arith.constant 0 : index
    %c160_426 = arith.constant 160 : index
    %392 = vector.load %arg4[%c0_425, %c160_426] : memref<2x256xf32, #tpu.memory_space<vmem>>, vector<1x16xf32>
    %c10_427 = arith.constant 10 : index
    %c0_428 = arith.constant 0 : index
    %393 = vector.load %arg5[%c10_427, %c0_428] : memref<32x16xf32, #tpu.memory_space<vmem>>, vector<1x16xf32>
    tpu.vector_store %arg5[%c10_427, %c0_428], %392 {strides = array<i32>} : memref<32x16xf32, #tpu.memory_space<vmem>>, vector<1x16xf32>,
    %c0_429 = arith.constant 0 : index
    %c176_430 = arith.constant 176 : index
    %394 = vector.load %arg4[%c0_429, %c176_430] : memref<2x256xf32, #tpu.memory_space<vmem>>, vector<1x16xf32>
    %c11_431 = arith.constant 11 : index
    %c0_432 = arith.constant 0 : index
    %395 = vector.load %arg5[%c11_431, %c0_432] : memref<32x16xf32, #tpu.memory_space<vmem>>, vector<1x16xf32>
    tpu.vector_store %arg5[%c11_431, %c0_432], %394 {strides = array<i32>} : memref<32x16xf32, #tpu.memory_space<vmem>>, vector<1x16xf32>,
    %c0_433 = arith.constant 0 : index
    %c192_434 = arith.constant 192 : index
    %396 = vector.load %arg4[%c0_433, %c192_434] : memref<2x256xf32, #tpu.memory_space<vmem>>, vector<1x16xf32>
    %c12_435 = arith.constant 12 : index
    %c0_436 = arith.constant 0 : index
    %397 = vector.load %arg5[%c12_435, %c0_436] : memref<32x16xf32, #tpu.memory_space<vmem>>, vector<1x16xf32>
    tpu.vector_store %arg5[%c12_435, %c0_436], %396 {strides = array<i32>} : memref<32x16xf32, #tpu.memory_space<vmem>>, vector<1x16xf32>,
    %c0_437 = arith.constant 0 : index
    %c208_438 = arith.constant 208 : index
    %398 = vector.load %arg4[%c0_437, %c208_438] : memref<2x256xf32, #tpu.memory_space<vmem>>, vector<1x16xf32>
    %c13_439 = arith.constant 13 : index
    %c0_440 = arith.constant 0 : index
    %399 = vector.load %arg5[%c13_439, %c0_440] : memref<32x16xf32, #tpu.memory_space<vmem>>, vector<1x16xf32>
    tpu.vector_store %arg5[%c13_439, %c0_440], %398 {strides = array<i32>} : memref<32x16xf32, #tpu.memory_space<vmem>>, vector<1x16xf32>,
    %c0_441 = arith.constant 0 : index
    %c224_442 = arith.constant 224 : index
    %400 = vector.load %arg4[%c0_441, %c224_442] : memref<2x256xf32, #tpu.memory_space<vmem>>, vector<1x16xf32>
    %c14_443 = arith.constant 14 : index
    %c0_444 = arith.constant 0 : index
    %401 = vector.load %arg5[%c14_443, %c0_444] : memref<32x16xf32, #tpu.memory_space<vmem>>, vector<1x16xf32>
    tpu.vector_store %arg5[%c14_443, %c0_444], %400 {strides = array<i32>} : memref<32x16xf32, #tpu.memory_space<vmem>>, vector<1x16xf32>,
    %c0_445 = arith.constant 0 : index
    %c240_446 = arith.constant 240 : index
    %402 = vector.load %arg4[%c0_445, %c240_446] : memref<2x256xf32, #tpu.memory_space<vmem>>, vector<1x16xf32>
    %c15_447 = arith.constant 15 : index
    %c0_448 = arith.constant 0 : index
    %403 = vector.load %arg5[%c15_447, %c0_448] : memref<32x16xf32, #tpu.memory_space<vmem>>, vector<1x16xf32>
    tpu.vector_store %arg5[%c15_447, %c0_448], %402 {strides = array<i32>} : memref<32x16xf32, #tpu.memory_space<vmem>>, vector<1x16xf32>,
    %c1_449 = arith.constant 1 : index
    %c0_450 = arith.constant 0 : index
    %404 = vector.load %arg4[%c1_449, %c0_450] : memref<2x256xf32, #tpu.memory_space<vmem>>, vector<1x16xf32>
    %c16_451 = arith.constant 16 : index
    %c0_452 = arith.constant 0 : index
    %405 = vector.load %arg5[%c16_451, %c0_452] : memref<32x16xf32, #tpu.memory_space<vmem>>, vector<1x16xf32>
    tpu.vector_store %arg5[%c16_451, %c0_452], %404 {strides = array<i32>} : memref<32x16xf32, #tpu.memory_space<vmem>>, vector<1x16xf32>,
    %c1_453 = arith.constant 1 : index
    %c16_454 = arith.constant 16 : index
    %406 = vector.load %arg4[%c1_453, %c16_454] : memref<2x256xf32, #tpu.memory_space<vmem>>, vector<1x16xf32>
    %c17_455 = arith.constant 17 : index
    %c0_456 = arith.constant 0 : index
    %407 = vector.load %arg5[%c17_455, %c0_456] : memref<32x16xf32, #tpu.memory_space<vmem>>, vector<1x16xf32>
    tpu.vector_store %arg5[%c17_455, %c0_456], %406 {strides = array<i32>} : memref<32x16xf32, #tpu.memory_space<vmem>>, vector<1x16xf32>,
    %c1_457 = arith.constant 1 : index
    %c32_458 = arith.constant 32 : index
    %408 = vector.load %arg4[%c1_457, %c32_458] : memref<2x256xf32, #tpu.memory_space<vmem>>, vector<1x16xf32>
    %c18_459 = arith.constant 18 : index
    %c0_460 = arith.constant 0 : index
    %409 = vector.load %arg5[%c18_459, %c0_460] : memref<32x16xf32, #tpu.memory_space<vmem>>, vector<1x16xf32>
    tpu.vector_store %arg5[%c18_459, %c0_460], %408 {strides = array<i32>} : memref<32x16xf32, #tpu.memory_space<vmem>>, vector<1x16xf32>,
    %c1_461 = arith.constant 1 : index
    %c48_462 = arith.constant 48 : index
    %410 = vector.load %arg4[%c1_461, %c48_462] : memref<2x256xf32, #tpu.memory_space<vmem>>, vector<1x16xf32>
    %c19_463 = arith.constant 19 : index
    %c0_464 = arith.constant 0 : index
    %411 = vector.load %arg5[%c19_463, %c0_464] : memref<32x16xf32, #tpu.memory_space<vmem>>, vector<1x16xf32>
    tpu.vector_store %arg5[%c19_463, %c0_464], %410 {strides = array<i32>} : memref<32x16xf32, #tpu.memory_space<vmem>>, vector<1x16xf32>,
    %c1_465 = arith.constant 1 : index
    %c64_466 = arith.constant 64 : index
    %412 = vector.load %arg4[%c1_465, %c64_466] : memref<2x256xf32, #tpu.memory_space<vmem>>, vector<1x16xf32>
    %c20_467 = arith.constant 20 : index
    %c0_468 = arith.constant 0 : index
    %413 = vector.load %arg5[%c20_467, %c0_468] : memref<32x16xf32, #tpu.memory_space<vmem>>, vector<1x16xf32>
    tpu.vector_store %arg5[%c20_467, %c0_468], %412 {strides = array<i32>} : memref<32x16xf32, #tpu.memory_space<vmem>>, vector<1x16xf32>,
    %c1_469 = arith.constant 1 : index
    %c80_470 = arith.constant 80 : index
    %414 = vector.load %arg4[%c1_469, %c80_470] : memref<2x256xf32, #tpu.memory_space<vmem>>, vector<1x16xf32>
    %c21_471 = arith.constant 21 : index
    %c0_472 = arith.constant 0 : index
    %415 = vector.load %arg5[%c21_471, %c0_472] : memref<32x16xf32, #tpu.memory_space<vmem>>, vector<1x16xf32>
    tpu.vector_store %arg5[%c21_471, %c0_472], %414 {strides = array<i32>} : memref<32x16xf32, #tpu.memory_space<vmem>>, vector<1x16xf32>,
    %c1_473 = arith.constant 1 : index
    %c96_474 = arith.constant 96 : index
    %416 = vector.load %arg4[%c1_473, %c96_474] : memref<2x256xf32, #tpu.memory_space<vmem>>, vector<1x16xf32>
    %c22_475 = arith.constant 22 : index
    %c0_476 = arith.constant 0 : index
    %417 = vector.load %arg5[%c22_475, %c0_476] : memref<32x16xf32, #tpu.memory_space<vmem>>, vector<1x16xf32>
    tpu.vector_store %arg5[%c22_475, %c0_476], %416 {strides = array<i32>} : memref<32x16xf32, #tpu.memory_space<vmem>>, vector<1x16xf32>,
    %c1_477 = arith.constant 1 : index
    %c112_478 = arith.constant 112 : index
    %418 = vector.load %arg4[%c1_477, %c112_478] : memref<2x256xf32, #tpu.memory_space<vmem>>, vector<1x16xf32>
    %c23_479 = arith.constant 23 : index
    %c0_480 = arith.constant 0 : index
    %419 = vector.load %arg5[%c23_479, %c0_480] : memref<32x16xf32, #tpu.memory_space<vmem>>, vector<1x16xf32>
    tpu.vector_store %arg5[%c23_479, %c0_480], %418 {strides = array<i32>} : memref<32x16xf32, #tpu.memory_space<vmem>>, vector<1x16xf32>,
    %c1_481 = arith.constant 1 : index
    %c128_482 = arith.constant 128 : index
    %420 = vector.load %arg4[%c1_481, %c128_482] : memref<2x256xf32, #tpu.memory_space<vmem>>, vector<1x16xf32>
    %c24_483 = arith.constant 24 : index
    %c0_484 = arith.constant 0 : index
    %421 = vector.load %arg5[%c24_483, %c0_484] : memref<32x16xf32, #tpu.memory_space<vmem>>, vector<1x16xf32>
    tpu.vector_store %arg5[%c24_483, %c0_484], %420 {strides = array<i32>} : memref<32x16xf32, #tpu.memory_space<vmem>>, vector<1x16xf32>,
    %c1_485 = arith.constant 1 : index
    %c144_486 = arith.constant 144 : index
    %422 = vector.load %arg4[%c1_485, %c144_486] : memref<2x256xf32, #tpu.memory_space<vmem>>, vector<1x16xf32>
    %c25_487 = arith.constant 25 : index
    %c0_488 = arith.constant 0 : index
    %423 = vector.load %arg5[%c25_487, %c0_488] : memref<32x16xf32, #tpu.memory_space<vmem>>, vector<1x16xf32>
    tpu.vector_store %arg5[%c25_487, %c0_488], %422 {strides = array<i32>} : memref<32x16xf32, #tpu.memory_space<vmem>>, vector<1x16xf32>,
    %c1_489 = arith.constant 1 : index
    %c160_490 = arith.constant 160 : index
    %424 = vector.load %arg4[%c1_489, %c160_490] : memref<2x256xf32, #tpu.memory_space<vmem>>, vector<1x16xf32>
    %c26_491 = arith.constant 26 : index
    %c0_492 = arith.constant 0 : index
    %425 = vector.load %arg5[%c26_491, %c0_492] : memref<32x16xf32, #tpu.memory_space<vmem>>, vector<1x16xf32>
    tpu.vector_store %arg5[%c26_491, %c0_492], %424 {strides = array<i32>} : memref<32x16xf32, #tpu.memory_space<vmem>>, vector<1x16xf32>,
    %c1_493 = arith.constant 1 : index
    %c176_494 = arith.constant 176 : index
    %426 = vector.load %arg4[%c1_493, %c176_494] : memref<2x256xf32, #tpu.memory_space<vmem>>, vector<1x16xf32>
    %c27_495 = arith.constant 27 : index
    %c0_496 = arith.constant 0 : index
    %427 = vector.load %arg5[%c27_495, %c0_496] : memref<32x16xf32, #tpu.memory_space<vmem>>, vector<1x16xf32>
    tpu.vector_store %arg5[%c27_495, %c0_496], %426 {strides = array<i32>} : memref<32x16xf32, #tpu.memory_space<vmem>>, vector<1x16xf32>,
    %c1_497 = arith.constant 1 : index
    %c192_498 = arith.constant 192 : index
    %428 = vector.load %arg4[%c1_497, %c192_498] : memref<2x256xf32, #tpu.memory_space<vmem>>, vector<1x16xf32>
    %c28_499 = arith.constant 28 : index
    %c0_500 = arith.constant 0 : index
    %429 = vector.load %arg5[%c28_499, %c0_500] : memref<32x16xf32, #tpu.memory_space<vmem>>, vector<1x16xf32>
    tpu.vector_store %arg5[%c28_499, %c0_500], %428 {strides = array<i32>} : memref<32x16xf32, #tpu.memory_space<vmem>>, vector<1x16xf32>,
    %c1_501 = arith.constant 1 : index
    %c208_502 = arith.constant 208 : index
    %430 = vector.load %arg4[%c1_501, %c208_502] : memref<2x256xf32, #tpu.memory_space<vmem>>, vector<1x16xf32>
    %c29_503 = arith.constant 29 : index
    %c0_504 = arith.constant 0 : index
    %431 = vector.load %arg5[%c29_503, %c0_504] : memref<32x16xf32, #tpu.memory_space<vmem>>, vector<1x16xf32>
    tpu.vector_store %arg5[%c29_503, %c0_504], %430 {strides = array<i32>} : memref<32x16xf32, #tpu.memory_space<vmem>>, vector<1x16xf32>,
    %c1_505 = arith.constant 1 : index
    %c224_506 = arith.constant 224 : index
    %432 = vector.load %arg4[%c1_505, %c224_506] : memref<2x256xf32, #tpu.memory_space<vmem>>, vector<1x16xf32>
    %c30_507 = arith.constant 30 : index
    %c0_508 = arith.constant 0 : index
    %433 = vector.load %arg5[%c30_507, %c0_508] : memref<32x16xf32, #tpu.memory_space<vmem>>, vector<1x16xf32>
    tpu.vector_store %arg5[%c30_507, %c0_508], %432 {strides = array<i32>} : memref<32x16xf32, #tpu.memory_space<vmem>>, vector<1x16xf32>,
    %c1_509 = arith.constant 1 : index
    %c240_510 = arith.constant 240 : index
    %434 = vector.load %arg4[%c1_509, %c240_510] : memref<2x256xf32, #tpu.memory_space<vmem>>, vector<1x16xf32>
    %c31_511 = arith.constant 31 : index
    %c0_512 = arith.constant 0 : index
    %435 = vector.load %arg5[%c31_511, %c0_512] : memref<32x16xf32, #tpu.memory_space<vmem>>, vector<1x16xf32>
    tpu.vector_store %arg5[%c31_511, %c0_512], %434 {strides = array<i32>} : memref<32x16xf32, #tpu.memory_space<vmem>>, vector<1x16xf32>,
    %c0_513 = arith.constant 0 : index
    %c0_514 = arith.constant 0 : index
    %436 = vector.load %arg5[%c0_513, %c0_514] : memref<32x16xf32, #tpu.memory_space<vmem>>, vector<32x16xf32>
    %437 = vector.extract_strided_slice %370 {offsets = [0, 0], sizes = [1, 256], strides = [1, 1]} : vector<2x256xf32> to vector<1x256xf32>
    %438 = arith.addf %0, %437 : vector<1x256xf32>
    %439 = vector.extract_strided_slice %370 {offsets = [1, 0], sizes = [1, 256], strides = [1, 1]} : vector<2x256xf32> to vector<1x256xf32>
    %440 = arith.addf %1, %439 : vector<1x256xf32>
    %441 = math.floor %438 : vector<1x256xf32>
    %442 = math.floor %440 : vector<1x256xf32>
    %443 = arith.subf %438, %441 : vector<1x256xf32>
    %cst_515 = arith.constant 1.000000e+00 : f32
    %444 = vector.broadcast %cst_515 : f32 to vector<1x256xf32>
    %445 = arith.subf %444, %443 : vector<1x256xf32>
    %446 = arith.subf %440, %442 : vector<1x256xf32>
    %cst_516 = arith.constant 1.000000e+00 : f32
    %447 = vector.broadcast %cst_516 : f32 to vector<1x256xf32>
    %448 = arith.subf %447, %446 : vector<1x256xf32>
    %449 = arith.fptosi %441 : vector<1x256xf32> to vector<1x256xi32>
    %450 = arith.fptosi %442 : vector<1x256xf32> to vector<1x256xi32>
    %451 = vector.broadcast %2 : vector<16x1xi32> to vector<16x256xi32>
    %452 = vector.broadcast %449 : vector<1x256xi32> to vector<16x256xi32>
    %453 = arith.cmpi eq, %451, %452 : vector<16x256xi32>
    %c1_i32_517 = arith.constant 1 : i32
    %454 = vector.broadcast %c1_i32_517 : i32 to vector<1x256xi32>
    %455 = arith.addi %449, %454 : vector<1x256xi32>
    %456 = vector.broadcast %2 : vector<16x1xi32> to vector<16x256xi32>
    %457 = vector.broadcast %455 : vector<1x256xi32> to vector<16x256xi32>
    %458 = arith.cmpi eq, %456, %457 : vector<16x256xi32>
    %cst_518 = arith.constant 0.000000e+00 : f32
    %459 = vector.shape_cast %443 : vector<1x256xf32> to vector<1x256xf32>
    %460 = vector.broadcast %459 : vector<1x256xf32> to vector<16x256xf32>
    %461 = vector.broadcast %cst_518 : f32 to vector<16x256xf32>
    %462 = arith.select %458, %460, %461 : vector<16x256xi1>, vector<16x256xf32>
    %463 = vector.shape_cast %445 : vector<1x256xf32> to vector<1x256xf32>
    %464 = vector.broadcast %463 : vector<1x256xf32> to vector<16x256xf32>
    %465 = arith.select %453, %464, %462 : vector<16x256xi1>, vector<16x256xf32>
    %466 = vector.broadcast %3 : vector<16x1xi32> to vector<16x256xi32>
    %467 = vector.broadcast %450 : vector<1x256xi32> to vector<16x256xi32>
    %468 = arith.cmpi eq, %466, %467 : vector<16x256xi32>
    %c1_i32_519 = arith.constant 1 : i32
    %469 = vector.broadcast %c1_i32_519 : i32 to vector<1x256xi32>
    %470 = arith.addi %450, %469 : vector<1x256xi32>
    %471 = vector.broadcast %3 : vector<16x1xi32> to vector<16x256xi32>
    %472 = vector.broadcast %470 : vector<1x256xi32> to vector<16x256xi32>
    %473 = arith.cmpi eq, %471, %472 : vector<16x256xi32>
    %cst_520 = arith.constant 0.000000e+00 : f32
    %474 = vector.shape_cast %446 : vector<1x256xf32> to vector<1x256xf32>
    %475 = vector.broadcast %474 : vector<1x256xf32> to vector<16x256xf32>
    %476 = vector.broadcast %cst_520 : f32 to vector<16x256xf32>
    %477 = arith.select %473, %475, %476 : vector<16x256xi1>, vector<16x256xf32>
    %478 = vector.shape_cast %448 : vector<1x256xf32> to vector<1x256xf32>
    %479 = vector.broadcast %478 : vector<1x256xf32> to vector<16x256xf32>
    %480 = arith.select %468, %479, %477 : vector<16x256xi1>, vector<16x256xf32>
    %cst_521 = arith.constant dense<0.000000e+00> : vector<32x256xf32>
    %481 = tpu.matmul %436, %480, %cst_521 {dimension_numbers = #tpu.dot_dimension_numbers<[1], [0], [0], [1], [0, 0, 1, 1], [], []>} : vector<32x16xf32>, vector<16x256xf32>, vector<32x256xf32> -> vector<32x256xf32>
    %482 = vector.extract_strided_slice %481 {offsets = [0, 0], sizes = [16, 256], strides = [1, 1]} : vector<32x256xf32> to vector<16x256xf32>
    %483 = arith.mulf %482, %465 : vector<16x256xf32>
    %cst_522 = arith.constant dense<0.000000e+00> : vector<256xf32>
    %484 = vector.multi_reduction <add>, %483, %cst_522 [0] : vector<16x256xf32> to vector<256xf32>
    %485 = vector.shape_cast %484 : vector<256xf32> to vector<1x256xf32>
    %486 = vector.extract_strided_slice %481 {offsets = [16, 0], sizes = [16, 256], strides = [1, 1]} : vector<32x256xf32> to vector<16x256xf32>
    %487 = arith.mulf %486, %465 : vector<16x256xf32>
    %cst_523 = arith.constant dense<0.000000e+00> : vector<256xf32>
    %488 = vector.multi_reduction <add>, %487, %cst_523 [0] : vector<16x256xf32> to vector<256xf32>
    %489 = vector.shape_cast %488 : vector<256xf32> to vector<1x256xf32>
    %490 = tpu.concatenate %485, %489 in 0 : vector<1x256xf32>, vector<1x256xf32> -> vector<2x256xf32>
    %491 = arith.addf %370, %490 : vector<2x256xf32>
    %c0_524 = arith.constant 0 : index
    %c0_525 = arith.constant 0 : index
    %c0_526 = arith.constant 0 : index
    %492 = vector.load %arg3[%c0_524, %c0_525, %c0_526] : memref<1x2x256xf32, #tpu.memory_space<vmem>>, vector<1x2x256xf32>
    %493 = vector.shape_cast %492 : vector<1x2x256xf32> to vector<2x256xf32>
    %494 = vector.shape_cast %491 : vector<2x256xf32> to vector<1x2x256xf32>
    tpu.vector_store %arg3[%c0_524, %c0_525, %c0_526], %494 {strides = array<i32>} : memref<1x2x256xf32, #tpu.memory_space<vmem>>, vector<1x2x256xf32>,
    return
  }
  func.func @transform_0(%arg0: i32) -> (i32, i32) {
    %c0_i32 = arith.constant 0 : i32
    %c0_i32_0 = arith.constant 0 : i32
    %c0_i32_1 = arith.constant 0 : i32
    return %c0_i32, %c0_i32_0 : i32, i32
  }
  func.func @transform_1(%arg0: i32) -> (i32, i32, i32) {
    %c0_i32 = arith.constant 0 : i32
    %c0_i32_0 = arith.constant 0 : i32
    %c0_i32_1 = arith.constant 0 : i32
    return %arg0, %c0_i32, %c0_i32_0 : i32, i32, i32
  }
  func.func @transform_2(%arg0: i32) -> (i32, i32, i32) {
    %c0_i32 = arith.constant 0 : i32
    %c0_i32_0 = arith.constant 0 : i32
    %c0_i32_1 = arith.constant 0 : i32
    return %arg0, %c0_i32, %c0_i32_0 : i32, i32, i32
  }
}

</mosaic_0001>

<bundles_post_ra>
// kernel: tpu_custom_call.1
= control target key start
LH: loop header
LB: loop body
LE: loop exit
PB: predicated region body
PF: predicated region fallthrough
CT: control target
= control target key end

     0   :  { %7 = vsyncpa [#allocation5], 0  ;;  %s3687_s0 = inlined_call_operand.hbm [shape: f32[2,256], index: 0, kind: input, shape index: {}]   ;;  %s3688_s1 = inlined_call_operand.hbm [shape: f32[2,2,256], index: 1, kind: input, shape index: {}]   ;;  %s3689_s2 = inlined_call_operand.hbm [shape: f32[2,2,256], index: 2, kind: output, shape index: {}]  }
   0x1   :  { %8 = vsyncpa [#allocation8], 0 }
   0x2   :  { %10 = vsyncpa [#allocation8 + $0x1], 0 }
   0x3   :  { %11 = vsyncpa [#allocation6], 0 }
   0x4   :  { %13 = vsyncpa [#allocation6 + $0x1], 0  ;;  %s2987_s9 = smov 0   ;;  %s2989_s10 = smov 0  }
   0x5   :  { %s2991_s11 = smov 0   ;;  %s2993_s12 = smov 0  }
   0x6 LB: > { %s3008_s13 = sadd.s32 4294967295, %s2957_s12   ;;  %s2582_s14 = sadd.s32 4294967294, %s2957_s12   ;;  %s2957_s12 = sphi %s2993_s12, %s3713_s12   ;;  %s2953_s11 = sphi %s2991_s11, %s3712_s11   ;;  %s2949_s10 = sphi %s2989_s10, %s3711_s10   ;;  %s2945_s9 = sphi %s2987_s9, %s3710_s9  }
   0x7   : > { %p60_p0 = scmp.ne.s32.totalorder %s2949_s10, %s2945_s9  ;;  %p3690_p1 = scmp.eq.s32.totalorder %s3008_s13, 0 }
   0x8   : > { %p90_p3 = scmp.eq.s32.totalorder %s2582_s14, 1  ;;  %p2583_p5 = scmp.ge.s32.totalorder %s2957_s12, 1 }
   0x9   : > { %p3017_p4 = por %p3690_p1, %p60_p0  ;;  %p97_p7 = scmp.lt.s32.totalorder %s2957_s12, 3 }
   0xa   : > { %p3022_p6 = por %p90_p3, %p60_p0  ;;  %s2959_s18 = smov [#allocation4]  }
   0xb   : > { %s3693_s15 = scalar_select %p3017_p4, 1, 0 }
   0xc   : > { %s3694_s16 = scalar_select %p3022_p6, 1, 0 }
   0xd   : > { %p3027_p8 = pnand %p2583_p5, %p97_p7  ;;  %s110_s19 = sshll.u32 %s2959_s18, 4  ;;  %s111_s19 = int_to_ptr.vmem [resolvable:$true] %s110_s19 }
   0xe   : > { %s3035_s20 = sadd.s32 1, %s2957_s12   ;;  %s47_s24 = sadd.s32 1, %s2953_s11 }
   0xf   : > { %s3695_s17 = scalar_select %p3027_p8, 1, 0 }
  0x10   : > { %p2768_p10 = pneg %p3027_p8  ;;  %s44_s22 = ssub.s32 %s2957_s12, %s3035_s20 }
  0x11   : > { %p3045_p12 = scmp.eq.s32.totalorder %s44_s22, 0  ;;  %s2829_s27 = scalar_lea.hbm %s3687_s0, 64 }
  0x12   : > { %p3039_p11 = pnand %p2768_p10, %p3690_p1  ;;  %p2830_p0 = scmp.ne.s32.totalorder %s3687_s0, %s2829_s27 }
  0x13   : > { %s3697_s23 = scalar_select %p3045_p12, 1, 0 }
  0x14   : > { %p2831_p3 = pneg %p3039_p11  ;;  %p2836_p10 = scmp.lt.u32.totalorder %s2829_s27, %s3687_s0 }
  0x16   : > { %p2832_p5 = pnand %p2831_p3, %p2830_p0 }
  0x18   : > { %p2833_p7 = pneg %p2832_p5 }
  0x1a   : > { %p2838_p9 = pnand %p2836_p10, %p2833_p7 }
  0x1c   : > { %2841 = shalt.err (!%p2838_p9)
}
  0x1d   : > { %s2842_s4 = scalar_lea.vmem %s111_s19, 64  ;;  %p2850_p6 = scmp.lt.s32.totalorder %s111_s19, %s111_s19 }
  0x1e   : > { %p2843_p1 = scmp.ne.s32.totalorder %s111_s19, %s2842_s4  ;;  %p2851_p4 = scmp.lt.s32.totalorder %s2842_s4, %s2842_s4 }
  0x20   : > { %p2845_p2 = pnand %p2843_p1, %p2831_p3  ;;  %p2852_p8 = por %p2851_p4, %p2850_p6 }
  0x22   : > { %p2846_p13 = pneg %p2845_p2 }
  0x24   : > { %p2853_p12 = pnand %p2852_p8, %p2846_p13 }
  0x26   : > { %2856 = shalt.err (!%p2853_p12)
}
  0x27   : > { %2771 = dma.hbm_to_vmem [thread:$0]  (!%p3039_p11), %s3687_s0, 64, %s111_s19, [#allocation5]  }
  0x28   : > { %p3698_p1 = scmp.ne.s32.totalorder %s3697_s23, 0  ;;  %p55_p2 = scmp.eq.s32.totalorder %s2957_s12, 0 }
  0x29   : > { %p3699_p4 = scmp.ne.s32.totalorder %s2953_s11, %s2949_s10  ;;  %p3700_p6 = scmp.eq.s32.totalorder %s3008_s13, 1 }
  0x2a   : > { %s3071_s7 = scalar_select %p3698_p1, %s2953_s11, %s47_s24  }
  0x2b   : > { %p3079_p8 = por %p3700_p6, %p3699_p4  ;;  %p2781_p9 = scmp.lt.s32.totalorder %s2957_s12, 2 }
  0x2c   : > { %s121_s14 = sand.u32 1, %s2953_s11   ;;  %p3702_p12 = pmov %p3699_p4 }
  0x2d   : > { %s2586_s18 = sshll.u32 %s121_s14, 2  ;;  %s2726_s21 = sshll.u32 %s2957_s12, 6 }
  0x2e   : > { %p56_p13 = por %p55_p2, %p3702_p12  ;;  %s3092_s19 = scalar_lea.hbm %s3688_s1, %s2726_s21 }
  0x2f   : > { %s125_s23 = scalar_lea.vmem [#allocation7], %s2586_s18  ;;  %s122_s27 = scalar_lea.sflag [#allocation8], %s121_s14 }
  0x30   : > { %s133_s24 = sshll.u32 %s125_s23, 4  ;;  %p3094_p11 = pnand %p2781_p9, %p56_p13  ;;  %s3098_s24 = int_to_ptr.vmem [resolvable:$true] %s133_s24 }
  0x31   : > { %s2857_s28 = scalar_lea.hbm %s3092_s19, 64  ;;  %s2862_s3 = scalar_lea.hbm %s3688_s1, 128 }
  0x32   : > { %p2858_p0 = scmp.ne.s32.totalorder %s3092_s19, %s2857_s28  ;;  %p2859_p3 = pneg %p3094_p11 }
  0x33   : > { %p2863_p10 = scmp.lt.u32.totalorder %s3092_s19, %s3688_s1  ;;  %p2864_p1 = scmp.lt.u32.totalorder %s2862_s3, %s2857_s28 }
  0x34   : > { %p2860_p5 = pnand %p2859_p3, %p2858_p0  ;;  %p2866_p4 = scmp.lt.u32.totalorder %s2857_s28, %s3092_s19 }
  0x35   : > { %p2865_p2 = por %p2864_p1, %p2863_p10 }
  0x36   : > { %p2861_p7 = pneg %p2860_p5 }
  0x37   : > { %p2867_p6 = por %p2866_p4, %p2865_p2 }
  0x39   : > { %p2868_p9 = pnand %p2867_p6, %p2861_p7 }
  0x3b   : > { %2871 = shalt.err (!%p2868_p9)
}
  0x3c   : > { %s2872_s6 = scalar_lea.vmem %s3098_s24, 64  ;;  %s2960_s14 = smov [#allocation7]  }
  0x3d   : > { %p2873_p12 = scmp.ne.s32.totalorder %s3098_s24, %s2872_s6  ;;  %s2877_s18 = sshll.u32 %s2960_s14, 4  ;;  %s2878_s18 = int_to_ptr.vmem [resolvable:$false] %s2877_s18 }
  0x3e   : > { %s2879_s21 = scalar_lea.vmem %s2878_s18, 128  ;;  %p2880_p5 = scmp.lt.s32.totalorder %s3098_s24, %s2878_s18 }
  0x3f   : > { %p2875_p13 = pnand %p2873_p12, %p2859_p3  ;;  %p2881_p10 = scmp.lt.s32.totalorder %s2879_s21, %s2872_s6 }
  0x41   : > { %p2876_p0 = pneg %p2875_p13  ;;  %p2882_p1 = por %p2881_p10, %p2880_p5 }
  0x43   : > { %p2883_p2 = pnand %p2882_p1, %p2876_p0 }
  0x45   : > { %2886 = shalt.err (!%p2883_p2)
}
  0x46   : > { %2775 = dma.hbm_to_vmem [thread:$0]  (!%p3094_p11), %s3092_s19, 64, %s3098_s24, %s122_s27  }
  0x47   : > { %p3704_p7 = scmp.ne.s32.totalorder %s3695_s17, 0 }
  0x48   : > { %p3705_p3 = scmp.eq.s32.totalorder (!%p3704_p7), %s3008_s13, 0 }
  0x49   : > { %142 = sbr.rel (%p3704_p7) target bundleno = 1778 (0x6f2), region = 28 }
  0x50   : > { %2932 = dma.done.wait (%p3705_p3), [#allocation5], 64   ;;  %p3706_p4 = pmov %p3705_p3 }
  0x51   : > { %s3132_s22 = sand.u32 1, %s2949_s10   ;;  %p3707_p11 = scmp.ne.s32.totalorder %s3693_s15, 0 }
  0x52   : > { %2934 = vsyncadd (%p3706_p4), [#allocation5], 4294967232  ;;  %s2591_s25 = sshll.u32 %s3132_s22, 2  ;;  %s149_s23 = scalar_lea.sflag [#allocation8], %s3132_s22 }
  0x53   : > { %s152_s19 = scalar_lea.vmem [#allocation7], %s2591_s25 }
  0x54   : > { %2936 = dma.done.wait (%p3707_p11), %s149_s23, 64  }
  0x55   : > { %2938 = vsyncadd (%p3707_p11), %s149_s23, 4294967232  ;;  %v176_v0 = vlaneseq  ;;  %v2961_v1 = vmov 1966171168   ;;  %v179_v6 = vld [vmem:[%s152_s19] sm:$0xf]  ;;  %vm183_vm0 = vcmask 122880  }
  0x56   : > { %v477_v2 = vunpack.c.l.s4 %v2961_v1  ;;  %v3147_v7 = vmul.f32 0.0625, %v179_v6  ;;  %v3154_v9 = vld [vmem:[#allocation4 + $0x1] ss:$2 sm:$0x3]  ;;  %s2962_s15 = smov 80   ;;  %s2963_s17 = smov 112  }
  0x57   : > { %v3142_v3 = vshrl.u32 %v176_v0, 7  ;;  %s2964_s24 = smov 64   ;;  %s2965_s26 = smov 96   ;;  %v2966_v30 = vmov 0.0   ;;  %vm606_vm9 = vcmask 130048  }
  0x58   : > { %v478_v4 = vunpack.c.0.s8 %v477_v2  ;;  %181 = vst [vmem:[#allocation2] sm:$0xf] %v3147_v7  ;;  %683 = vmatprep.mubr.f32.mxu0 %v2966_v30  ;;  %1259 = vmatprep.mubr.f32.mxu1 %v2966_v30  ;;  %s2967_s27 = smov 32   ;;  %s2968_s28 = smov 48  }
  0x59   : > { %v3162_v17 = vsub.s32 1, %v3142_v3  ;;  %v3165_v18 = vsub.s32 0, %v3142_v3  ;;  %v3169_v21 = vadd.s32 8, %v3142_v3  ;;  %s2969_s29 = smov 16   ;;  %s2727_s30 = sshll.u32 %s3008_s13, 6 }
  0x5a   : > { %v3145_v5 = vsub.s32 %v478_v4, %v3142_v3  ;;  %s172_s3 = scalar_lea.vmem [#allocation9], %s2591_s25  ;;  %s3643_s14 = scalar_lea.hbm %s3689_s2, %s2727_s30 }
  0x5b   : > { %s2500_s4 = sshll.u32 %s172_s3, 4  ;;  %s2486_s18 = scalar_lea.sflag [#allocation6], %s3132_s22  ;;  %s3645_s4 = int_to_ptr.vmem [resolvable:$true] %s2500_s4 }
  0x5c   : > { %v3152_v8 = vrot.slane %v3147_v7, %v3145_v5  ;;  %s2887_s13 = scalar_lea.vmem %s3645_s4, 64  ;;  %s2971_s21 = smov [#allocation9]  }
  0x5d   : > { %p2888_p6 = scmp.ne.s32.totalorder %s3645_s4, %s2887_s13  ;;  %s2891_s25 = sshll.u32 %s2971_s21, 4  ;;  %s2892_s25 = int_to_ptr.vmem [resolvable:$false] %s2891_s25 }
  0x5e   : > { %v485_v10 = vcombine.high %v3152_v8, %v3152_v8  ;;  %s2893_s23 = scalar_lea.vmem %s2892_s25, 128  ;;  %p2894_p13 = scmp.lt.s32.totalorder %s3645_s4, %s2892_s25 }
  0x5f   : > { %v2595_v13 = vld [vmem:[#allocation2] ss:$0 sm:$0xff]  ;;  %v2600_v32 = vld [vmem:[#allocation2 + $0x2] ss:$0 sm:$0xff]  ;;  %v2608_v44 = vld [vmem:[#allocation2 + $0x1] ss:$0 sm:$0xff]  ;;  %p2889_p9 = pnand %p2888_p6, %p3079_p8  ;;  %p2895_p0 = scmp.lt.s32.totalorder %s2893_s23, %s2887_s13 }
  0x60   : > { %v487_v11 = vadd.f32 %v485_v10, %v3154_v9  ;;  %211 = vrot.lane.b32.xlu1 %v2595_v13, %s2962_s15  ;;  %191 = vrot.lane.b32.xlu0 %v2595_v13, %s2963_s17  ;;  %v182_v14 = vld [vmem:[#allocation2] sm:$0x1]  ;;  %v255_v39 = vld [vmem:[#allocation2 + $0x2] sm:$0x1]  ;;  %v327_v45 = vld [vmem:[#allocation2 + $0x1] sm:$0x1] }
  0x61   : > { %184 = vst.msk [vmem:[#allocation3] sm:$0x1] %vm183_vm0, %v182_v14  ;;  %256 = vst.msk [vmem:[#allocation3 + $0x8] sm:$0x1] %vm183_vm0, %v255_v39  ;;  %v2614_v46 = vld [vmem:[#allocation2 + $0x3] ss:$0 sm:$0xff]  ;;  %p2890_p12 = pneg %p2889_p9  ;;  %p2896_p5 = por %p2895_p0, %p2894_p13 }
  0x62   : > { %v489_v12 = vfloor.f32 %v487_v11  ;;  %328 = vst.msk [vmem:[#allocation3 + $0x10] sm:$0x1] %vm183_vm0, %v327_v45  ;;  %v399_v47 = vld [vmem:[#allocation2 + $0x3] sm:$0x1] }
  0x63   : > { %400 = vst.msk [vmem:[#allocation3 + $0x18] sm:$0x1] %vm183_vm0, %v399_v47  ;;  %p2897_p10 = pnand %p2896_p5, %p2890_p12 }
  0x64   : > { %v492_v15 = vsub.f32 %v487_v11, %v489_v12  ;;  %v2746_v16 = vtrunc.f32 %v489_v12  ;;  %221 = vrot.lane.b32.xlu1 %v2595_v13, %s2964_s24  ;;  %201 = vrot.lane.b32.xlu0 %v2595_v13, %s2965_s26 }
  0x66   : > { %v493_v19 = vsub.f32 1.0, %v492_v15  ;;  %v2747_v20 = vcvt.f32.s32 %v2746_v16  ;;  %v584_v25 = vrot.slane %v492_v15, %v3162_v17  ;;  %v580_v28 = vrot.slane %v492_v15, %v3165_v18 }
  0x68   : > { %v558_v22 = vrot.slane %v2747_v20, %v3162_v17  ;;  %v563_v23 = vadd.s32 1, %v2747_v20  ;;  %v554_v24 = vrot.slane %v2747_v20, %v3165_v18  ;;  %v599_v27 = vrot.slane %v493_v19, %v3162_v17  ;;  %241 = vrot.lane.b32.xlu1 %v2595_v13, %s2967_s27  ;;  %231 = vrot.lane.b32.xlu0 %v2595_v13, %s2968_s28 }
  0x69   : > { %v595_v29 = vrot.slane %v493_v19, %v3165_v18 }
  0x6a   : > { %v571_v26 = vrot.slane %v563_v23, %v3162_v17  ;;  %vm560_vm1 = vcmp.eq.s32.totalorder %v3142_v3, %v558_v22  ;;  %vm562_vm2 = vcmp.eq.s32.totalorder %v3169_v21, %v558_v22  ;;  %vm559_vm3 = vcmp.eq.s32.totalorder %v3142_v3, %v554_v24 }
  0x6b   : > { %v567_v31 = vrot.slane %v563_v23, %v3165_v18  ;;  %vm561_vm6 = vcmp.eq.s32.totalorder %v3169_v21, %v554_v24  ;;  %v3260_v24 = vld [vmem:[#allocation4] ss:$2 sm:$0x3] }
  0x6c   : > { %vm573_vm4 = vcmp.eq.s32.totalorder %v3142_v3, %v571_v26  ;;  %vm575_vm5 = vcmp.eq.s32.totalorder %v3169_v21, %v571_v26  ;;  %263 = vrot.lane.b32.xlu1 %v2600_v32, %s2963_s17  ;;  %251 = vrot.lane.b32.xlu0 %v2595_v13, %s2969_s29 }
  0x6d   : > { %v588_v33 = vsel %vm573_vm4, %v584_v25, 0.0  ;;  %v590_v34 = vsel %vm575_vm5, %v584_v25, 0.0  ;;  %vm572_vm7 = vcmp.eq.s32.totalorder %v3142_v3, %v567_v31  ;;  %vm574_vm8 = vcmp.eq.s32.totalorder %v3169_v21, %v567_v31 }
  0x6e   : > { %v603_v35 = vsel %vm560_vm1, %v599_v27, %v588_v33  ;;  %v605_v36 = vsel %vm562_vm2, %v599_v27, %v590_v34  ;;  %v587_v37 = vsel %vm572_vm7, %v580_v28, 0.0  ;;  %v589_v38 = vsel %vm574_vm8, %v580_v28, 0.0 }
  0x6f   : > { %v2728_v40 = vpack.c.bf16 %v605_v36, %v603_v35  ;;  %v602_v41 = vsel %vm559_vm3, %v595_v29, %v587_v37  ;;  %v604_v42 = vsel %vm561_vm6, %v595_v29, %v589_v38  ;;  %v484_v25 = vadd.f32 %v3152_v8, %v3260_v24 }
  0x70   : > { %v2730_v43 = vpack.c.bf16 %v604_v42, %v602_v41  ;;  %283 = vrot.lane.b32.xlu1 %v2600_v32, %s2962_s15  ;;  %273 = vrot.lane.b32.xlu0 %v2600_v32, %s2965_s26  ;;  %vm744_vm3 = vcmask 1040384  }
  0x71   : > { %2729 = vmatprep.subr.bf16.mxu0 %v2728_v40  ;;  %v488_v26 = vfloor.f32 %v484_v25 }
  0x72   : > { %2731 = vmatpush1.bf16.msra.mxu0 %v2730_v43 }
  0x73   : > { %v2744_v27 = vtrunc.f32 %v488_v26  ;;  %v490_v31 = vsub.f32 %v484_v25, %v488_v26  ;;  %v2970_v26 = vmov 1983009808  }
  0x74   : > { %303 = vrot.lane.b32.xlu1 %v2600_v32, %s2968_s28  ;;  %293 = vrot.lane.b32.xlu0 %v2600_v32, %s2964_s24 }
  0x75   : > { %v2745_v28 = vcvt.f32.s32 %v2744_v27  ;;  %v491_v34 = vsub.f32 1.0, %v490_v31  ;;  %v525_v36 = vrot.slane %v490_v31, %v3165_v18  ;;  %v529_v8 = vrot.slane %v490_v31, %v3162_v17 }
  0x76   : > { %v751_v27 = vunpack.c.l.s4 %v2970_v26 }
  0x77   : > { %v508_v29 = vadd.s32 1, %v2745_v28  ;;  %v499_v35 = vrot.slane %v2745_v28, %v3165_v18  ;;  %v503_v37 = vrot.slane %v2745_v28, %v3162_v17  ;;  %v540_v38 = vrot.slane %v491_v34, %v3165_v18 }
  0x78   : > { %323 = vrot.lane.b32.xlu1 %v2600_v32, %s2969_s29  ;;  %313 = vrot.lane.b32.xlu0 %v2600_v32, %s2967_s27  ;;  %v544_v40 = vrot.slane %v491_v34, %v3162_v17 }
  0x79   : > { %v512_v32 = vrot.slane %v508_v29, %v3165_v18  ;;  %v516_v33 = vrot.slane %v508_v29, %v3162_v17  ;;  %vm504_vm12 = vcmp.eq.s32.totalorder %v3142_v3, %v499_v35  ;;  %vm505_vm13 = vcmp.eq.s32.totalorder %v3142_v3, %v503_v37 }
  0x7a   : > { %vm506_vm1 = vcmp.eq.s32.totalorder %v3169_v21, %v499_v35  ;;  %vm507_vm2 = vcmp.eq.s32.totalorder %v3169_v21, %v503_v37  ;;  %v752_v35 = vunpack.c.0.s8 %v751_v27 }
  0x7b   : > { %vm517_vm10 = vcmp.eq.s32.totalorder %v3142_v3, %v512_v32  ;;  %vm518_vm11 = vcmp.eq.s32.totalorder %v3142_v3, %v516_v33  ;;  %vm519_vm14 = vcmp.eq.s32.totalorder %v3169_v21, %v512_v32  ;;  %vm520_vm15 = vcmp.eq.s32.totalorder %v3169_v21, %v516_v33 }
  0x7c   : > { %345 = vrot.lane.b32.xlu1 %v2608_v44, %s2965_s26  ;;  %335 = vrot.lane.b32.xlu0 %v2608_v44, %s2963_s17  ;;  %v532_v39 = vsel %vm517_vm10, %v525_v36, 0.0  ;;  %v533_v41 = vsel %vm518_vm11, %v529_v8, 0.0 }
  0x7d   : > { %v547_v42 = vsel %vm504_vm12, %v540_v38, %v532_v39  ;;  %v548_v43 = vsel %vm505_vm13, %v544_v40, %v533_v41  ;;  %v3282_v41 = vsub.s32 %v752_v35, %v3142_v3 }
  0x80   : > { %365 = vrot.lane.b32.xlu1 %v2608_v44, %s2964_s24  ;;  %355 = vrot.lane.b32.xlu0 %v2608_v44, %s2962_s15 }
  0x84   : > { %385 = vrot.lane.b32.xlu1 %v2608_v44, %s2967_s27  ;;  %375 = vrot.lane.b32.xlu0 %v2608_v44, %s2968_s28 }
  0x88   : > { %407 = vrot.lane.b32.xlu1 %v2614_v46, %s2963_s17  ;;  %395 = vrot.lane.b32.xlu0 %v2608_v44, %s2969_s29 }
  0x8c   : > { %427 = vrot.lane.b32.xlu1 %v2614_v46, %s2962_s15  ;;  %417 = vrot.lane.b32.xlu0 %v2614_v46, %s2965_s26 }
  0x90   : > { %447 = vrot.lane.b32.xlu1 %v2614_v46, %s2968_s28  ;;  %437 = vrot.lane.b32.xlu0 %v2614_v46, %s2964_s24 }
  0x94   : > { %467 = vrot.lane.b32.xlu1 %v2614_v46, %s2969_s29  ;;  %457 = vrot.lane.b32.xlu0 %v2614_v46, %s2967_s27 }
  0xd2   : > { %v212_v48 = vpop.permute.xlu1 %211  ;;  %v192_v49 = vpop.permute.xlu0 %191 }
  0xd3   : > { %214 = vst.msk [vmem:[#allocation3 + $0x3] sm:$0x1] %vm183_vm0, %v212_v48  ;;  %194 = vst.msk [vmem:[#allocation3 + $0x1] sm:$0x1] %vm183_vm0, %v192_v49  ;;  %v534_v48 = vsel %vm519_vm14, %v525_v36, 0.0  ;;  %v535_v49 = vsel %vm520_vm15, %v529_v8, 0.0 }
  0xd6   : > { %v222_v50 = vpop.permute.xlu1 %221  ;;  %v202_v51 = vpop.permute.xlu0 %201 }
  0xd7   : > { %224 = vst.msk [vmem:[#allocation3 + $0x4] sm:$0x1] %vm183_vm0, %v222_v50  ;;  %204 = vst.msk [vmem:[#allocation3 + $0x2] sm:$0x1] %vm183_vm0, %v202_v51  ;;  %v549_v50 = vsel %vm506_vm1, %v540_v38, %v534_v48  ;;  %v550_v51 = vsel %vm507_vm2, %v544_v40, %v535_v49 }
  0xda   : > { %v242_v52 = vpop.permute.xlu1 %241  ;;  %v232_v53 = vpop.permute.xlu0 %231 }
  0xdb   : > { %244 = vst.msk [vmem:[#allocation3 + $0x6] sm:$0x1] %vm183_vm0, %v242_v52  ;;  %234 = vst.msk [vmem:[#allocation3 + $0x5] sm:$0x1] %vm183_vm0, %v232_v53 }
  0xde   : > { %v264_v54 = vpop.permute.xlu1 %263  ;;  %v252_v55 = vpop.permute.xlu0 %251 }
  0xdf   : > { %266 = vst.msk [vmem:[#allocation3 + $0x9] sm:$0x1] %vm183_vm0, %v264_v54  ;;  %254 = vst.msk [vmem:[#allocation3 + $0x7] sm:$0x1] %vm183_vm0, %v252_v55 }
  0xe2   : > { %v284_v56 = vpop.permute.xlu1 %283  ;;  %v274_v57 = vpop.permute.xlu0 %273 }
  0xe3   : > { %286 = vst.msk [vmem:[#allocation3 + $0xb] sm:$0x1] %vm183_vm0, %v284_v56  ;;  %276 = vst.msk [vmem:[#allocation3 + $0xa] sm:$0x1] %vm183_vm0, %v274_v57 }
  0xe6   : > { %v471_v58 = vld [vmem:[#allocation3] sm:$0xff]  ;;  %v304_v59 = vpop.permute.xlu1 %303  ;;  %v294_v60 = vpop.permute.xlu0 %293 }
  0xe7   : > { %306 = vst.msk [vmem:[#allocation3 + $0xd] sm:$0x1] %vm183_vm0, %v304_v59  ;;  %296 = vst.msk [vmem:[#allocation3 + $0xc] sm:$0x1] %vm183_vm0, %v294_v60  ;;  %2621 = vmatmul.mubr.msk.f32.vlgmr.msra.gmra.mrb[0].mxu0 %vm606_vm9, %v471_v58 }
  0xe8   : > { %689 = vmatprep.mubr.f32.mxu0 %v2966_v30 }
  0xea   : > { %v324_v61 = vpop.permute.xlu1 %323  ;;  %v314_v62 = vpop.permute.xlu0 %313 }
  0xeb   : > { %326 = vst.msk [vmem:[#allocation3 + $0xf] sm:$0x1] %vm183_vm0, %v324_v61  ;;  %316 = vst.msk [vmem:[#allocation3 + $0xe] sm:$0x1] %vm183_vm0, %v314_v62 }
  0xee   : > { %v346_v63 = vpop.permute.xlu1 %345  ;;  %v336_v0 = vpop.permute.xlu0 %335 }
  0xef   : > { %348 = vst.msk [vmem:[#allocation3 + $0x12] sm:$0x1] %vm183_vm0, %v346_v63  ;;  %338 = vst.msk [vmem:[#allocation3 + $0x11] sm:$0x1] %vm183_vm0, %v336_v0 }
  0xf2   : > { %v472_v1 = vld [vmem:[#allocation3 + $0x8] sm:$0xff]  ;;  %v366_v2 = vpop.permute.xlu1 %365  ;;  %v356_v4 = vpop.permute.xlu0 %355 }
  0xf3   : > { %368 = vst.msk [vmem:[#allocation3 + $0x14] sm:$0x1] %vm183_vm0, %v366_v2  ;;  %358 = vst.msk [vmem:[#allocation3 + $0x13] sm:$0x1] %vm183_vm0, %v356_v4  ;;  %2622 = vmatmul.mubr.msk.f32.gmra.mrb[2].mxu0 %vm606_vm9, %v472_v1 }
  0xf4   : > { %695 = vmatprep.mubr.f32.mxu0 %v2966_v30 }
  0xf6   : > { %v386_v6 = vpop.permute.xlu1 %385  ;;  %v376_v10 = vpop.permute.xlu0 %375 }
  0xf7   : > { %388 = vst.msk [vmem:[#allocation3 + $0x16] sm:$0x1] %vm183_vm0, %v386_v6  ;;  %378 = vst.msk [vmem:[#allocation3 + $0x15] sm:$0x1] %vm183_vm0, %v376_v10 }
  0xfa   : > { %v408_v11 = vpop.permute.xlu1 %407  ;;  %v396_v12 = vpop.permute.xlu0 %395 }
  0xfb   : > { %410 = vst.msk [vmem:[#allocation3 + $0x19] sm:$0x1] %vm183_vm0, %v408_v11  ;;  %398 = vst.msk [vmem:[#allocation3 + $0x17] sm:$0x1] %vm183_vm0, %v396_v12 }
  0xfe   : > { %v428_v13 = vpop.permute.xlu1 %427  ;;  %v418_v14 = vpop.permute.xlu0 %417 }
  0xff   : > { %430 = vst.msk [vmem:[#allocation3 + $0x1b] sm:$0x1] %vm183_vm0, %v428_v13  ;;  %420 = vst.msk [vmem:[#allocation3 + $0x1a] sm:$0x1] %vm183_vm0, %v418_v14 }
 0x102   : > { %v473_v15 = vld [vmem:[#allocation3 + $0x10] sm:$0xff]  ;;  %v448_v16 = vpop.permute.xlu1 %447  ;;  %v438_v19 = vpop.permute.xlu0 %437 }
 0x103   : > { %450 = vst.msk [vmem:[#allocation3 + $0x1d] sm:$0x1] %vm183_vm0, %v448_v16  ;;  %440 = vst.msk [vmem:[#allocation3 + $0x1c] sm:$0x1] %vm183_vm0, %v438_v19  ;;  %2623 = vmatmul.mubr.msk.f32.gmra.mrb[4].mxu0 %vm606_vm9, %v473_v15 }
 0x104   : > { %701 = vmatprep.mubr.f32.mxu0 %v2966_v30 }
 0x106   : > { %v468_v20 = vpop.permute.xlu1 %467  ;;  %v458_v22 = vpop.permute.xlu0 %457 }
 0x107   : > { %470 = vst.msk [vmem:[#allocation3 + $0x1f] sm:$0x1] %vm183_vm0, %v468_v20  ;;  %460 = vst.msk [vmem:[#allocation3 + $0x1e] sm:$0x1] %vm183_vm0, %v458_v22 }
 0x10e   : > { %v474_v23 = vld [vmem:[#allocation3 + $0x18] sm:$0xff] }
 0x10f   : > { %2624 = vmatmul.mubr.msk.f32.gmra.mrb[6].mxu0 %vm606_vm9, %v474_v23 }
 0x110   : > { %1834 = vmatprep.mubr.f32.mxu0 %v2966_v30 }
 0x1ba   : > { %v685_v44 = vpop.f32.mrb[0].mxu0 }
 0x1bb   : > { %v708_v45 = vmul.f32 %v685_v44, %v547_v42  ;;  %v687_v46 = vpop.f32.mrb[1].mxu0 }
 0x1bc   : > { %v709_v47 = vmul.f32 %v687_v46, %v548_v43 }
 0x1c6   : > { %v691_v52 = vpop.f32.mrb[2].mxu0 }
 0x1c7   : > { %v710_v53 = vmul.f32 %v691_v52, %v549_v50  ;;  %v693_v54 = vpop.f32.mrb[3].mxu0 }
 0x1c8   : > { %v711_v55 = vmul.f32 %v693_v54, %v550_v51 }
 0x1c9   : > { %v712_v56 = vadd.f32 %v710_v53, %v708_v45 }
 0x1ca   : > { %v719_v57 = vadd.f32 %v711_v55, %v709_v47 }
 0x1cb   : > { %v713_v62 = vrot.slane %v712_v56, 4 }
 0x1cc   : > { %v720_v63 = vrot.slane %v719_v57, 4 }
 0x1cd   : > { %v714_v0 = vadd.f32 %v713_v62, %v712_v56 }
 0x1ce   : > { %v721_v1 = vadd.f32 %v720_v63, %v719_v57 }
 0x1cf   : > { %v715_v11 = vrot.slane %v714_v0, 2 }
 0x1d0   : > { %v722_v13 = vrot.slane %v721_v1, 2 }
 0x1d1   : > { %v716_v19 = vadd.f32 %v715_v11, %v714_v0 }
 0x1d2   : > { %v723_v22 = vadd.f32 %v722_v13, %v721_v1 }
 0x1d3   : > { %v717_v29 = vrot.slane %v716_v19, 1 }
 0x1d4   : > { %v724_v32 = vrot.slane %v723_v22, 1 }
 0x1d5   : > { %v718_v37 = vadd.f32 %v717_v29, %v716_v19 }
 0x1d6   : > { %v697_v58 = vpop.f32.mrb[4].mxu0  ;;  %v725_v38 = vadd.f32 %v724_v32, %v723_v22 }
 0x1d7   : > { %v726_v59 = vmul.f32 %v697_v58, %v547_v42  ;;  %v699_v60 = vpop.f32.mrb[5].mxu0 }
 0x1d8   : > { %v727_v61 = vmul.f32 %v699_v60, %v548_v43 }
 0x1e2   : > { %v703_v2 = vpop.f32.mrb[6].mxu0 }
 0x1e3   : > { %v728_v4 = vmul.f32 %v703_v2, %v549_v50  ;;  %v705_v6 = vpop.f32.mrb[7].mxu0 }
 0x1e4   : > { %v729_v10 = vmul.f32 %v705_v6, %v550_v51 }
 0x1e5   : > { %v730_v12 = vadd.f32 %v728_v4, %v726_v59 }
 0x1e6   : > { %v737_v14 = vadd.f32 %v729_v10, %v727_v61 }
 0x1e7   : > { %v731_v15 = vrot.slane %v730_v12, 4 }
 0x1e8   : > { %v738_v16 = vrot.slane %v737_v14, 4 }
 0x1e9   : > { %v732_v20 = vadd.f32 %v731_v15, %v730_v12 }
 0x1ea   : > { %v739_v23 = vadd.f32 %v738_v16, %v737_v14 }
 0x1eb   : > { %v733_v25 = vrot.slane %v732_v20, 2 }
 0x1ec   : > { %v740_v28 = vrot.slane %v739_v23, 2 }
 0x1ed   : > { %v734_v31 = vadd.f32 %v733_v25, %v732_v20 }
 0x1ee   : > { %v741_v33 = vadd.f32 %v740_v28, %v739_v23 }
 0x1ef   : > { %v735_v34 = vrot.slane %v734_v31, 1 }
 0x1f0   : > { %v742_v36 = vrot.slane %v741_v33, 1 }
 0x1f1   : > { %v736_v8 = vadd.f32 %v735_v34, %v734_v31 }
 0x1f2   : > { %v743_v39 = vadd.f32 %v742_v36, %v741_v33 }
 0x1f3   : > { %v745_v40 = vsel %vm744_vm3, %v718_v37, %v736_v8 }
 0x1f4   : > { %v746_v42 = vsel %vm744_vm3, %v725_v38, %v743_v39 }
 0x1f5   : > { %v749_v43 = vcombine.low %v745_v40, %v746_v42 }
 0x1f7   : > { %v756_v44 = vrot.slane %v749_v43, %v3282_v41 }
 0x1f9   : > { %v3287_v45 = vadd.f32 %v756_v44, %v3147_v7 }
 0x1fb   : > { %759 = vst [vmem:[#allocation2] sm:$0xf] %v3287_v45  ;;  %v3292_v46 = vrot.slane %v3287_v45, %v3145_v5 }
 0x1fd   : > { %v1062_v47 = vcombine.high %v3292_v46, %v3292_v46 }
 0x1ff   : > { %v1064_v48 = vadd.f32 %v1062_v47, %v3154_v9 }
 0x201   : > { %v1066_v49 = vfloor.f32 %v1064_v48 }
 0x202   : > { %v2626_v50 = vld [vmem:[#allocation2] ss:$0 sm:$0xff]  ;;  %v832_v53 = vld [vmem:[#allocation2 + $0x2] sm:$0x1]  ;;  %v904_v54 = vld [vmem:[#allocation2 + $0x1] sm:$0x1] }
 0x203   : > { %778 = vrot.lane.b32.xlu1 %v2626_v50, %s2965_s26  ;;  %768 = vrot.lane.b32.xlu0 %v2626_v50, %s2963_s17  ;;  %v1069_v51 = vsub.f32 %v1064_v48, %v1066_v49  ;;  %v2750_v7 = vtrunc.f32 %v1066_v49  ;;  %v760_v52 = vld [vmem:[#allocation2] sm:$0x1]  ;;  %833 = vst.msk [vmem:[#allocation3 + $0x8] sm:$0x1] %vm183_vm0, %v832_v53  ;;  %v976_v55 = vld [vmem:[#allocation2 + $0x3] sm:$0x1] }
 0x204   : > { %761 = vst.msk [vmem:[#allocation3] sm:$0x1] %vm183_vm0, %v760_v52  ;;  %905 = vst.msk [vmem:[#allocation3 + $0x10] sm:$0x1] %vm183_vm0, %v904_v54  ;;  %v2632_v14 = vld [vmem:[#allocation2 + $0x2] ss:$0 sm:$0xff] }
 0x205   : > { %v1070_v56 = vsub.f32 1.0, %v1069_v51  ;;  %v2751_v57 = vcvt.f32.s32 %v2750_v7  ;;  %977 = vst.msk [vmem:[#allocation3 + $0x18] sm:$0x1] %vm183_vm0, %v976_v55  ;;  %v1161_v61 = vrot.slane %v1069_v51, %v3162_v17  ;;  %v1157_v0 = vrot.slane %v1069_v51, %v3165_v18  ;;  %v2640_v22 = vld [vmem:[#allocation2 + $0x1] ss:$0 sm:$0xff] }
 0x206   : > { %v2646_v23 = vld [vmem:[#allocation2 + $0x3] ss:$0 sm:$0xff] }
 0x207   : > { %798 = vrot.lane.b32.xlu1 %v2626_v50, %s2964_s24  ;;  %788 = vrot.lane.b32.xlu0 %v2626_v50, %s2962_s15  ;;  %v1135_v58 = vrot.slane %v2751_v57, %v3162_v17  ;;  %v1140_v59 = vadd.s32 1, %v2751_v57  ;;  %v1131_v60 = vrot.slane %v2751_v57, %v3165_v18  ;;  %v1176_v63 = vrot.slane %v1070_v56, %v3162_v17 }
 0x208   : > { %v1172_v1 = vrot.slane %v1070_v56, %v3165_v18 }
 0x209   : > { %v1148_v62 = vrot.slane %v1140_v59, %v3162_v17  ;;  %vm1137_vm4 = vcmp.eq.s32.totalorder %v3142_v3, %v1135_v58  ;;  %vm1139_vm5 = vcmp.eq.s32.totalorder %v3169_v21, %v1135_v58  ;;  %vm1136_vm6 = vcmp.eq.s32.totalorder %v3142_v3, %v1131_v60 }
 0x20a   : > { %v1144_v2 = vrot.slane %v1140_v59, %v3165_v18  ;;  %vm1138_vm10 = vcmp.eq.s32.totalorder %v3169_v21, %v1131_v60  ;;  %v1061_v59 = vadd.f32 %v3292_v46, %v3260_v24 }
 0x20b   : > { %818 = vrot.lane.b32.xlu1 %v2626_v50, %s2967_s27  ;;  %808 = vrot.lane.b32.xlu0 %v2626_v50, %s2968_s28  ;;  %vm1150_vm7 = vcmp.eq.s32.totalorder %v3142_v3, %v1148_v62  ;;  %vm1152_vm8 = vcmp.eq.s32.totalorder %v3169_v21, %v1148_v62 }
 0x20c   : > { %v1165_v4 = vsel %vm1150_vm7, %v1161_v61, 0.0  ;;  %v1167_v6 = vsel %vm1152_vm8, %v1161_v61, 0.0  ;;  %vm1149_vm11 = vcmp.eq.s32.totalorder %v3142_v3, %v1144_v2  ;;  %vm1151_vm12 = vcmp.eq.s32.totalorder %v3169_v21, %v1144_v2 }
 0x20d   : > { %v1180_v10 = vsel %vm1137_vm4, %v1176_v63, %v1165_v4  ;;  %v1182_v11 = vsel %vm1139_vm5, %v1176_v63, %v1167_v6  ;;  %v1164_v12 = vsel %vm1149_vm11, %v1157_v0, 0.0  ;;  %v1166_v13 = vsel %vm1151_vm12, %v1157_v0, 0.0 }
 0x20e   : > { %v2732_v15 = vpack.c.bf16 %v1182_v11, %v1180_v10  ;;  %v1179_v16 = vsel %vm1136_vm6, %v1172_v1, %v1164_v12  ;;  %v1181_v19 = vsel %vm1138_vm10, %v1172_v1, %v1166_v13  ;;  %v1065_v60 = vfloor.f32 %v1061_v59 }
 0x20f   : > { %840 = vrot.lane.b32.xlu1 %v2632_v14, %s2963_s17  ;;  %828 = vrot.lane.b32.xlu0 %v2626_v50, %s2969_s29  ;;  %v2734_v20 = vpack.c.bf16 %v1181_v19, %v1179_v16 }
 0x210   : > { %2733 = vmatprep.subr.bf16.mxu1 %v2732_v15  ;;  %v2748_v61 = vtrunc.f32 %v1065_v60  ;;  %v1067_v0 = vsub.f32 %v1061_v59, %v1065_v60 }
 0x211   : > { %2735 = vmatpush1.bf16.msra.mxu1 %v2734_v20 }
 0x212   : > { %v2749_v62 = vcvt.f32.s32 %v2748_v61  ;;  %v1068_v4 = vsub.f32 1.0, %v1067_v0  ;;  %v1102_v10 = vrot.slane %v1067_v0, %v3165_v18  ;;  %v1106_v11 = vrot.slane %v1067_v0, %v3162_v17 }
 0x213   : > { %860 = vrot.lane.b32.xlu1 %v2632_v14, %s2962_s15  ;;  %850 = vrot.lane.b32.xlu0 %v2632_v14, %s2965_s26 }
 0x214   : > { %v1085_v63 = vadd.s32 1, %v2749_v62  ;;  %v1076_v6 = vrot.slane %v2749_v62, %v3165_v18  ;;  %v1080_v46 = vrot.slane %v2749_v62, %v3162_v17  ;;  %v1117_v13 = vrot.slane %v1068_v4, %v3165_v18 }
 0x215   : > { %v1121_v15 = vrot.slane %v1068_v4, %v3162_v17 }
 0x216   : > { %v1089_v1 = vrot.slane %v1085_v63, %v3165_v18  ;;  %v1093_v2 = vrot.slane %v1085_v63, %v3162_v17  ;;  %vm1081_vm15 = vcmp.eq.s32.totalorder %v3142_v3, %v1076_v6  ;;  %vm1082_vm1 = vcmp.eq.s32.totalorder %v3142_v3, %v1080_v46 }
 0x217   : > { %880 = vrot.lane.b32.xlu1 %v2632_v14, %s2968_s28  ;;  %870 = vrot.lane.b32.xlu0 %v2632_v14, %s2964_s24  ;;  %vm1083_vm5 = vcmp.eq.s32.totalorder %v3169_v21, %v1076_v6  ;;  %vm1084_vm6 = vcmp.eq.s32.totalorder %v3169_v21, %v1080_v46 }
 0x218   : > { %vm1094_vm13 = vcmp.eq.s32.totalorder %v3142_v3, %v1089_v1  ;;  %vm1095_vm14 = vcmp.eq.s32.totalorder %v3142_v3, %v1093_v2  ;;  %vm1096_vm2 = vcmp.eq.s32.totalorder %v3169_v21, %v1089_v1  ;;  %vm1097_vm4 = vcmp.eq.s32.totalorder %v3169_v21, %v1093_v2 }
 0x219   : > { %v1109_v12 = vsel %vm1094_vm13, %v1102_v10, 0.0 }
 0x21a   : > { %v1124_v16 = vsel %vm1081_vm15, %v1117_v13, %v1109_v12 }
 0x21b   : > { %900 = vrot.lane.b32.xlu1 %v2632_v14, %s2969_s29  ;;  %890 = vrot.lane.b32.xlu0 %v2632_v14, %s2967_s27  ;;  %v1110_v14 = vsel %vm1095_vm14, %v1106_v11, 0.0 }
 0x21f   : > { %922 = vrot.lane.b32.xlu1 %v2640_v22, %s2965_s26  ;;  %912 = vrot.lane.b32.xlu0 %v2640_v22, %s2963_s17 }
 0x223   : > { %942 = vrot.lane.b32.xlu1 %v2640_v22, %s2964_s24  ;;  %932 = vrot.lane.b32.xlu0 %v2640_v22, %s2962_s15 }
 0x227   : > { %962 = vrot.lane.b32.xlu1 %v2640_v22, %s2967_s27  ;;  %952 = vrot.lane.b32.xlu0 %v2640_v22, %s2968_s28 }
 0x22b   : > { %984 = vrot.lane.b32.xlu1 %v2646_v23, %s2963_s17  ;;  %972 = vrot.lane.b32.xlu0 %v2640_v22, %s2969_s29  ;;  %v1125_v22 = vsel %vm1082_vm1, %v1121_v15, %v1110_v14 }
 0x22f   : > { %1004 = vrot.lane.b32.xlu1 %v2646_v23, %s2962_s15  ;;  %994 = vrot.lane.b32.xlu0 %v2646_v23, %s2965_s26 }
 0x233   : > { %1024 = vrot.lane.b32.xlu1 %v2646_v23, %s2968_s28  ;;  %1014 = vrot.lane.b32.xlu0 %v2646_v23, %s2964_s24 }
 0x237   : > { %1044 = vrot.lane.b32.xlu1 %v2646_v23, %s2969_s29  ;;  %1034 = vrot.lane.b32.xlu0 %v2646_v23, %s2967_s27 }
 0x275   : > { %v779_v25 = vpop.permute.xlu1 %778  ;;  %v769_v26 = vpop.permute.xlu0 %768 }
 0x276   : > { %781 = vst.msk [vmem:[#allocation3 + $0x2] sm:$0x1] %vm183_vm0, %v779_v25  ;;  %771 = vst.msk [vmem:[#allocation3 + $0x1] sm:$0x1] %vm183_vm0, %v769_v26  ;;  %v1111_v26 = vsel %vm1096_vm2, %v1102_v10, 0.0 }
 0x279   : > { %v799_v27 = vpop.permute.xlu1 %798  ;;  %v789_v28 = vpop.permute.xlu0 %788 }
 0x27a   : > { %801 = vst.msk [vmem:[#allocation3 + $0x4] sm:$0x1] %vm183_vm0, %v799_v27  ;;  %791 = vst.msk [vmem:[#allocation3 + $0x3] sm:$0x1] %vm183_vm0, %v789_v28  ;;  %v1112_v27 = vsel %vm1097_vm4, %v1106_v11, 0.0  ;;  %v1126_v28 = vsel %vm1083_vm5, %v1117_v13, %v1111_v26 }
 0x27d   : > { %v819_v29 = vpop.permute.xlu1 %818  ;;  %v809_v31 = vpop.permute.xlu0 %808 }
 0x27e   : > { %821 = vst.msk [vmem:[#allocation3 + $0x6] sm:$0x1] %vm183_vm0, %v819_v29  ;;  %811 = vst.msk [vmem:[#allocation3 + $0x5] sm:$0x1] %vm183_vm0, %v809_v31 }
 0x281   : > { %v841_v32 = vpop.permute.xlu1 %840  ;;  %v829_v33 = vpop.permute.xlu0 %828 }
 0x282   : > { %843 = vst.msk [vmem:[#allocation3 + $0x9] sm:$0x1] %vm183_vm0, %v841_v32  ;;  %831 = vst.msk [vmem:[#allocation3 + $0x7] sm:$0x1] %vm183_vm0, %v829_v33  ;;  %v1127_v32 = vsel %vm1084_vm6, %v1121_v15, %v1112_v27 }
 0x285   : > { %v861_v34 = vpop.permute.xlu1 %860  ;;  %v851_v35 = vpop.permute.xlu0 %850 }
 0x286   : > { %863 = vst.msk [vmem:[#allocation3 + $0xb] sm:$0x1] %vm183_vm0, %v861_v34  ;;  %853 = vst.msk [vmem:[#allocation3 + $0xa] sm:$0x1] %vm183_vm0, %v851_v35 }
 0x289   : > { %v1048_v36 = vld [vmem:[#allocation3] sm:$0xff]  ;;  %v881_v37 = vpop.permute.xlu1 %880  ;;  %v871_v8 = vpop.permute.xlu0 %870 }
 0x28a   : > { %883 = vst.msk [vmem:[#allocation3 + $0xd] sm:$0x1] %vm183_vm0, %v881_v37  ;;  %873 = vst.msk [vmem:[#allocation3 + $0xc] sm:$0x1] %vm183_vm0, %v871_v8  ;;  %2653 = vmatmul.mubr.msk.f32.vlgmr.msra.gmra.mrb[0].mxu1 %vm606_vm9, %v1048_v36 }
 0x28b   : > { %1265 = vmatprep.mubr.f32.mxu1 %v2966_v30 }
 0x28d   : > { %v901_v38 = vpop.permute.xlu1 %900  ;;  %v891_v39 = vpop.permute.xlu0 %890 }
 0x28e   : > { %903 = vst.msk [vmem:[#allocation3 + $0xf] sm:$0x1] %vm183_vm0, %v901_v38  ;;  %893 = vst.msk [vmem:[#allocation3 + $0xe] sm:$0x1] %vm183_vm0, %v891_v39 }
 0x291   : > { %v923_v40 = vpop.permute.xlu1 %922  ;;  %v913_v42 = vpop.permute.xlu0 %912 }
 0x292   : > { %925 = vst.msk [vmem:[#allocation3 + $0x12] sm:$0x1] %vm183_vm0, %v923_v40  ;;  %915 = vst.msk [vmem:[#allocation3 + $0x11] sm:$0x1] %vm183_vm0, %v913_v42 }
 0x295   : > { %v1049_v43 = vld [vmem:[#allocation3 + $0x8] sm:$0xff]  ;;  %v943_v44 = vpop.permute.xlu1 %942  ;;  %v933_v47 = vpop.permute.xlu0 %932 }
 0x296   : > { %945 = vst.msk [vmem:[#allocation3 + $0x14] sm:$0x1] %vm183_vm0, %v943_v44  ;;  %935 = vst.msk [vmem:[#allocation3 + $0x13] sm:$0x1] %vm183_vm0, %v933_v47  ;;  %2654 = vmatmul.mubr.msk.f32.gmra.mrb[2].mxu1 %vm606_vm9, %v1049_v43 }
 0x297   : > { %1271 = vmatprep.mubr.f32.mxu1 %v2966_v30 }
 0x299   : > { %v963_v48 = vpop.permute.xlu1 %962  ;;  %v953_v49 = vpop.permute.xlu0 %952 }
 0x29a   : > { %965 = vst.msk [vmem:[#allocation3 + $0x16] sm:$0x1] %vm183_vm0, %v963_v48  ;;  %955 = vst.msk [vmem:[#allocation3 + $0x15] sm:$0x1] %vm183_vm0, %v953_v49 }
 0x29d   : > { %v985_v50 = vpop.permute.xlu1 %984  ;;  %v973_v51 = vpop.permute.xlu0 %972 }
 0x29e   : > { %987 = vst.msk [vmem:[#allocation3 + $0x19] sm:$0x1] %vm183_vm0, %v985_v50  ;;  %975 = vst.msk [vmem:[#allocation3 + $0x17] sm:$0x1] %vm183_vm0, %v973_v51 }
 0x2a1   : > { %v1005_v7 = vpop.permute.xlu1 %1004  ;;  %v995_v52 = vpop.permute.xlu0 %994 }
 0x2a2   : > { %1007 = vst.msk [vmem:[#allocation3 + $0x1b] sm:$0x1] %vm183_vm0, %v1005_v7  ;;  %997 = vst.msk [vmem:[#allocation3 + $0x1a] sm:$0x1] %vm183_vm0, %v995_v52 }
 0x2a5   : > { %v1050_v53 = vld [vmem:[#allocation3 + $0x10] sm:$0xff]  ;;  %v1025_v54 = vpop.permute.xlu1 %1024  ;;  %v1015_v55 = vpop.permute.xlu0 %1014 }
 0x2a6   : > { %1027 = vst.msk [vmem:[#allocation3 + $0x1d] sm:$0x1] %vm183_vm0, %v1025_v54  ;;  %1017 = vst.msk [vmem:[#allocation3 + $0x1c] sm:$0x1] %vm183_vm0, %v1015_v55  ;;  %2655 = vmatmul.mubr.msk.f32.gmra.mrb[4].mxu1 %vm606_vm9, %v1050_v53 }
 0x2a7   : > { %1277 = vmatprep.mubr.f32.mxu1 %v2966_v30 }
 0x2a9   : > { %v1045_v56 = vpop.permute.xlu1 %1044  ;;  %v1035_v57 = vpop.permute.xlu0 %1034 }
 0x2aa   : > { %1047 = vst.msk [vmem:[#allocation3 + $0x1f] sm:$0x1] %vm183_vm0, %v1045_v56  ;;  %1037 = vst.msk [vmem:[#allocation3 + $0x1e] sm:$0x1] %vm183_vm0, %v1035_v57 }
 0x2b1   : > { %v1051_v58 = vld [vmem:[#allocation3 + $0x18] sm:$0xff] }
 0x2b2   : > { %2656 = vmatmul.mubr.msk.f32.gmra.mrb[6].mxu1 %vm606_vm9, %v1051_v58 }
 0x2b3   : > { %2409 = vmatprep.mubr.f32.mxu1 %v2966_v30 }
 0x35d   : > { %v1261_v19 = vpop.f32.mrb[0].mxu1 }
 0x35e   : > { %v1284_v20 = vmul.f32 %v1261_v19, %v1124_v16  ;;  %v1263_v23 = vpop.f32.mrb[1].mxu1 }
 0x35f   : > { %v1285_v25 = vmul.f32 %v1263_v23, %v1125_v22 }
 0x369   : > { %v1267_v29 = vpop.f32.mrb[2].mxu1 }
 0x36a   : > { %v1286_v31 = vmul.f32 %v1267_v29, %v1126_v28  ;;  %v1269_v33 = vpop.f32.mrb[3].mxu1 }
 0x36b   : > { %v1287_v34 = vmul.f32 %v1269_v33, %v1127_v32 }
 0x36c   : > { %v1288_v35 = vadd.f32 %v1286_v31, %v1284_v20 }
 0x36d   : > { %v1295_v36 = vadd.f32 %v1287_v34, %v1285_v25 }
 0x36e   : > { %v1289_v40 = vrot.slane %v1288_v35, 4 }
 0x36f   : > { %v1296_v42 = vrot.slane %v1295_v36, 4 }
 0x370   : > { %v1290_v43 = vadd.f32 %v1289_v40, %v1288_v35 }
 0x371   : > { %v1297_v44 = vadd.f32 %v1296_v42, %v1295_v36 }
 0x372   : > { %v1291_v51 = vrot.slane %v1290_v43, 2 }
 0x373   : > { %v1298_v52 = vrot.slane %v1297_v44, 2 }
 0x374   : > { %v1292_v56 = vadd.f32 %v1291_v51, %v1290_v43 }
 0x375   : > { %v1299_v58 = vadd.f32 %v1298_v52, %v1297_v44 }
 0x376   : > { %v1293_v62 = vrot.slane %v1292_v56, 1 }
 0x377   : > { %v1300_v0 = vrot.slane %v1299_v58, 1 }
 0x378   : > { %v1294_v6 = vadd.f32 %v1293_v62, %v1292_v56 }
 0x379   : > { %v1273_v37 = vpop.f32.mrb[4].mxu1  ;;  %v1301_v46 = vadd.f32 %v1300_v0, %v1299_v58 }
 0x37a   : > { %v1302_v8 = vmul.f32 %v1273_v37, %v1124_v16  ;;  %v1275_v38 = vpop.f32.mrb[5].mxu1 }
 0x37b   : > { %v1303_v39 = vmul.f32 %v1275_v38, %v1125_v22 }
 0x385   : > { %v1279_v47 = vpop.f32.mrb[6].mxu1 }
 0x386   : > { %v1304_v48 = vmul.f32 %v1279_v47, %v1126_v28  ;;  %v1281_v49 = vpop.f32.mrb[7].mxu1 }
 0x387   : > { %v1305_v50 = vmul.f32 %v1281_v49, %v1127_v32 }
 0x388   : > { %v1306_v7 = vadd.f32 %v1304_v48, %v1302_v8 }
 0x389   : > { %v1313_v53 = vadd.f32 %v1305_v50, %v1303_v39 }
 0x38a   : > { %v1307_v54 = vrot.slane %v1306_v7, 4 }
 0x38b   : > { %v1314_v55 = vrot.slane %v1313_v53, 4 }
 0x38c   : > { %v1308_v57 = vadd.f32 %v1307_v54, %v1306_v7 }
 0x38d   : > { %v1315_v59 = vadd.f32 %v1314_v55, %v1313_v53 }
 0x38e   : > { %v1309_v60 = vrot.slane %v1308_v57, 2 }
 0x38f   : > { %v1316_v61 = vrot.slane %v1315_v59, 2 }
 0x390   : > { %v1310_v63 = vadd.f32 %v1309_v60, %v1308_v57 }
 0x391   : > { %v1317_v1 = vadd.f32 %v1316_v61, %v1315_v59 }
 0x392   : > { %v1311_v2 = vrot.slane %v1310_v63, 1 }
 0x393   : > { %v1318_v4 = vrot.slane %v1317_v1, 1 }
 0x394   : > { %v1312_v10 = vadd.f32 %v1311_v2, %v1310_v63 }
 0x395   : > { %v1319_v11 = vadd.f32 %v1318_v4, %v1317_v1 }
 0x396   : > { %v1320_v12 = vsel %vm744_vm3, %v1294_v6, %v1312_v10 }
 0x397   : > { %v1321_v13 = vsel %vm744_vm3, %v1301_v46, %v1319_v11 }
 0x398   : > { %v1324_v14 = vcombine.low %v1320_v12, %v1321_v13 }
 0x39a   : > { %v1331_v15 = vrot.slane %v1324_v14, %v3282_v41 }
 0x39c   : > { %v3405_v16 = vadd.f32 %v1331_v15, %v3287_v45 }
 0x39e   : > { %1334 = vst [vmem:[#allocation2] sm:$0xf] %v3405_v16  ;;  %v3410_v19 = vrot.slane %v3405_v16, %v3145_v5 }
 0x3a0   : > { %v1637_v20 = vcombine.high %v3410_v19, %v3410_v19 }
 0x3a2   : > { %v1639_v22 = vadd.f32 %v1637_v20, %v3154_v9 }
 0x3a4   : > { %v1641_v23 = vfloor.f32 %v1639_v22 }
 0x3a5   : > { %v2658_v25 = vld [vmem:[#allocation2] ss:$0 sm:$0xff]  ;;  %v1407_v28 = vld [vmem:[#allocation2 + $0x2] sm:$0x1]  ;;  %v1479_v29 = vld [vmem:[#allocation2 + $0x1] sm:$0x1] }
 0x3a6   : > { %1353 = vrot.lane.b32.xlu1 %v2658_v25, %s2965_s26  ;;  %1343 = vrot.lane.b32.xlu0 %v2658_v25, %s2963_s17  ;;  %v1644_v26 = vsub.f32 %v1639_v22, %v1641_v23  ;;  %v2754_v45 = vtrunc.f32 %v1641_v23  ;;  %v1335_v27 = vld [vmem:[#allocation2] sm:$0x1]  ;;  %1408 = vst.msk [vmem:[#allocation3 + $0x8] sm:$0x1] %vm183_vm0, %v1407_v28  ;;  %v1551_v31 = vld [vmem:[#allocation2 + $0x3] sm:$0x1] }
 0x3a7   : > { %1336 = vst.msk [vmem:[#allocation3] sm:$0x1] %vm183_vm0, %v1335_v27  ;;  %1480 = vst.msk [vmem:[#allocation3 + $0x10] sm:$0x1] %vm183_vm0, %v1479_v29  ;;  %v2664_v50 = vld [vmem:[#allocation2 + $0x2] ss:$0 sm:$0xff] }
 0x3a8   : > { %v1645_v32 = vsub.f32 1.0, %v1644_v26  ;;  %v2755_v33 = vcvt.f32.s32 %v2754_v45  ;;  %1552 = vst.msk [vmem:[#allocation3 + $0x18] sm:$0x1] %vm183_vm0, %v1551_v31  ;;  %v1736_v36 = vrot.slane %v1644_v26, %v3162_v17  ;;  %v1732_v38 = vrot.slane %v1644_v26, %v3165_v18  ;;  %v2672_v54 = vld [vmem:[#allocation2 + $0x1] ss:$0 sm:$0xff] }
 0x3a9   : > { %v2678_v55 = vld [vmem:[#allocation2 + $0x3] ss:$0 sm:$0xff] }
 0x3aa   : > { %1373 = vrot.lane.b32.xlu1 %v2658_v25, %s2964_s24  ;;  %1363 = vrot.lane.b32.xlu0 %v2658_v25, %s2962_s15  ;;  %v1710_v9 = vrot.slane %v2755_v33, %v3162_v17  ;;  %v1715_v34 = vadd.s32 1, %v2755_v33  ;;  %v1706_v35 = vrot.slane %v2755_v33, %v3165_v18  ;;  %v1751_v8 = vrot.slane %v1645_v32, %v3162_v17 }
 0x3ab   : > { %v1747_v39 = vrot.slane %v1645_v32, %v3165_v18 }
 0x3ac   : > { %v1723_v37 = vrot.slane %v1715_v34, %v3162_v17  ;;  %vm1712_vm7 = vcmp.eq.s32.totalorder %v3142_v3, %v1710_v9  ;;  %vm1714_vm8 = vcmp.eq.s32.totalorder %v3169_v21, %v1710_v9  ;;  %vm1711_vm10 = vcmp.eq.s32.totalorder %v3142_v3, %v1706_v35 }
 0x3ad   : > { %v1719_v40 = vrot.slane %v1715_v34, %v3165_v18  ;;  %vm1713_vm13 = vcmp.eq.s32.totalorder %v3169_v21, %v1706_v35  ;;  %v1636_v9 = vadd.f32 %v3410_v19, %v3260_v24 }
 0x3ae   : > { %1393 = vrot.lane.b32.xlu1 %v2658_v25, %s2967_s27  ;;  %1383 = vrot.lane.b32.xlu0 %v2658_v25, %s2968_s28  ;;  %vm1725_vm11 = vcmp.eq.s32.totalorder %v3142_v3, %v1723_v37  ;;  %vm1727_vm12 = vcmp.eq.s32.totalorder %v3169_v21, %v1723_v37 }
 0x3af   : > { %v1740_v42 = vsel %vm1725_vm11, %v1736_v36, 0.0  ;;  %v1742_v43 = vsel %vm1727_vm12, %v1736_v36, 0.0  ;;  %vm1724_vm14 = vcmp.eq.s32.totalorder %v3142_v3, %v1719_v40  ;;  %vm1726_vm15 = vcmp.eq.s32.totalorder %v3169_v21, %v1719_v40 }
 0x3b0   : > { %v1755_v44 = vsel %vm1712_vm7, %v1751_v8, %v1740_v42  ;;  %v1757_v47 = vsel %vm1714_vm8, %v1751_v8, %v1742_v43  ;;  %v1739_v48 = vsel %vm1724_vm14, %v1732_v38, 0.0  ;;  %v1741_v49 = vsel %vm1726_vm15, %v1732_v38, 0.0 }
 0x3b1   : > { %v2736_v51 = vpack.c.bf16 %v1757_v47, %v1755_v44  ;;  %v1754_v7 = vsel %vm1711_vm10, %v1747_v39, %v1739_v48  ;;  %v1756_v52 = vsel %vm1713_vm13, %v1747_v39, %v1741_v49  ;;  %v1640_v34 = vfloor.f32 %v1636_v9 }
 0x3b2   : > { %1415 = vrot.lane.b32.xlu1 %v2664_v50, %s2963_s17  ;;  %1403 = vrot.lane.b32.xlu0 %v2658_v25, %s2969_s29  ;;  %v2738_v53 = vpack.c.bf16 %v1756_v52, %v1754_v7 }
 0x3b3   : > { %2737 = vmatprep.subr.bf16.mxu0 %v2736_v51  ;;  %v2752_v35 = vtrunc.f32 %v1640_v34  ;;  %v1642_v8 = vsub.f32 %v1636_v9, %v1640_v34 }
 0x3b4   : > { %2739 = vmatpush1.bf16.msra.mxu0 %v2738_v53 }
 0x3b5   : > { %v2753_v36 = vcvt.f32.s32 %v2752_v35  ;;  %v1643_v40 = vsub.f32 1.0, %v1642_v8  ;;  %v1677_v43 = vrot.slane %v1642_v8, %v3165_v18  ;;  %v1681_v19 = vrot.slane %v1642_v8, %v3162_v17 }
 0x3b6   : > { %1435 = vrot.lane.b32.xlu1 %v2664_v50, %s2962_s15  ;;  %1425 = vrot.lane.b32.xlu0 %v2664_v50, %s2965_s26 }
 0x3b7   : > { %v1660_v37 = vadd.s32 1, %v2753_v36  ;;  %v1651_v42 = vrot.slane %v2753_v36, %v3165_v18  ;;  %v1655_v24 = vrot.slane %v2753_v36, %v3162_v17  ;;  %v1692_v47 = vrot.slane %v1643_v40, %v3165_v18 }
 0x3b8   : > { %v1696_v49 = vrot.slane %v1643_v40, %v3162_v17 }
 0x3b9   : > { %v1664_v38 = vrot.slane %v1660_v37, %v3165_v18  ;;  %v1668_v39 = vrot.slane %v1660_v37, %v3162_v17  ;;  %vm1656_vm4 = vcmp.eq.s32.totalorder %v3142_v3, %v1651_v42  ;;  %vm1657_vm5 = vcmp.eq.s32.totalorder %v3142_v3, %v1655_v24 }
 0x3ba   : > { %1455 = vrot.lane.b32.xlu1 %v2664_v50, %s2968_s28  ;;  %1445 = vrot.lane.b32.xlu0 %v2664_v50, %s2964_s24  ;;  %vm1658_vm8 = vcmp.eq.s32.totalorder %v3169_v21, %v1651_v42  ;;  %vm1659_vm10 = vcmp.eq.s32.totalorder %v3169_v21, %v1655_v24 }
 0x3bb   : > { %vm1669_vm1 = vcmp.eq.s32.totalorder %v3142_v3, %v1664_v38  ;;  %vm1670_vm2 = vcmp.eq.s32.totalorder %v3142_v3, %v1668_v39  ;;  %vm1671_vm6 = vcmp.eq.s32.totalorder %v3169_v21, %v1664_v38  ;;  %vm1672_vm7 = vcmp.eq.s32.totalorder %v3169_v21, %v1668_v39 }
 0x3bc   : > { %v1684_v44 = vsel %vm1669_vm1, %v1677_v43, 0.0  ;;  %v1685_v48 = vsel %vm1670_vm2, %v1681_v19, 0.0 }
 0x3bd   : > { %v1700_v52 = vsel %vm1657_vm5, %v1696_v49, %v1685_v48 }
 0x3be   : > { %1475 = vrot.lane.b32.xlu1 %v2664_v50, %s2969_s29  ;;  %1465 = vrot.lane.b32.xlu0 %v2664_v50, %s2967_s27  ;;  %v1699_v50 = vsel %vm1656_vm4, %v1692_v47, %v1684_v44 }
 0x3c2   : > { %1497 = vrot.lane.b32.xlu1 %v2672_v54, %s2965_s26  ;;  %1487 = vrot.lane.b32.xlu0 %v2672_v54, %s2963_s17 }
 0x3c6   : > { %1517 = vrot.lane.b32.xlu1 %v2672_v54, %s2964_s24  ;;  %1507 = vrot.lane.b32.xlu0 %v2672_v54, %s2962_s15 }
 0x3ca   : > { %1537 = vrot.lane.b32.xlu1 %v2672_v54, %s2967_s27  ;;  %1527 = vrot.lane.b32.xlu0 %v2672_v54, %s2968_s28 }
 0x3ce   : > { %1559 = vrot.lane.b32.xlu1 %v2678_v55, %s2963_s17  ;;  %1547 = vrot.lane.b32.xlu0 %v2672_v54, %s2969_s29 }
 0x3d2   : > { %1579 = vrot.lane.b32.xlu1 %v2678_v55, %s2962_s15  ;;  %1569 = vrot.lane.b32.xlu0 %v2678_v55, %s2965_s26 }
 0x3d6   : > { %1599 = vrot.lane.b32.xlu1 %v2678_v55, %s2968_s28  ;;  %1589 = vrot.lane.b32.xlu0 %v2678_v55, %s2964_s24 }
 0x3da   : > { %1619 = vrot.lane.b32.xlu1 %v2678_v55, %s2969_s29  ;;  %1609 = vrot.lane.b32.xlu0 %v2678_v55, %s2967_s27  ;;  %v1686_v55 = vsel %vm1671_vm6, %v1677_v43, 0.0 }
 0x418   : > { %v1354_v56 = vpop.permute.xlu1 %1353  ;;  %v1344_v57 = vpop.permute.xlu0 %1343 }
 0x419   : > { %1356 = vst.msk [vmem:[#allocation3 + $0x2] sm:$0x1] %vm183_vm0, %v1354_v56  ;;  %1346 = vst.msk [vmem:[#allocation3 + $0x1] sm:$0x1] %vm183_vm0, %v1344_v57  ;;  %v1687_v56 = vsel %vm1672_vm7, %v1681_v19, 0.0  ;;  %v1701_v57 = vsel %vm1658_vm8, %v1692_v47, %v1686_v55 }
 0x41c   : > { %v1374_v58 = vpop.permute.xlu1 %1373  ;;  %v1364_v59 = vpop.permute.xlu0 %1363 }
 0x41d   : > { %1376 = vst.msk [vmem:[#allocation3 + $0x4] sm:$0x1] %vm183_vm0, %v1374_v58  ;;  %1366 = vst.msk [vmem:[#allocation3 + $0x3] sm:$0x1] %vm183_vm0, %v1364_v59 }
 0x420   : > { %v1394_v60 = vpop.permute.xlu1 %1393  ;;  %v1384_v61 = vpop.permute.xlu0 %1383 }
 0x421   : > { %1396 = vst.msk [vmem:[#allocation3 + $0x6] sm:$0x1] %vm183_vm0, %v1394_v60  ;;  %1386 = vst.msk [vmem:[#allocation3 + $0x5] sm:$0x1] %vm183_vm0, %v1384_v61  ;;  %v1702_v60 = vsel %vm1659_vm10, %v1696_v49, %v1687_v56 }
 0x424   : > { %v1416_v62 = vpop.permute.xlu1 %1415  ;;  %v1404_v63 = vpop.permute.xlu0 %1403 }
 0x425   : > { %1418 = vst.msk [vmem:[#allocation3 + $0x9] sm:$0x1] %vm183_vm0, %v1416_v62  ;;  %1406 = vst.msk [vmem:[#allocation3 + $0x7] sm:$0x1] %vm183_vm0, %v1404_v63 }
 0x428   : > { %v1436_v0 = vpop.permute.xlu1 %1435  ;;  %v1426_v1 = vpop.permute.xlu0 %1425 }
 0x429   : > { %1438 = vst.msk [vmem:[#allocation3 + $0xb] sm:$0x1] %vm183_vm0, %v1436_v0  ;;  %1428 = vst.msk [vmem:[#allocation3 + $0xa] sm:$0x1] %vm183_vm0, %v1426_v1 }
 0x42c   : > { %v1456_v2 = vpop.permute.xlu1 %1455  ;;  %v1446_v4 = vpop.permute.xlu0 %1445  ;;  %v1623_v6 = vld [vmem:[#allocation3] sm:$0xff] }
 0x42d   : > { %1458 = vst.msk [vmem:[#allocation3 + $0xd] sm:$0x1] %vm183_vm0, %v1456_v2  ;;  %1448 = vst.msk [vmem:[#allocation3 + $0xc] sm:$0x1] %vm183_vm0, %v1446_v4  ;;  %2685 = vmatmul.mubr.msk.f32.vlgmr.msra.gmra.mrb[8].mxu0 %vm606_vm9, %v1623_v6 }
 0x42e   : > { %1840 = vmatprep.mubr.f32.mxu0 %v2966_v30 }
 0x430   : > { %v1476_v10 = vpop.permute.xlu1 %1475  ;;  %v1466_v46 = vpop.permute.xlu0 %1465 }
 0x431   : > { %1478 = vst.msk [vmem:[#allocation3 + $0xf] sm:$0x1] %vm183_vm0, %v1476_v10  ;;  %1468 = vst.msk [vmem:[#allocation3 + $0xe] sm:$0x1] %vm183_vm0, %v1466_v46 }
 0x434   : > { %v1498_v11 = vpop.permute.xlu1 %1497  ;;  %v1488_v12 = vpop.permute.xlu0 %1487 }
 0x435   : > { %1500 = vst.msk [vmem:[#allocation3 + $0x12] sm:$0x1] %vm183_vm0, %v1498_v11  ;;  %1490 = vst.msk [vmem:[#allocation3 + $0x11] sm:$0x1] %vm183_vm0, %v1488_v12 }
 0x438   : > { %v1518_v13 = vpop.permute.xlu1 %1517  ;;  %v1508_v14 = vpop.permute.xlu0 %1507  ;;  %v1624_v15 = vld [vmem:[#allocation3 + $0x8] sm:$0xff] }
 0x439   : > { %1520 = vst.msk [vmem:[#allocation3 + $0x14] sm:$0x1] %vm183_vm0, %v1518_v13  ;;  %1510 = vst.msk [vmem:[#allocation3 + $0x13] sm:$0x1] %vm183_vm0, %v1508_v14  ;;  %2686 = vmatmul.mubr.msk.f32.gmra.mrb[10].mxu0 %vm606_vm9, %v1624_v15 }
 0x43a   : > { %1846 = vmatprep.mubr.f32.mxu0 %v2966_v30 }
 0x43c   : > { %v1538_v20 = vpop.permute.xlu1 %1537  ;;  %v1528_v22 = vpop.permute.xlu0 %1527 }
 0x43d   : > { %1540 = vst.msk [vmem:[#allocation3 + $0x16] sm:$0x1] %vm183_vm0, %v1538_v20  ;;  %1530 = vst.msk [vmem:[#allocation3 + $0x15] sm:$0x1] %vm183_vm0, %v1528_v22 }
 0x440   : > { %v1560_v23 = vpop.permute.xlu1 %1559  ;;  %v1548_v25 = vpop.permute.xlu0 %1547 }
 0x441   : > { %1562 = vst.msk [vmem:[#allocation3 + $0x19] sm:$0x1] %vm183_vm0, %v1560_v23  ;;  %1550 = vst.msk [vmem:[#allocation3 + $0x17] sm:$0x1] %vm183_vm0, %v1548_v25 }
 0x444   : > { %v1580_v26 = vpop.permute.xlu1 %1579  ;;  %v1570_v45 = vpop.permute.xlu0 %1569 }
 0x445   : > { %1582 = vst.msk [vmem:[#allocation3 + $0x1b] sm:$0x1] %vm183_vm0, %v1580_v26  ;;  %1572 = vst.msk [vmem:[#allocation3 + $0x1a] sm:$0x1] %vm183_vm0, %v1570_v45 }
 0x448   : > { %v1600_v27 = vpop.permute.xlu1 %1599  ;;  %v1590_v28 = vpop.permute.xlu0 %1589  ;;  %v1625_v29 = vld [vmem:[#allocation3 + $0x10] sm:$0xff] }
 0x449   : > { %1602 = vst.msk [vmem:[#allocation3 + $0x1d] sm:$0x1] %vm183_vm0, %v1600_v27  ;;  %1592 = vst.msk [vmem:[#allocation3 + $0x1c] sm:$0x1] %vm183_vm0, %v1590_v28  ;;  %2687 = vmatmul.mubr.msk.f32.gmra.mrb[12].mxu0 %vm606_vm9, %v1625_v29 }
 0x44a   : > { %1852 = vmatprep.mubr.f32.mxu0 %v2966_v30 }
 0x44c   : > { %v1620_v31 = vpop.permute.xlu1 %1619  ;;  %v1610_v32 = vpop.permute.xlu0 %1609 }
 0x44d   : > { %1622 = vst.msk [vmem:[#allocation3 + $0x1f] sm:$0x1] %vm183_vm0, %v1620_v31  ;;  %1612 = vst.msk [vmem:[#allocation3 + $0x1e] sm:$0x1] %vm183_vm0, %v1610_v32 }
 0x454   : > { %v1626_v33 = vld [vmem:[#allocation3 + $0x18] sm:$0xff] }
 0x455   : > { %2688 = vmatmul.mubr.msk.f32.gmra.mrb[14].mxu0 %vm606_vm9, %v1626_v33 }
 0x500   : > { %v1836_v51 = vpop.f32.mrb[8].mxu0 }
 0x501   : > { %v1859_v7 = vmul.f32 %v1836_v51, %v1699_v50  ;;  %v1838_v53 = vpop.f32.mrb[9].mxu0  ;;  %v2827_v51 = vld [vmem:[#allocation4 + $0x1] ss:$2 sm:$0x3] }
 0x502   : > { %v1860_v54 = vmul.f32 %v1838_v53, %v1700_v52 }
 0x50c   : > { %v1842_v58 = vpop.f32.mrb[10].mxu0 }
 0x50d   : > { %v1861_v59 = vmul.f32 %v1842_v58, %v1701_v57  ;;  %v1844_v61 = vpop.f32.mrb[11].mxu0 }
 0x50e   : > { %v1862_v62 = vmul.f32 %v1844_v61, %v1702_v60 }
 0x50f   : > { %v1863_v63 = vadd.f32 %v1861_v59, %v1859_v7 }
 0x510   : > { %v1870_v0 = vadd.f32 %v1862_v62, %v1860_v54 }
 0x511   : > { %v1864_v10 = vrot.slane %v1863_v63, 4 }
 0x512   : > { %v1871_v46 = vrot.slane %v1870_v0, 4 }
 0x513   : > { %v1865_v11 = vadd.f32 %v1864_v10, %v1863_v63 }
 0x514   : > { %v1872_v12 = vadd.f32 %v1871_v46, %v1870_v0 }
 0x515   : > { %v1866_v22 = vrot.slane %v1865_v11, 2 }
 0x516   : > { %v1873_v25 = vrot.slane %v1872_v12, 2 }
 0x517   : > { %v1867_v28 = vadd.f32 %v1866_v22, %v1865_v11 }
 0x518   : > { %v1874_v31 = vadd.f32 %v1873_v25, %v1872_v12 }
 0x519   : > { %v1868_v34 = vrot.slane %v1867_v28, 1 }
 0x51a   : > { %v1875_v36 = vrot.slane %v1874_v31, 1 }
 0x51b   : > { %v1869_v39 = vadd.f32 %v1868_v34, %v1867_v28 }
 0x51c   : > { %v1848_v1 = vpop.f32.mrb[12].mxu0  ;;  %v1876_v42 = vadd.f32 %v1875_v36, %v1874_v31 }
 0x51d   : > { %v1877_v2 = vmul.f32 %v1848_v1, %v1699_v50  ;;  %v1850_v4 = vpop.f32.mrb[13].mxu0 }
 0x51e   : > { %v1878_v6 = vmul.f32 %v1850_v4, %v1700_v52 }
 0x528   : > { %v1854_v13 = vpop.f32.mrb[14].mxu0 }
 0x529   : > { %v1879_v14 = vmul.f32 %v1854_v13, %v1701_v57  ;;  %v1856_v15 = vpop.f32.mrb[15].mxu0 }
 0x52a   : > { %v1880_v20 = vmul.f32 %v1856_v15, %v1702_v60 }
 0x52b   : > { %v1881_v23 = vadd.f32 %v1879_v14, %v1877_v2 }
 0x52c   : > { %v1888_v26 = vadd.f32 %v1880_v20, %v1878_v6 }
 0x52d   : > { %v1882_v45 = vrot.slane %v1881_v23, 4 }
 0x52e   : > { %v1889_v27 = vrot.slane %v1888_v26, 4 }
 0x52f   : > { %v1883_v29 = vadd.f32 %v1882_v45, %v1881_v23 }
 0x530   : > { %v1890_v32 = vadd.f32 %v1889_v27, %v1888_v26 }
 0x531   : > { %v1884_v33 = vrot.slane %v1883_v29, 2 }
 0x532   : > { %v1891_v9 = vrot.slane %v1890_v32, 2 }
 0x533   : > { %v1885_v35 = vadd.f32 %v1884_v33, %v1883_v29 }
 0x534   : > { %v1892_v37 = vadd.f32 %v1891_v9, %v1890_v32 }
 0x535   : > { %v1886_v8 = vrot.slane %v1885_v35, 1 }
 0x536   : > { %v1893_v38 = vrot.slane %v1892_v37, 1 }
 0x537   : > { %v1887_v40 = vadd.f32 %v1886_v8, %v1885_v35 }
 0x538   : > { %v1894_v43 = vadd.f32 %v1893_v38, %v1892_v37 }
 0x539   : > { %v1895_v24 = vsel %vm744_vm3, %v1869_v39, %v1887_v40 }
 0x53a   : > { %v1896_v19 = vsel %vm744_vm3, %v1876_v42, %v1894_v43 }
 0x53b   : > { %v1899_v44 = vcombine.low %v1895_v24, %v1896_v19 }
 0x53d   : > { %v1906_v47 = vrot.slane %v1899_v44, %v3282_v41 }
 0x53f   : > { %v3522_v48 = vadd.f32 %v1906_v47, %v3405_v16 }
 0x541   : > { %1909 = vst [vmem:[#allocation2] sm:$0xf] %v3522_v48  ;;  %v3527_v49 = vrot.slane %v3522_v48, %v3145_v5 }
 0x543   : > { %v2212_v50 = vcombine.high %v3527_v49, %v3527_v49 }
 0x545   : > { %v2214_v7 = vadd.f32 %v2827_v51, %v2212_v50 }
 0x547   : > { %v2216_v52 = vfloor.f32 %v2214_v7 }
 0x548   : > { %v2690_v53 = vld [vmem:[#allocation2] ss:$0 sm:$0xff]  ;;  %v1982_v56 = vld [vmem:[#allocation2 + $0x2] sm:$0x1]  ;;  %v2054_v5 = vld [vmem:[#allocation2 + $0x1] sm:$0x1] }
 0x549   : > { %v1910_v54 = vld [vmem:[#allocation2] sm:$0x1]  ;;  %1928 = vrot.lane.b32.xlu1 %v2690_v53, %s2965_s26  ;;  %1918 = vrot.lane.b32.xlu0 %v2690_v53, %s2963_s17  ;;  %v2219_v16 = vsub.f32 %v2214_v7, %v2216_v52  ;;  %v2758_v55 = vtrunc.f32 %v2216_v52  ;;  %1983 = vst.msk [vmem:[#allocation3 + $0x8] sm:$0x1] %vm183_vm0, %v1982_v56  ;;  %v2126_v57 = vld [vmem:[#allocation2 + $0x3] sm:$0x1] }
 0x54a   : > { %1911 = vst.msk [vmem:[#allocation3] sm:$0x1] %vm183_vm0, %v1910_v54  ;;  %2055 = vst.msk [vmem:[#allocation3 + $0x10] sm:$0x1] %vm183_vm0, %v2054_v5  ;;  %v2696_v15 = vld [vmem:[#allocation2 + $0x2] ss:$0 sm:$0xff] }
 0x54b   : > { %v2220_v58 = vsub.f32 1.0, %v2219_v16  ;;  %v2759_v59 = vcvt.f32.s32 %v2758_v55  ;;  %2127 = vst.msk [vmem:[#allocation3 + $0x18] sm:$0x1] %vm183_vm0, %v2126_v57  ;;  %v2311_v63 = vrot.slane %v2219_v16, %v3162_v17  ;;  %v2307_v2 = vrot.slane %v2219_v16, %v3165_v18  ;;  %v2704_v26 = vld [vmem:[#allocation2 + $0x1] ss:$0 sm:$0xff] }
 0x54c   : > { %v2710_v45 = vld [vmem:[#allocation2 + $0x3] ss:$0 sm:$0xff] }
 0x54d   : > { %1948 = vrot.lane.b32.xlu1 %v2690_v53, %s2964_s24  ;;  %1938 = vrot.lane.b32.xlu0 %v2690_v53, %s2962_s15  ;;  %v2285_v60 = vrot.slane %v2759_v59, %v3162_v17  ;;  %v2290_v61 = vadd.s32 1, %v2759_v59  ;;  %v2281_v62 = vrot.slane %v2759_v59, %v3165_v18  ;;  %v2326_v1 = vrot.slane %v2220_v58, %v3162_v17 }
 0x54e   : > { %v2322_v4 = vrot.slane %v2220_v58, %v3165_v18  ;;  %v2828_v58 = vld [vmem:[#allocation4] ss:$2 sm:$0x3] }
 0x54f   : > { %v2298_v0 = vrot.slane %v2290_v61, %v3162_v17  ;;  %vm2287_vm11 = vcmp.eq.s32.totalorder %v3142_v3, %v2285_v60  ;;  %vm2289_vm12 = vcmp.eq.s32.totalorder %v3169_v21, %v2285_v60  ;;  %vm2286_vm13 = vcmp.eq.s32.totalorder %v3142_v3, %v2281_v62 }
 0x550   : > { %v2294_v6 = vrot.slane %v2290_v61, %v3165_v18  ;;  %vm2288_vm1 = vcmp.eq.s32.totalorder %v3169_v21, %v2281_v62  ;;  %v2211_v59 = vadd.f32 %v2828_v58, %v3527_v49 }
 0x551   : > { %1968 = vrot.lane.b32.xlu1 %v2690_v53, %s2967_s27  ;;  %1958 = vrot.lane.b32.xlu0 %v2690_v53, %s2968_s28  ;;  %vm2300_vm14 = vcmp.eq.s32.totalorder %v3142_v3, %v2298_v0  ;;  %vm2302_vm15 = vcmp.eq.s32.totalorder %v3169_v21, %v2298_v0 }
 0x552   : > { %v2315_v10 = vsel %vm2300_vm14, %v2311_v63, 0.0  ;;  %v2317_v46 = vsel %vm2302_vm15, %v2311_v63, 0.0  ;;  %vm2299_vm2 = vcmp.eq.s32.totalorder %v3142_v3, %v2294_v6  ;;  %vm2301_vm4 = vcmp.eq.s32.totalorder %v3169_v21, %v2294_v6 }
 0x553   : > { %v2330_v11 = vsel %vm2287_vm11, %v2326_v1, %v2315_v10  ;;  %v2332_v12 = vsel %vm2289_vm12, %v2326_v1, %v2317_v46  ;;  %v2314_v13 = vsel %vm2299_vm2, %v2307_v2, 0.0  ;;  %v2316_v14 = vsel %vm2301_vm4, %v2307_v2, 0.0 }
 0x554   : > { %v2740_v20 = vpack.c.bf16 %v2332_v12, %v2330_v11  ;;  %v2329_v22 = vsel %vm2286_vm13, %v2322_v4, %v2314_v13  ;;  %v2331_v23 = vsel %vm2288_vm1, %v2322_v4, %v2316_v14  ;;  %v2215_v60 = vfloor.f32 %v2211_v59 }
 0x555   : > { %1990 = vrot.lane.b32.xlu1 %v2696_v15, %s2963_s17  ;;  %1978 = vrot.lane.b32.xlu0 %v2690_v53, %s2969_s29  ;;  %v2742_v25 = vpack.c.bf16 %v2331_v23, %v2329_v22 }
 0x556   : > { %2741 = vmatprep.subr.bf16.mxu1 %v2740_v20  ;;  %v2756_v61 = vtrunc.f32 %v2215_v60  ;;  %v2217_v0 = vsub.f32 %v2211_v59, %v2215_v60 }
 0x557   : > { %2743 = vmatpush1.bf16.msra.mxu1 %v2742_v25 }
 0x558   : > { %v2757_v62 = vcvt.f32.s32 %v2756_v61  ;;  %v2218_v2 = vsub.f32 1.0, %v2217_v0  ;;  %v2252_v6 = vrot.slane %v2217_v0, %v3165_v18  ;;  %v2256_v10 = vrot.slane %v2217_v0, %v3162_v17 }
 0x559   : > { %2010 = vrot.lane.b32.xlu1 %v2696_v15, %s2962_s15  ;;  %2000 = vrot.lane.b32.xlu0 %v2696_v15, %s2965_s26 }
 0x55a   : > { %v2235_v63 = vadd.s32 1, %v2757_v62  ;;  %v2226_v4 = vrot.slane %v2757_v62, %v3165_v18  ;;  %v2230_v49 = vrot.slane %v2757_v62, %v3162_v17  ;;  %v2267_v11 = vrot.slane %v2218_v2, %v3165_v18 }
 0x55b   : > { %v2271_v13 = vrot.slane %v2218_v2, %v3162_v17 }
 0x55c   : > { %v2239_v1 = vrot.slane %v2235_v63, %v3165_v18  ;;  %vm2232_vm6 = vcmp.eq.s32.totalorder %v3142_v3, %v2230_v49  ;;  %vm2233_vm10 = vcmp.eq.s32.totalorder %v3169_v21, %v2226_v4  ;;  %vm2234_vm11 = vcmp.eq.s32.totalorder %v3169_v21, %v2230_v49 }
 0x55d   : > { %2030 = vrot.lane.b32.xlu1 %v2696_v15, %s2968_s28  ;;  %2020 = vrot.lane.b32.xlu0 %v2696_v15, %s2964_s24 }
 0x55e   : > { %vm2244_vm5 = vcmp.eq.s32.totalorder %v3142_v3, %v2239_v1  ;;  %vm2246_vm7 = vcmp.eq.s32.totalorder %v3169_v21, %v2239_v1 }
 0x55f   : > { %v2259_v46 = vsel %vm2244_vm5, %v2252_v6, 0.0 }
 0x561   : > { %2050 = vrot.lane.b32.xlu1 %v2696_v15, %s2969_s29  ;;  %2040 = vrot.lane.b32.xlu0 %v2696_v15, %s2967_s27 }
 0x565   : > { %2072 = vrot.lane.b32.xlu1 %v2704_v26, %s2965_s26  ;;  %2062 = vrot.lane.b32.xlu0 %v2704_v26, %s2963_s17 }
 0x569   : > { %2092 = vrot.lane.b32.xlu1 %v2704_v26, %s2964_s24  ;;  %2082 = vrot.lane.b32.xlu0 %v2704_v26, %s2962_s15 }
 0x56d   : > { %2112 = vrot.lane.b32.xlu1 %v2704_v26, %s2967_s27  ;;  %2102 = vrot.lane.b32.xlu0 %v2704_v26, %s2968_s28 }
 0x571   : > { %2134 = vrot.lane.b32.xlu1 %v2710_v45, %s2963_s17  ;;  %2122 = vrot.lane.b32.xlu0 %v2704_v26, %s2969_s29  ;;  %v2261_v26 = vsel %vm2246_vm7, %v2252_v6, 0.0 }
 0x572   : > { %v2276_v18 = vsel %vm2233_vm10, %v2267_v11, %v2261_v26 }
 0x575   : > { %2154 = vrot.lane.b32.xlu1 %v2710_v45, %s2962_s15  ;;  %2144 = vrot.lane.b32.xlu0 %v2710_v45, %s2965_s26 }
 0x579   : > { %2174 = vrot.lane.b32.xlu1 %v2710_v45, %s2968_s28  ;;  %2164 = vrot.lane.b32.xlu0 %v2710_v45, %s2964_s24 }
 0x57d   : > { %2194 = vrot.lane.b32.xlu1 %v2710_v45, %s2969_s29  ;;  %2184 = vrot.lane.b32.xlu0 %v2710_v45, %s2967_s27 }
 0x5bb   : > { %v1929_v27 = vpop.permute.xlu1 %1928  ;;  %v1919_v28 = vpop.permute.xlu0 %1918 }
 0x5bc   : > { %1931 = vst.msk [vmem:[#allocation3 + $0x2] sm:$0x1] %vm183_vm0, %v1929_v27  ;;  %1921 = vst.msk [vmem:[#allocation3 + $0x1] sm:$0x1] %vm183_vm0, %v1919_v28 }
 0x5bf   : > { %v1949_v29 = vpop.permute.xlu1 %1948  ;;  %v1939_v31 = vpop.permute.xlu0 %1938 }
 0x5c0   : > { %1951 = vst.msk [vmem:[#allocation3 + $0x4] sm:$0x1] %vm183_vm0, %v1949_v29  ;;  %1941 = vst.msk [vmem:[#allocation3 + $0x3] sm:$0x1] %vm183_vm0, %v1939_v31 }
 0x5c3   : > { %v1969_v32 = vpop.permute.xlu1 %1968  ;;  %v1959_v33 = vpop.permute.xlu0 %1958 }
 0x5c4   : > { %1971 = vst.msk [vmem:[#allocation3 + $0x6] sm:$0x1] %vm183_vm0, %v1969_v32  ;;  %1961 = vst.msk [vmem:[#allocation3 + $0x5] sm:$0x1] %vm183_vm0, %v1959_v33 }
 0x5c7   : > { %v1991_v9 = vpop.permute.xlu1 %1990  ;;  %v1979_v34 = vpop.permute.xlu0 %1978 }
 0x5c8   : > { %1993 = vst.msk [vmem:[#allocation3 + $0x9] sm:$0x1] %vm183_vm0, %v1991_v9  ;;  %1981 = vst.msk [vmem:[#allocation3 + $0x7] sm:$0x1] %vm183_vm0, %v1979_v34 }
 0x5cb   : > { %v2011_v35 = vpop.permute.xlu1 %2010  ;;  %v2001_v36 = vpop.permute.xlu0 %2000 }
 0x5cc   : > { %2013 = vst.msk [vmem:[#allocation3 + $0xb] sm:$0x1] %vm183_vm0, %v2011_v35  ;;  %2003 = vst.msk [vmem:[#allocation3 + $0xa] sm:$0x1] %vm183_vm0, %v2001_v36 }
 0x5cf   : > { %v2031_v37 = vpop.permute.xlu1 %2030  ;;  %v2021_v8 = vpop.permute.xlu0 %2020  ;;  %v2198_v38 = vld [vmem:[#allocation3] sm:$0xff] }
 0x5d0   : > { %2033 = vst.msk [vmem:[#allocation3 + $0xd] sm:$0x1] %vm183_vm0, %v2031_v37  ;;  %2023 = vst.msk [vmem:[#allocation3 + $0xc] sm:$0x1] %vm183_vm0, %v2021_v8  ;;  %2717 = vmatmul.mubr.msk.f32.vlgmr.msra.gmra.mrb[8].mxu1 %vm606_vm9, %v2198_v38 }
 0x5d1   : > { %2415 = vmatprep.mubr.f32.mxu1 %v2966_v30 }
 0x5d3   : > { %v2051_v39 = vpop.permute.xlu1 %2050  ;;  %v2041_v40 = vpop.permute.xlu0 %2040 }
 0x5d4   : > { %2053 = vst.msk [vmem:[#allocation3 + $0xf] sm:$0x1] %vm183_vm0, %v2051_v39  ;;  %2043 = vst.msk [vmem:[#allocation3 + $0xe] sm:$0x1] %vm183_vm0, %v2041_v40 }
 0x5d7   : > { %v2073_v42 = vpop.permute.xlu1 %2072  ;;  %v2063_v43 = vpop.permute.xlu0 %2062 }
 0x5d8   : > { %2075 = vst.msk [vmem:[#allocation3 + $0x12] sm:$0x1] %vm183_vm0, %v2073_v42  ;;  %2065 = vst.msk [vmem:[#allocation3 + $0x11] sm:$0x1] %vm183_vm0, %v2063_v43 }
 0x5db   : > { %v2093_v24 = vpop.permute.xlu1 %2092  ;;  %v2083_v19 = vpop.permute.xlu0 %2082  ;;  %v2199_v44 = vld [vmem:[#allocation3 + $0x8] sm:$0xff] }
 0x5dc   : > { %2095 = vst.msk [vmem:[#allocation3 + $0x14] sm:$0x1] %vm183_vm0, %v2093_v24  ;;  %2085 = vst.msk [vmem:[#allocation3 + $0x13] sm:$0x1] %vm183_vm0, %v2083_v19  ;;  %2718 = vmatmul.mubr.msk.f32.gmra.mrb[10].mxu1 %vm606_vm9, %v2199_v44 }
 0x5dd   : > { %2421 = vmatprep.mubr.f32.mxu1 %v2966_v30 }
 0x5df   : > { %v2113_v47 = vpop.permute.xlu1 %2112  ;;  %v2103_v50 = vpop.permute.xlu0 %2102 }
 0x5e0   : > { %2115 = vst.msk [vmem:[#allocation3 + $0x16] sm:$0x1] %vm183_vm0, %v2113_v47  ;;  %2105 = vst.msk [vmem:[#allocation3 + $0x15] sm:$0x1] %vm183_vm0, %v2103_v50 }
 0x5e3   : > { %v2135_v51 = vpop.permute.xlu1 %2134  ;;  %v2123_v7 = vpop.permute.xlu0 %2122 }
 0x5e4   : > { %2137 = vst.msk [vmem:[#allocation3 + $0x19] sm:$0x1] %vm183_vm0, %v2135_v51  ;;  %2125 = vst.msk [vmem:[#allocation3 + $0x17] sm:$0x1] %vm183_vm0, %v2123_v7 }
 0x5e7   : > { %v2155_v52 = vpop.permute.xlu1 %2154  ;;  %v2145_v53 = vpop.permute.xlu0 %2144 }
 0x5e8   : > { %2157 = vst.msk [vmem:[#allocation3 + $0x1b] sm:$0x1] %vm183_vm0, %v2155_v52  ;;  %2147 = vst.msk [vmem:[#allocation3 + $0x1a] sm:$0x1] %vm183_vm0, %v2145_v53 }
 0x5eb   : > { %v2175_v54 = vpop.permute.xlu1 %2174  ;;  %v2165_v16 = vpop.permute.xlu0 %2164  ;;  %v2200_v55 = vld [vmem:[#allocation3 + $0x10] sm:$0xff] }
 0x5ec   : > { %2177 = vst.msk [vmem:[#allocation3 + $0x1d] sm:$0x1] %vm183_vm0, %v2175_v54  ;;  %2167 = vst.msk [vmem:[#allocation3 + $0x1c] sm:$0x1] %vm183_vm0, %v2165_v16  ;;  %2719 = vmatmul.mubr.msk.f32.gmra.mrb[12].mxu1 %vm606_vm9, %v2200_v55 }
 0x5ed   : > { %2427 = vmatprep.mubr.f32.mxu1 %v2966_v30  ;;  %v2243_v30 = vrot.slane %v2235_v63, %v3162_v17 }
 0x5ef   : > { %v2195_v56 = vpop.permute.xlu1 %2194  ;;  %v2185_v5 = vpop.permute.xlu0 %2184  ;;  %vm2247_vm8 = vcmp.eq.s32.totalorder %v3169_v21, %v2243_v30 }
 0x5f0   : > { %2197 = vst.msk [vmem:[#allocation3 + $0x1f] sm:$0x1] %vm183_vm0, %v2195_v56  ;;  %2187 = vst.msk [vmem:[#allocation3 + $0x1e] sm:$0x1] %vm183_vm0, %v2185_v5  ;;  %vm2245_vm0 = vcmp.eq.s32.totalorder %v3142_v3, %v2243_v30  ;;  %v2262_v45 = vsel %vm2247_vm8, %v2256_v10, 0.0 }
 0x5f1   : > { %v2260_v12 = vsel %vm2245_vm0, %v2256_v10, 0.0  ;;  %v2277_v28 = vsel %vm2234_vm11, %v2271_v13, %v2262_v45 }
 0x5f2   : > { %v2275_v22 = vsel %vm2232_vm6, %v2271_v13, %v2260_v12 }
 0x5f7   : > { %v2201_v57 = vld [vmem:[#allocation3 + $0x18] sm:$0xff] }
 0x5f8   : > { %2720 = vmatmul.mubr.msk.f32.gmra.mrb[14].mxu1 %vm606_vm9, %v2201_v57  ;;  %vm2231_vm9 = vcmp.eq.s32.totalorder %v3142_v3, %v2226_v4 }
 0x5f9   : > { %v2274_v14 = vsel %vm2231_vm9, %v2267_v11, %v2259_v46 }
 0x6a3   : > { %v2411_v15 = vpop.f32.mrb[8].mxu1 }
 0x6a4   : > { %v2434_v20 = vmul.f32 %v2411_v15, %v2274_v14  ;;  %v2413_v23 = vpop.f32.mrb[9].mxu1 }
 0x6a5   : > { %v2435_v25 = vmul.f32 %v2413_v23, %v2275_v22 }
 0x6af   : > { %v2417_v27 = vpop.f32.mrb[10].mxu1 }
 0x6b0   : > { %v2436_v17 = vmul.f32 %v2417_v27, %v2276_v18  ;;  %v2419_v29 = vpop.f32.mrb[11].mxu1 }
 0x6b1   : > { %v2437_v3 = vmul.f32 %v2419_v29, %v2277_v28 }
 0x6b2   : > { %v2438_v31 = vadd.f32 %v2436_v17, %v2434_v20 }
 0x6b3   : > { %v2445_v32 = vadd.f32 %v2437_v3, %v2435_v25 }
 0x6b4   : > { %v2439_v36 = vrot.slane %v2438_v31, 4 }
 0x6b5   : > { %v2446_v37 = vrot.slane %v2445_v32, 4 }
 0x6b6   : > { %v2440_v8 = vadd.f32 %v2439_v36, %v2438_v31 }
 0x6b7   : > { %v2447_v38 = vadd.f32 %v2446_v37, %v2445_v32 }
 0x6b8   : > { %v2441_v24 = vrot.slane %v2440_v8, 2 }
 0x6b9   : > { %v2448_v19 = vrot.slane %v2447_v38, 2 }
 0x6ba   : > { %v2442_v51 = vadd.f32 %v2441_v24, %v2440_v8 }
 0x6bb   : > { %v2449_v52 = vadd.f32 %v2448_v19, %v2447_v38 }
 0x6bc   : > { %v2443_v55 = vrot.slane %v2442_v51, 1 }
 0x6bd   : > { %v2450_v5 = vrot.slane %v2449_v52, 1 }
 0x6be   : > { %v2444_v60 = vadd.f32 %v2443_v55, %v2442_v51 }
 0x6bf   : > { %v2423_v33 = vpop.f32.mrb[12].mxu1  ;;  %v2451_v62 = vadd.f32 %v2450_v5, %v2449_v52 }
 0x6c0   : > { %v2452_v9 = vmul.f32 %v2423_v33, %v2274_v14  ;;  %v2425_v34 = vpop.f32.mrb[13].mxu1 }
 0x6c1   : > { %v2453_v35 = vmul.f32 %v2425_v34, %v2275_v22 }
 0x6cb   : > { %v2429_v39 = vpop.f32.mrb[14].mxu1 }
 0x6cc   : > { %v2454_v40 = vmul.f32 %v2429_v39, %v2276_v18  ;;  %v2431_v42 = vpop.f32.mrb[15].mxu1 }
 0x6cd   : > { %v2455_v43 = vmul.f32 %v2431_v42, %v2277_v28 }
 0x6ce   : > { %v2456_v21 = vadd.f32 %v2454_v40, %v2452_v9 }
 0x6cf   : > { %v2463_v44 = vadd.f32 %v2455_v43, %v2453_v35 }
 0x6d0   : > { %v2457_v47 = vrot.slane %v2456_v21, 4 }
 0x6d1   : > { %v2464_v50 = vrot.slane %v2463_v44, 4 }
 0x6d2   : > { %v2458_v7 = vadd.f32 %v2457_v47, %v2456_v21 }
 0x6d3   : > { %v2465_v53 = vadd.f32 %v2464_v50, %v2463_v44 }
 0x6d4   : > { %v2459_v54 = vrot.slane %v2458_v7, 2 }
 0x6d5   : > { %v2466_v16 = vrot.slane %v2465_v53, 2 }
 0x6d6   : > { %v2460_v56 = vadd.f32 %v2459_v54, %v2458_v7 }
 0x6d7   : > { %v2467_v57 = vadd.f32 %v2466_v16, %v2465_v53 }
 0x6d8   : > { %v2461_v58 = vrot.slane %v2460_v56, 1 }
 0x6d9   : > { %v2468_v59 = vrot.slane %v2467_v57, 1 }
 0x6da   : > { %v2462_v61 = vadd.f32 %v2461_v58, %v2460_v56 }
 0x6db   : > { %v2469_v63 = vadd.f32 %v2468_v59, %v2467_v57 }
 0x6dc   : > { %v2470_v0 = vsel %vm744_vm3, %v2444_v60, %v2462_v61 }
 0x6dd   : > { %v2471_v1 = vsel %vm744_vm3, %v2451_v62, %v2469_v63 }
 0x6de   : > { %v2474_v30 = vcombine.low %v2470_v0, %v2471_v1 }
 0x6e0   : > { %v2481_v2 = vrot.slane %v2474_v30, %v3282_v41 }
 0x6e2   : > { %v2483_v4 = vadd.f32 %v2481_v2, %v3522_v48 }
 0x6e4   : > { %2484 = vst [vmem:[%s172_s3] sm:$0xf] %v2483_v4 }
 0x6e5   : > { %2900 = shalt.err (!%p2897_p10)
}
 0x6e6   : > { %s2901_s22 = scalar_lea.hbm %s3643_s14, 64  ;;  %s2905_s17 = scalar_lea.hbm %s3689_s2, 128 }
 0x6e7   : > { %p2902_p1 = scmp.ne.s32.totalorder %s3643_s14, %s2901_s22  ;;  %p2906_p3 = scmp.lt.u32.totalorder %s3643_s14, %s3689_s2 }
 0x6e8   : > { %p2907_p4 = scmp.lt.u32.totalorder %s2905_s17, %s2901_s22  ;;  %p2909_p6 = scmp.lt.u32.totalorder %s2901_s22, %s3643_s14 }
 0x6e9   : > { %p2903_p2 = pnand %p2902_p1, %p3079_p8 }
 0x6ea   : > { %p2908_p11 = por %p2907_p4, %p2906_p3 }
 0x6eb   : > { %p2904_p7 = pneg %p2903_p2 }
 0x6ec   : > { %p2910_p9 = por %p2909_p6, %p2908_p11 }
 0x6ee   : > { %p2911_p12 = pnand %p2910_p9, %p2904_p7 }
 0x6f0   : > { %2914 = shalt.err (!%p2911_p12)
}
 0x6f1   : > { %2766 = dma.vmem_to_hbm [thread:$0]  (%p3079_p8), %s3645_s4, 64, %s3643_s14, %s2486_s18  }
 0x6f2 PF: > { %s2512_s27 = sand.u32 1, %s2945_s9   ;;  %p3708_p13 = scmp.ne.s32.totalorder %s3694_s16, 0 }
 0x6f3   : > { %p3709_p0 = scmp.ge.s32.totalorder %s2957_s12, 2  ;;  %s2513_s28 = scalar_lea.sflag [#allocation6], %s2512_s27 }
 0x6f5   : > { %p2777_p5 = pnand %p3709_p0, %p3708_p13 }
 0x6f7   : > { %2940 = dma.done.wait (!%p2777_p5), %s2513_s28, 64  }
 0x6f8   : > { %2942 = vsyncadd (!%p2777_p5), %s2513_s28, 4294967232  ;;  %p16_p10 = scmp.ge.s32.totalorder %s3035_s20, 4   ;;  %s3710_s9 = smov %s2949_s10 }
 0x6f9   : > { %s3711_s10 = smov %s2953_s11  ;;  %s3712_s11 = smov %s3071_s7 }
 0x6fa   : > { %s3713_s12 = smov %s3035_s20  ;;  %18 = sbr.rel (!%p16_p10) target bundleno = 6 (0x6), region = 79 }
 0x701   :  { %2518 = vsyncpa [#allocation5], 1 }
 0x702   :  { %2520 = vsyncpa [#allocation5 + $0x1], 1 }
 0x703   :  { %2521 = vsyncpa [#allocation8], 1 }
 0x704   :  { %2523 = vsyncpa [#allocation8 + $0x1], 1 }
 0x705   :  { %2524 = vsyncpa [#allocation6], 1 }
 0x706   :  { %2526 = vsyncpa [#allocation6 + $0x1], 1 }

</bundles_post_ra>
